<compile_context>
chip_gen: v6e
topology: v6e:2x2x1
jax: 0.10.0
libtpu: 0.0.40
codegen_flags: <defaults>
</compile_context>

<pallas_src>
import functools

import jax
import jax.numpy as jnp
import numpy as np
from jax.experimental import pallas as pl
from jax.experimental.pallas import tpu as pltpu

LANE = 128      # TPU lane width: (height-pixel, channel) packed dim
W_OFF = 8       # sublane-aligned offset of the valid width region in the halo buffer
W_PAD_R = 8     # right-side width halo pad (aligned)


# ----------------------------------------------------------------------------
# Fused DnCNN kernel: one program per batch element, all L layers inside.
# ----------------------------------------------------------------------------
def _dncnn_fused_kernel(x_ref, w_ref, scale_ref, bias_ref, out_ref,
                        act_ref, slab_ref, *, GH, W, L, CH, h_tail):
    # x_ref:     (1, GH, W, 128)      f32  packed input (lane = ph*CH + ch)
    # w_ref:     (L, 3, 3*128, 128)   bf16 packed weights (dgh, dx*128+pi*CH+ci, po*CH+co)
    # scale_ref: (L, 1, 128)          f32  folded BN scale (tiled over height-pixels)
    # bias_ref:  (L, 1, 128)          f32  folded BN shift / conv bias (tiled)
    # out_ref:   (1, GH, W, 128)      f32
    # act_ref:   (GH+2, W_OFF+W+8, 128) bf16 VMEM: padded activation, zero halos
    # slab_ref:  ((GH+2)*W, 3*128)    bf16 VMEM: dx-shifted im2col slab
    WB = W_OFF + W + W_PAD_R
    R = GH * W              # output rows
    RS = (GH + 2) * W       # slab rows (includes top/bottom halo groups)

    # --- zero only the halo strips (interior is overwritten every layer) ---
    zrow = jnp.zeros((WB, LANE), jnp.bfloat16)
    act_ref[0, :, :] = zrow                        # top height-halo group
    act_ref[GH + 1, :, :] = zrow                   # bottom height-halo group
    act_ref[:, 0:W_OFF, :] = jnp.zeros((GH + 2, W_OFF, LANE), jnp.bfloat16)
    act_ref[:, W_OFF + W:WB, :] = jnp.zeros((GH + 2, W_PAD_R, LANE), jnp.bfloat16)

    # --- load input once into the bf16 resident activation buffer ---
    act_ref[1:1 + GH, W_OFF:W_OFF + W, :] = x_ref[0].astype(jnp.bfloat16)

    for layer in range(L):
        # --- 3-copy im2col over width shifts dx in {-1,0,+1} ---
        for dx in range(3):
            col = act_ref[:, W_OFF - 1 + dx:W_OFF - 1 + dx + W, :]   # (GH+2, W, 128)
            slab_ref[:, dx * LANE:(dx + 1) * LANE] = col.reshape(RS, LANE)

        # --- 3 accumulating MXU matmuls over height-group shifts dgh ---
        # row offset dgh*W is a free, sublane-aligned slice when W % 8 == 0
        y = jnp.dot(slab_ref[0:R, :], w_ref[layer, 0],
                    preferred_element_type=jnp.float32)
        y = y + jnp.dot(slab_ref[W:W + R, :], w_ref[layer, 1],
                        preferred_element_type=jnp.float32)
        y = y + jnp.dot(slab_ref[2 * W:2 * W + R, :], w_ref[layer, 2],
                        preferred_element_type=jnp.float32)

        # --- f32 epilogue: folded BN / conv bias ---
        y = y * scale_ref[layer] + bias_ref[layer]

        if layer < L - 1:
            y = jnp.maximum(y, 0.0)
            if h_tail:   # only traced when H % 8 != 0: keep padded image rows zero
                row = jax.lax.broadcasted_iota(jnp.int32, (R, LANE), 0)
                lane = jax.lax.broadcasted_iota(jnp.int32, (R, LANE), 1)
                keep = jnp.logical_or(row < (GH - 1) * W, (lane // CH) < h_tail)
                y = jnp.where(keep, y, 0.0)
            act_ref[1:1 + GH, W_OFF:W_OFF + W, :] = (
                y.reshape(GH, W, LANE).astype(jnp.bfloat16))
        else:
            # fused residual add (padded lanes are zero on both operands)
            y = y + x_ref[0].reshape(R, LANE)
            out_ref[0, :, :, :] = y.reshape(GH, W, LANE)


def dncnn_forward_pallas(x_nchw, packed):
    w_all, scale_all, bias_all = packed["w"], packed["scale"], packed["bias"]
    CH, PX = packed["ch"], packed["px"]
    L = w_all.shape[0]
    N, cin, H, W = x_nchw.shape
    GH = -(-H // PX)
    Hp = GH * PX
    h_tail = 0 if H % PX == 0 else H - (GH - 1) * PX

    # pack NCHW -> (N, GH, W, PX*CH): lane = (height-pixel-in-group, channel)
    x = jnp.transpose(x_nchw, (0, 2, 3, 1))                               # NHWC
    x = jnp.pad(x, ((0, 0), (0, Hp - H), (0, 0), (0, CH - cin)))
    x = x.reshape(N, GH, PX, W, CH).transpose(0, 1, 3, 2, 4).reshape(N, GH, W, LANE)

    kernel = functools.partial(_dncnn_fused_kernel,
                               GH=GH, W=W, L=L, CH=CH, h_tail=h_tail)

    flops = 2 * N * L * 3 * (GH * W) * (3 * LANE) * LANE
    bytes_accessed = (x.size * 4 + w_all.size * 2 + scale_all.size * 4
                      + bias_all.size * 4 + N * GH * W * LANE * 4)

    out = pl.pallas_call(
        kernel,
        out_shape=jax.ShapeDtypeStruct((N, GH, W, LANE), jnp.float32),
        grid_spec=pltpu.PrefetchScalarGridSpec(
            num_scalar_prefetch=0,
            grid=(N,),
            in_specs=[
                pl.BlockSpec((1, GH, W, LANE), lambda n: (n, 0, 0, 0)),
                pl.BlockSpec((L, 3, 3 * LANE, LANE), lambda n: (0, 0, 0, 0)),
                pl.BlockSpec((L, 1, LANE), lambda n: (0, 0, 0)),
                pl.BlockSpec((L, 1, LANE), lambda n: (0, 0, 0)),
            ],
            out_specs=pl.BlockSpec((1, GH, W, LANE), lambda n: (n, 0, 0, 0)),
            scratch_shapes=[
                pltpu.VMEM((GH + 2, W_OFF + W + W_PAD_R, LANE), jnp.bfloat16),
                pltpu.VMEM(((GH + 2) * W, 3 * LANE), jnp.bfloat16),
            ],
        ),
        compiler_params=pltpu.CompilerParams(
            dimension_semantics=("parallel",),
            vmem_limit_bytes=48 * 1024 * 1024),
        cost_estimate=pl.CostEstimate(
            flops=flops, transcendentals=0, bytes_accessed=bytes_accessed),
    )(x, w_all, scale_all, bias_all)

    # unpack (N, GH, W, 128) -> NCHW, drop height/channel padding
    out = out.reshape(N, GH, W, PX, CH).transpose(0, 1, 3, 2, 4)
    out = out.reshape(N, Hp, W, CH)[:, :H, :, :cin]
    return jnp.transpose(out, (0, 3, 1, 2))


# ----------------------------------------------------------------------------
# Parameter construction (deterministic, synthetic) + packing for the kernel
# ----------------------------------------------------------------------------
def init_dncnn_params(key, in_channels, bn_channels, depth, eps=1e-5):
    """Returns a list of (w[3,3,cin,cout], scale[cout], bias[cout]) per layer."""
    layers = []
    k = key

    def nrm(kk, shape, s=0.1):
        return s * jax.random.normal(kk, shape, jnp.float32)

    # first conv (with bias) + ReLU
    k, kw, kb = jax.random.split(k, 3)
    layers.append((nrm(kw, (3, 3, in_channels, bn_channels)),
                   jnp.ones((bn_channels,), jnp.float32),
                   nrm(kb, (bn_channels,), 0.05)))

    # depth x [conv (no bias) + BN(eval, folded) + ReLU]
    for _ in range(depth):
        k, kw, kg, kbt, km, kv = jax.random.split(k, 6)
        w = nrm(kw, (3, 3, bn_channels, bn_channels))
        gamma = 1.0 + nrm(kg, (bn_channels,), 0.05)
        beta = nrm(kbt, (bn_channels,), 0.05)
        mean = nrm(km, (bn_channels,), 0.05)
        var = 1.0 + 0.1 * jax.random.uniform(kv, (bn_channels,), jnp.float32)
        scale = gamma / jnp.sqrt(var + eps)
        shift = beta - mean * scale
        layers.append((w, scale, shift))

    # last conv (with bias), no ReLU
    k, kw, kb = jax.random.split(k, 3)
    layers.append((nrm(kw, (3, 3, bn_channels, in_channels)),
                   jnp.ones((in_channels,), jnp.float32),
                   nrm(kb, (in_channels,), 0.05)))
    return layers


def pack_params(layers, in_channels, bn_channels):
    """Space-to-channel lane packing of weights/scale/bias.

    Lane layout: lane = p*CH + c  (p = height pixel within a group of PX, c = channel).
    Per layer and per height-group shift dgh in {0,1,2} (= offset -1,0,+1), builds a
    (3*128, 128) matrix whose K dim is dx*128 + pi*CH + ci.
    """
    cmax = max(in_channels, bn_channels)
    assert cmax <= LANE, "channel counts above 128 not supported by this packing"
    CH = 1
    while CH < cmax:
        CH *= 2
    PX = LANE // CH

    L = len(layers)
    w_all = np.zeros((L, 3, 3, PX, CH, PX, CH), np.float32)
    s_all = np.zeros((L, 1, LANE), np.float32)
    b_all = np.zeros((L, 1, LANE), np.float32)
    for l, (w, s, b) in enumerate(layers):
        w = np.asarray(w); s = np.asarray(s); b = np.asarray(b)
        _, _, ci_l, co_l = w.shape
        for dgh in range(3):
            for po in range(PX):
                for pi in range(PX):
                    ky = (dgh - 1) * PX + pi - po + 1
                    if 0 <= ky <= 2:
                        w_all[l, dgh, :, pi, :ci_l, po, :co_l] = w[ky]
        s_pad = np.zeros((CH,), np.float32); s_pad[:co_l] = s
        b_pad = np.zeros((CH,), np.float32); b_pad[:co_l] = b
        s_all[l, 0] = np.tile(s_pad, PX)
        b_all[l, 0] = np.tile(b_pad, PX)
    w_all = jnp.asarray(w_all.reshape(L, 3, 3 * LANE, LANE), jnp.bfloat16)
    return {"w": w_all, "scale": jnp.asarray(s_all), "bias": jnp.asarray(b_all),
            "ch": CH, "px": PX}


# ----------------------------------------------------------------------------
# Pure-JAX reference (f32 activations; weights rounded to bf16 like the kernel)
# ----------------------------------------------------------------------------
def dncnn_forward_ref(x_nchw, layers):
    x = jnp.transpose(x_nchw, (0, 2, 3, 1))
    residual = x
    out = x
    L = len(layers)
    for i, (w, s, b) in enumerate(layers):
        w_bf = w.astype(jnp.bfloat16).astype(jnp.float32)
        y = jax.lax.conv_general_dilated(
            out, w_bf, window_strides=(1, 1), padding="SAME",
            dimension_numbers=("NHWC", "HWIO", "NHWC"))
        y = y * s + b
        out = jnp.maximum(y, 0.0) if i < L - 1 else y
    out = out + residual
    return jnp.transpose(out, (0, 3, 1, 2))


if __name__ == "__main__":
    # Small shapes consistent with the module: N=2, in_channels=1, 16x16,
    # bn_channels=16, depth=3  (=> L = depth + 2 = 5 conv layers).
    N, IN_C, H, W = 2, 1, 16, 16
    BN_C, DEPTH = 16, 3

    key = jax.random.PRNGKey(0)
    kx, kp = jax.random.split(key)
    x = jax.random.normal(kx, (N, IN_C, H, W), jnp.float32)   # NCHW like PyTorch
    layers = init_dncnn_params(kp, IN_C, BN_C, DEPTH)
    packed = pack_params(layers, IN_C, BN_C)

    out = jax.block_until_ready(dncnn_forward_pallas(x, packed))
    ref = jax.block_until_ready(dncnn_forward_ref(x, layers))

    np.testing.assert_allclose(np.asarray(out), np.asarray(ref),
                               rtol=5e-2, atol=5e-2)
    assert out.shape == x.shape and out.dtype == jnp.float32

    print("KERNEL_OK")
</pallas_src>

<mosaic_0001>
module attributes {stable_mosaic.version = 11 : i64} {
  func.func @_dncnn_fused_kernel(%arg0: i32, %arg1: memref<1x2x16x128xf32, #tpu.memory_space<vmem>>, %arg2: memref<5x3x384x128xbf16, #tpu.memory_space<vmem>>, %arg3: memref<5x1x128xf32, #tpu.memory_space<vmem>>, %arg4: memref<5x1x128xf32, #tpu.memory_space<vmem>>, %arg5: memref<1x2x16x128xf32, #tpu.memory_space<vmem>>, %arg6: memref<4x32x128xbf16, #tpu.memory_space<vmem>>, %arg7: memref<64x384xbf16, #tpu.memory_space<vmem>>) attributes {dimension_semantics = [#tpu.dimension_semantics<parallel>], iteration_bounds = array<i64: 2>, scalar_prefetch = 0 : i64, scratch_operands = 2 : i64, tpu.core_type = #tpu.core_type<tc>, window_params = [{transform_indices = @transform_0, window_bounds = array<i64: 1, 2, 16, 128>}, {pipeline_mode = #tpu.pipeline_mode<synchronous>, transform_indices = @transform_1, window_bounds = array<i64: 5, 3, 384, 128>}, {pipeline_mode = #tpu.pipeline_mode<synchronous>, transform_indices = @transform_2, window_bounds = array<i64: 5, 1, 128>}, {pipeline_mode = #tpu.pipeline_mode<synchronous>, transform_indices = @transform_3, window_bounds = array<i64: 5, 1, 128>}, {transform_indices = @transform_4, window_bounds = array<i64: 1, 2, 16, 128>}]} {
    %cst = arith.constant 0.000000e+00 : bf16
    %0 = vector.broadcast %cst : bf16 to vector<32x128xbf16>
    %c0 = arith.constant 0 : index
    %c0_0 = arith.constant 0 : index
    %c0_1 = arith.constant 0 : index
    %1 = vector.load %arg6[%c0, %c0_0, %c0_1] : memref<4x32x128xbf16, #tpu.memory_space<vmem>>, vector<1x32x128xbf16>
    %2 = vector.shape_cast %1 : vector<1x32x128xbf16> to vector<32x128xbf16>
    %3 = vector.shape_cast %0 : vector<32x128xbf16> to vector<1x32x128xbf16>
    tpu.vector_store %arg6[%c0, %c0_0, %c0_1], %3 {strides = array<i32>} : memref<4x32x128xbf16, #tpu.memory_space<vmem>>, vector<1x32x128xbf16>,
    %c3 = arith.constant 3 : index
    %c0_2 = arith.constant 0 : index
    %c0_3 = arith.constant 0 : index
    %4 = vector.load %arg6[%c3, %c0_2, %c0_3] : memref<4x32x128xbf16, #tpu.memory_space<vmem>>, vector<1x32x128xbf16>
    %5 = vector.shape_cast %4 : vector<1x32x128xbf16> to vector<32x128xbf16>
    %6 = vector.shape_cast %0 : vector<32x128xbf16> to vector<1x32x128xbf16>
    tpu.vector_store %arg6[%c3, %c0_2, %c0_3], %6 {strides = array<i32>} : memref<4x32x128xbf16, #tpu.memory_space<vmem>>, vector<1x32x128xbf16>,
    %cst_4 = arith.constant 0.000000e+00 : bf16
    %7 = vector.broadcast %cst_4 : bf16 to vector<4x8x128xbf16>
    %c0_5 = arith.constant 0 : index
    %c0_6 = arith.constant 0 : index
    %c0_7 = arith.constant 0 : index
    %8 = vector.load %arg6[%c0_5, %c0_6, %c0_7] : memref<4x32x128xbf16, #tpu.memory_space<vmem>>, vector<4x8x128xbf16>
    tpu.vector_store %arg6[%c0_5, %c0_6, %c0_7], %7 {strides = array<i32>} : memref<4x32x128xbf16, #tpu.memory_space<vmem>>, vector<4x8x128xbf16>,
    %cst_8 = arith.constant 0.000000e+00 : bf16
    %9 = vector.broadcast %cst_8 : bf16 to vector<4x8x128xbf16>
    %c0_9 = arith.constant 0 : index
    %c24 = arith.constant 24 : index
    %c0_10 = arith.constant 0 : index
    %10 = vector.load %arg6[%c0_9, %c24, %c0_10] : memref<4x32x128xbf16, #tpu.memory_space<vmem>>, vector<4x8x128xbf16>
    tpu.vector_store %arg6[%c0_9, %c24, %c0_10], %9 {strides = array<i32>} : memref<4x32x128xbf16, #tpu.memory_space<vmem>>, vector<4x8x128xbf16>,
    %c0_11 = arith.constant 0 : index
    %c0_12 = arith.constant 0 : index
    %c0_13 = arith.constant 0 : index
    %c0_14 = arith.constant 0 : index
    %11 = vector.load %arg1[%c0_11, %c0_12, %c0_13, %c0_14] : memref<1x2x16x128xf32, #tpu.memory_space<vmem>>, vector<1x2x16x128xf32>
    %12 = vector.shape_cast %11 : vector<1x2x16x128xf32> to vector<2x16x128xf32>
    %13 = arith.truncf %12 : vector<2x16x128xf32> to vector<2x16x128xbf16>
    %c1 = arith.constant 1 : index
    %c8 = arith.constant 8 : index
    %c0_15 = arith.constant 0 : index
    %14 = vector.load %arg6[%c1, %c8, %c0_15] : memref<4x32x128xbf16, #tpu.memory_space<vmem>>, vector<2x16x128xbf16>
    tpu.vector_store %arg6[%c1, %c8, %c0_15], %13 {strides = array<i32>} : memref<4x32x128xbf16, #tpu.memory_space<vmem>>, vector<2x16x128xbf16>,
    %c0_16 = arith.constant 0 : index
    %c7 = arith.constant 7 : index
    %c0_17 = arith.constant 0 : index
    %15 = vector.load %arg6[%c0_16, %c7, %c0_17] : memref<4x32x128xbf16, #tpu.memory_space<vmem>>, vector<4x16x128xbf16>
    %16 = vector.shape_cast %15 : vector<4x16x128xbf16> to vector<64x128xbf16>
    %c0_18 = arith.constant 0 : index
    %c0_19 = arith.constant 0 : index
    %17 = vector.load %arg7[%c0_18, %c0_19] : memref<64x384xbf16, #tpu.memory_space<vmem>>, vector<64x128xbf16>
    tpu.vector_store %arg7[%c0_18, %c0_19], %16 {strides = array<i32>} : memref<64x384xbf16, #tpu.memory_space<vmem>>, vector<64x128xbf16>,
    %c0_20 = arith.constant 0 : index
    %c8_21 = arith.constant 8 : index
    %c0_22 = arith.constant 0 : index
    %18 = vector.load %arg6[%c0_20, %c8_21, %c0_22] : memref<4x32x128xbf16, #tpu.memory_space<vmem>>, vector<4x16x128xbf16>
    %19 = vector.shape_cast %18 : vector<4x16x128xbf16> to vector<64x128xbf16>
    %c0_23 = arith.constant 0 : index
    %c128 = arith.constant 128 : index
    %20 = vector.load %arg7[%c0_23, %c128] : memref<64x384xbf16, #tpu.memory_space<vmem>>, vector<64x128xbf16>
    tpu.vector_store %arg7[%c0_23, %c128], %19 {strides = array<i32>} : memref<64x384xbf16, #tpu.memory_space<vmem>>, vector<64x128xbf16>,
    %c0_24 = arith.constant 0 : index
    %c9 = arith.constant 9 : index
    %c0_25 = arith.constant 0 : index
    %21 = vector.load %arg6[%c0_24, %c9, %c0_25] : memref<4x32x128xbf16, #tpu.memory_space<vmem>>, vector<4x16x128xbf16>
    %22 = vector.shape_cast %21 : vector<4x16x128xbf16> to vector<64x128xbf16>
    %c0_26 = arith.constant 0 : index
    %c256 = arith.constant 256 : index
    %23 = vector.load %arg7[%c0_26, %c256] : memref<64x384xbf16, #tpu.memory_space<vmem>>, vector<64x128xbf16>
    tpu.vector_store %arg7[%c0_26, %c256], %22 {strides = array<i32>} : memref<64x384xbf16, #tpu.memory_space<vmem>>, vector<64x128xbf16>,
    %c0_27 = arith.constant 0 : index
    %c0_28 = arith.constant 0 : index
    %24 = vector.load %arg7[%c0_27, %c0_28] : memref<64x384xbf16, #tpu.memory_space<vmem>>, vector<32x384xbf16>
    %c0_29 = arith.constant 0 : index
    %c0_30 = arith.constant 0 : index
    %c0_31 = arith.constant 0 : index
    %c0_32 = arith.constant 0 : index
    %25 = vector.load %arg2[%c0_29, %c0_30, %c0_31, %c0_32] : memref<5x3x384x128xbf16, #tpu.memory_space<vmem>>, vector<1x1x384x128xbf16>
    %26 = vector.shape_cast %25 : vector<1x1x384x128xbf16> to vector<384x128xbf16>
    %cst_33 = arith.constant dense<0.000000e+00> : vector<32x128xf32>
    %27 = tpu.matmul %24, %26, %cst_33 {dimension_numbers = #tpu.dot_dimension_numbers<[1], [0], [0], [1], [0, 0, 1, 1], [], []>} : vector<32x384xbf16>, vector<384x128xbf16>, vector<32x128xf32> -> vector<32x128xf32>
    %c16 = arith.constant 16 : index
    %c0_34 = arith.constant 0 : index
    %28 = vector.load %arg7[%c16, %c0_34] : memref<64x384xbf16, #tpu.memory_space<vmem>>, vector<32x384xbf16>
    %c0_35 = arith.constant 0 : index
    %c1_36 = arith.constant 1 : index
    %c0_37 = arith.constant 0 : index
    %c0_38 = arith.constant 0 : index
    %29 = vector.load %arg2[%c0_35, %c1_36, %c0_37, %c0_38] : memref<5x3x384x128xbf16, #tpu.memory_space<vmem>>, vector<1x1x384x128xbf16>
    %30 = vector.shape_cast %29 : vector<1x1x384x128xbf16> to vector<384x128xbf16>
    %cst_39 = arith.constant dense<0.000000e+00> : vector<32x128xf32>
    %31 = tpu.matmul %28, %30, %cst_39 {dimension_numbers = #tpu.dot_dimension_numbers<[1], [0], [0], [1], [0, 0, 1, 1], [], []>} : vector<32x384xbf16>, vector<384x128xbf16>, vector<32x128xf32> -> vector<32x128xf32>
    %32 = arith.addf %27, %31 : vector<32x128xf32>
    %c32 = arith.constant 32 : index
    %c0_40 = arith.constant 0 : index
    %33 = vector.load %arg7[%c32, %c0_40] : memref<64x384xbf16, #tpu.memory_space<vmem>>, vector<32x384xbf16>
    %c0_41 = arith.constant 0 : index
    %c2 = arith.constant 2 : index
    %c0_42 = arith.constant 0 : index
    %c0_43 = arith.constant 0 : index
    %34 = vector.load %arg2[%c0_41, %c2, %c0_42, %c0_43] : memref<5x3x384x128xbf16, #tpu.memory_space<vmem>>, vector<1x1x384x128xbf16>
    %35 = vector.shape_cast %34 : vector<1x1x384x128xbf16> to vector<384x128xbf16>
    %cst_44 = arith.constant dense<0.000000e+00> : vector<32x128xf32>
    %36 = tpu.matmul %33, %35, %cst_44 {dimension_numbers = #tpu.dot_dimension_numbers<[1], [0], [0], [1], [0, 0, 1, 1], [], []>} : vector<32x384xbf16>, vector<384x128xbf16>, vector<32x128xf32> -> vector<32x128xf32>
    %37 = arith.addf %32, %36 : vector<32x128xf32>
    %c0_45 = arith.constant 0 : index
    %c0_46 = arith.constant 0 : index
    %c0_47 = arith.constant 0 : index
    %38 = vector.load %arg3[%c0_45, %c0_46, %c0_47] : memref<5x1x128xf32, #tpu.memory_space<vmem>>, vector<1x1x128xf32>
    %39 = vector.shape_cast %38 : vector<1x1x128xf32> to vector<1x128xf32>
    %40 = vector.broadcast %39 : vector<1x128xf32> to vector<32x128xf32>
    %41 = arith.mulf %37, %40 : vector<32x128xf32>
    %c0_48 = arith.constant 0 : index
    %c0_49 = arith.constant 0 : index
    %c0_50 = arith.constant 0 : index
    %42 = vector.load %arg4[%c0_48, %c0_49, %c0_50] : memref<5x1x128xf32, #tpu.memory_space<vmem>>, vector<1x1x128xf32>
    %43 = vector.shape_cast %42 : vector<1x1x128xf32> to vector<1x128xf32>
    %44 = vector.broadcast %43 : vector<1x128xf32> to vector<32x128xf32>
    %45 = arith.addf %41, %44 : vector<32x128xf32>
    %cst_51 = arith.constant 0.000000e+00 : f32
    %46 = vector.broadcast %cst_51 : f32 to vector<32x128xf32>
    %47 = arith.maximumf %45, %46 : vector<32x128xf32>
    %48 = vector.shape_cast %47 : vector<32x128xf32> to vector<2x16x128xf32>
    %49 = arith.truncf %48 : vector<2x16x128xf32> to vector<2x16x128xbf16>
    %c1_52 = arith.constant 1 : index
    %c8_53 = arith.constant 8 : index
    %c0_54 = arith.constant 0 : index
    %50 = vector.load %arg6[%c1_52, %c8_53, %c0_54] : memref<4x32x128xbf16, #tpu.memory_space<vmem>>, vector<2x16x128xbf16>
    tpu.vector_store %arg6[%c1_52, %c8_53, %c0_54], %49 {strides = array<i32>} : memref<4x32x128xbf16, #tpu.memory_space<vmem>>, vector<2x16x128xbf16>,
    %c0_55 = arith.constant 0 : index
    %c7_56 = arith.constant 7 : index
    %c0_57 = arith.constant 0 : index
    %51 = vector.load %arg6[%c0_55, %c7_56, %c0_57] : memref<4x32x128xbf16, #tpu.memory_space<vmem>>, vector<4x16x128xbf16>
    %52 = vector.shape_cast %51 : vector<4x16x128xbf16> to vector<64x128xbf16>
    %c0_58 = arith.constant 0 : index
    %c0_59 = arith.constant 0 : index
    %53 = vector.load %arg7[%c0_58, %c0_59] : memref<64x384xbf16, #tpu.memory_space<vmem>>, vector<64x128xbf16>
    tpu.vector_store %arg7[%c0_58, %c0_59], %52 {strides = array<i32>} : memref<64x384xbf16, #tpu.memory_space<vmem>>, vector<64x128xbf16>,
    %c0_60 = arith.constant 0 : index
    %c8_61 = arith.constant 8 : index
    %c0_62 = arith.constant 0 : index
    %54 = vector.load %arg6[%c0_60, %c8_61, %c0_62] : memref<4x32x128xbf16, #tpu.memory_space<vmem>>, vector<4x16x128xbf16>
    %55 = vector.shape_cast %54 : vector<4x16x128xbf16> to vector<64x128xbf16>
    %c0_63 = arith.constant 0 : index
    %c128_64 = arith.constant 128 : index
    %56 = vector.load %arg7[%c0_63, %c128_64] : memref<64x384xbf16, #tpu.memory_space<vmem>>, vector<64x128xbf16>
    tpu.vector_store %arg7[%c0_63, %c128_64], %55 {strides = array<i32>} : memref<64x384xbf16, #tpu.memory_space<vmem>>, vector<64x128xbf16>,
    %c0_65 = arith.constant 0 : index
    %c9_66 = arith.constant 9 : index
    %c0_67 = arith.constant 0 : index
    %57 = vector.load %arg6[%c0_65, %c9_66, %c0_67] : memref<4x32x128xbf16, #tpu.memory_space<vmem>>, vector<4x16x128xbf16>
    %58 = vector.shape_cast %57 : vector<4x16x128xbf16> to vector<64x128xbf16>
    %c0_68 = arith.constant 0 : index
    %c256_69 = arith.constant 256 : index
    %59 = vector.load %arg7[%c0_68, %c256_69] : memref<64x384xbf16, #tpu.memory_space<vmem>>, vector<64x128xbf16>
    tpu.vector_store %arg7[%c0_68, %c256_69], %58 {strides = array<i32>} : memref<64x384xbf16, #tpu.memory_space<vmem>>, vector<64x128xbf16>,
    %c0_70 = arith.constant 0 : index
    %c0_71 = arith.constant 0 : index
    %60 = vector.load %arg7[%c0_70, %c0_71] : memref<64x384xbf16, #tpu.memory_space<vmem>>, vector<32x384xbf16>
    %c1_72 = arith.constant 1 : index
    %c0_73 = arith.constant 0 : index
    %c0_74 = arith.constant 0 : index
    %c0_75 = arith.constant 0 : index
    %61 = vector.load %arg2[%c1_72, %c0_73, %c0_74, %c0_75] : memref<5x3x384x128xbf16, #tpu.memory_space<vmem>>, vector<1x1x384x128xbf16>
    %62 = vector.shape_cast %61 : vector<1x1x384x128xbf16> to vector<384x128xbf16>
    %cst_76 = arith.constant dense<0.000000e+00> : vector<32x128xf32>
    %63 = tpu.matmul %60, %62, %cst_76 {dimension_numbers = #tpu.dot_dimension_numbers<[1], [0], [0], [1], [0, 0, 1, 1], [], []>} : vector<32x384xbf16>, vector<384x128xbf16>, vector<32x128xf32> -> vector<32x128xf32>
    %c16_77 = arith.constant 16 : index
    %c0_78 = arith.constant 0 : index
    %64 = vector.load %arg7[%c16_77, %c0_78] : memref<64x384xbf16, #tpu.memory_space<vmem>>, vector<32x384xbf16>
    %c1_79 = arith.constant 1 : index
    %c1_80 = arith.constant 1 : index
    %c0_81 = arith.constant 0 : index
    %c0_82 = arith.constant 0 : index
    %65 = vector.load %arg2[%c1_79, %c1_80, %c0_81, %c0_82] : memref<5x3x384x128xbf16, #tpu.memory_space<vmem>>, vector<1x1x384x128xbf16>
    %66 = vector.shape_cast %65 : vector<1x1x384x128xbf16> to vector<384x128xbf16>
    %cst_83 = arith.constant dense<0.000000e+00> : vector<32x128xf32>
    %67 = tpu.matmul %64, %66, %cst_83 {dimension_numbers = #tpu.dot_dimension_numbers<[1], [0], [0], [1], [0, 0, 1, 1], [], []>} : vector<32x384xbf16>, vector<384x128xbf16>, vector<32x128xf32> -> vector<32x128xf32>
    %68 = arith.addf %63, %67 : vector<32x128xf32>
    %c32_84 = arith.constant 32 : index
    %c0_85 = arith.constant 0 : index
    %69 = vector.load %arg7[%c32_84, %c0_85] : memref<64x384xbf16, #tpu.memory_space<vmem>>, vector<32x384xbf16>
    %c1_86 = arith.constant 1 : index
    %c2_87 = arith.constant 2 : index
    %c0_88 = arith.constant 0 : index
    %c0_89 = arith.constant 0 : index
    %70 = vector.load %arg2[%c1_86, %c2_87, %c0_88, %c0_89] : memref<5x3x384x128xbf16, #tpu.memory_space<vmem>>, vector<1x1x384x128xbf16>
    %71 = vector.shape_cast %70 : vector<1x1x384x128xbf16> to vector<384x128xbf16>
    %cst_90 = arith.constant dense<0.000000e+00> : vector<32x128xf32>
    %72 = tpu.matmul %69, %71, %cst_90 {dimension_numbers = #tpu.dot_dimension_numbers<[1], [0], [0], [1], [0, 0, 1, 1], [], []>} : vector<32x384xbf16>, vector<384x128xbf16>, vector<32x128xf32> -> vector<32x128xf32>
    %73 = arith.addf %68, %72 : vector<32x128xf32>
    %c1_91 = arith.constant 1 : index
    %c0_92 = arith.constant 0 : index
    %c0_93 = arith.constant 0 : index
    %74 = vector.load %arg3[%c1_91, %c0_92, %c0_93] : memref<5x1x128xf32, #tpu.memory_space<vmem>>, vector<1x1x128xf32>
    %75 = vector.shape_cast %74 : vector<1x1x128xf32> to vector<1x128xf32>
    %76 = vector.broadcast %75 : vector<1x128xf32> to vector<32x128xf32>
    %77 = arith.mulf %73, %76 : vector<32x128xf32>
    %c1_94 = arith.constant 1 : index
    %c0_95 = arith.constant 0 : index
    %c0_96 = arith.constant 0 : index
    %78 = vector.load %arg4[%c1_94, %c0_95, %c0_96] : memref<5x1x128xf32, #tpu.memory_space<vmem>>, vector<1x1x128xf32>
    %79 = vector.shape_cast %78 : vector<1x1x128xf32> to vector<1x128xf32>
    %80 = vector.broadcast %79 : vector<1x128xf32> to vector<32x128xf32>
    %81 = arith.addf %77, %80 : vector<32x128xf32>
    %cst_97 = arith.constant 0.000000e+00 : f32
    %82 = vector.broadcast %cst_97 : f32 to vector<32x128xf32>
    %83 = arith.maximumf %81, %82 : vector<32x128xf32>
    %84 = vector.shape_cast %83 : vector<32x128xf32> to vector<2x16x128xf32>
    %85 = arith.truncf %84 : vector<2x16x128xf32> to vector<2x16x128xbf16>
    %c1_98 = arith.constant 1 : index
    %c8_99 = arith.constant 8 : index
    %c0_100 = arith.constant 0 : index
    %86 = vector.load %arg6[%c1_98, %c8_99, %c0_100] : memref<4x32x128xbf16, #tpu.memory_space<vmem>>, vector<2x16x128xbf16>
    tpu.vector_store %arg6[%c1_98, %c8_99, %c0_100], %85 {strides = array<i32>} : memref<4x32x128xbf16, #tpu.memory_space<vmem>>, vector<2x16x128xbf16>,
    %c0_101 = arith.constant 0 : index
    %c7_102 = arith.constant 7 : index
    %c0_103 = arith.constant 0 : index
    %87 = vector.load %arg6[%c0_101, %c7_102, %c0_103] : memref<4x32x128xbf16, #tpu.memory_space<vmem>>, vector<4x16x128xbf16>
    %88 = vector.shape_cast %87 : vector<4x16x128xbf16> to vector<64x128xbf16>
    %c0_104 = arith.constant 0 : index
    %c0_105 = arith.constant 0 : index
    %89 = vector.load %arg7[%c0_104, %c0_105] : memref<64x384xbf16, #tpu.memory_space<vmem>>, vector<64x128xbf16>
    tpu.vector_store %arg7[%c0_104, %c0_105], %88 {strides = array<i32>} : memref<64x384xbf16, #tpu.memory_space<vmem>>, vector<64x128xbf16>,
    %c0_106 = arith.constant 0 : index
    %c8_107 = arith.constant 8 : index
    %c0_108 = arith.constant 0 : index
    %90 = vector.load %arg6[%c0_106, %c8_107, %c0_108] : memref<4x32x128xbf16, #tpu.memory_space<vmem>>, vector<4x16x128xbf16>
    %91 = vector.shape_cast %90 : vector<4x16x128xbf16> to vector<64x128xbf16>
    %c0_109 = arith.constant 0 : index
    %c128_110 = arith.constant 128 : index
    %92 = vector.load %arg7[%c0_109, %c128_110] : memref<64x384xbf16, #tpu.memory_space<vmem>>, vector<64x128xbf16>
    tpu.vector_store %arg7[%c0_109, %c128_110], %91 {strides = array<i32>} : memref<64x384xbf16, #tpu.memory_space<vmem>>, vector<64x128xbf16>,
    %c0_111 = arith.constant 0 : index
    %c9_112 = arith.constant 9 : index
    %c0_113 = arith.constant 0 : index
    %93 = vector.load %arg6[%c0_111, %c9_112, %c0_113] : memref<4x32x128xbf16, #tpu.memory_space<vmem>>, vector<4x16x128xbf16>
    %94 = vector.shape_cast %93 : vector<4x16x128xbf16> to vector<64x128xbf16>
    %c0_114 = arith.constant 0 : index
    %c256_115 = arith.constant 256 : index
    %95 = vector.load %arg7[%c0_114, %c256_115] : memref<64x384xbf16, #tpu.memory_space<vmem>>, vector<64x128xbf16>
    tpu.vector_store %arg7[%c0_114, %c256_115], %94 {strides = array<i32>} : memref<64x384xbf16, #tpu.memory_space<vmem>>, vector<64x128xbf16>,
    %c0_116 = arith.constant 0 : index
    %c0_117 = arith.constant 0 : index
    %96 = vector.load %arg7[%c0_116, %c0_117] : memref<64x384xbf16, #tpu.memory_space<vmem>>, vector<32x384xbf16>
    %c2_118 = arith.constant 2 : index
    %c0_119 = arith.constant 0 : index
    %c0_120 = arith.constant 0 : index
    %c0_121 = arith.constant 0 : index
    %97 = vector.load %arg2[%c2_118, %c0_119, %c0_120, %c0_121] : memref<5x3x384x128xbf16, #tpu.memory_space<vmem>>, vector<1x1x384x128xbf16>
    %98 = vector.shape_cast %97 : vector<1x1x384x128xbf16> to vector<384x128xbf16>
    %cst_122 = arith.constant dense<0.000000e+00> : vector<32x128xf32>
    %99 = tpu.matmul %96, %98, %cst_122 {dimension_numbers = #tpu.dot_dimension_numbers<[1], [0], [0], [1], [0, 0, 1, 1], [], []>} : vector<32x384xbf16>, vector<384x128xbf16>, vector<32x128xf32> -> vector<32x128xf32>
    %c16_123 = arith.constant 16 : index
    %c0_124 = arith.constant 0 : index
    %100 = vector.load %arg7[%c16_123, %c0_124] : memref<64x384xbf16, #tpu.memory_space<vmem>>, vector<32x384xbf16>
    %c2_125 = arith.constant 2 : index
    %c1_126 = arith.constant 1 : index
    %c0_127 = arith.constant 0 : index
    %c0_128 = arith.constant 0 : index
    %101 = vector.load %arg2[%c2_125, %c1_126, %c0_127, %c0_128] : memref<5x3x384x128xbf16, #tpu.memory_space<vmem>>, vector<1x1x384x128xbf16>
    %102 = vector.shape_cast %101 : vector<1x1x384x128xbf16> to vector<384x128xbf16>
    %cst_129 = arith.constant dense<0.000000e+00> : vector<32x128xf32>
    %103 = tpu.matmul %100, %102, %cst_129 {dimension_numbers = #tpu.dot_dimension_numbers<[1], [0], [0], [1], [0, 0, 1, 1], [], []>} : vector<32x384xbf16>, vector<384x128xbf16>, vector<32x128xf32> -> vector<32x128xf32>
    %104 = arith.addf %99, %103 : vector<32x128xf32>
    %c32_130 = arith.constant 32 : index
    %c0_131 = arith.constant 0 : index
    %105 = vector.load %arg7[%c32_130, %c0_131] : memref<64x384xbf16, #tpu.memory_space<vmem>>, vector<32x384xbf16>
    %c2_132 = arith.constant 2 : index
    %c2_133 = arith.constant 2 : index
    %c0_134 = arith.constant 0 : index
    %c0_135 = arith.constant 0 : index
    %106 = vector.load %arg2[%c2_132, %c2_133, %c0_134, %c0_135] : memref<5x3x384x128xbf16, #tpu.memory_space<vmem>>, vector<1x1x384x128xbf16>
    %107 = vector.shape_cast %106 : vector<1x1x384x128xbf16> to vector<384x128xbf16>
    %cst_136 = arith.constant dense<0.000000e+00> : vector<32x128xf32>
    %108 = tpu.matmul %105, %107, %cst_136 {dimension_numbers = #tpu.dot_dimension_numbers<[1], [0], [0], [1], [0, 0, 1, 1], [], []>} : vector<32x384xbf16>, vector<384x128xbf16>, vector<32x128xf32> -> vector<32x128xf32>
    %109 = arith.addf %104, %108 : vector<32x128xf32>
    %c2_137 = arith.constant 2 : index
    %c0_138 = arith.constant 0 : index
    %c0_139 = arith.constant 0 : index
    %110 = vector.load %arg3[%c2_137, %c0_138, %c0_139] : memref<5x1x128xf32, #tpu.memory_space<vmem>>, vector<1x1x128xf32>
    %111 = vector.shape_cast %110 : vector<1x1x128xf32> to vector<1x128xf32>
    %112 = vector.broadcast %111 : vector<1x128xf32> to vector<32x128xf32>
    %113 = arith.mulf %109, %112 : vector<32x128xf32>
    %c2_140 = arith.constant 2 : index
    %c0_141 = arith.constant 0 : index
    %c0_142 = arith.constant 0 : index
    %114 = vector.load %arg4[%c2_140, %c0_141, %c0_142] : memref<5x1x128xf32, #tpu.memory_space<vmem>>, vector<1x1x128xf32>
    %115 = vector.shape_cast %114 : vector<1x1x128xf32> to vector<1x128xf32>
    %116 = vector.broadcast %115 : vector<1x128xf32> to vector<32x128xf32>
    %117 = arith.addf %113, %116 : vector<32x128xf32>
    %cst_143 = arith.constant 0.000000e+00 : f32
    %118 = vector.broadcast %cst_143 : f32 to vector<32x128xf32>
    %119 = arith.maximumf %117, %118 : vector<32x128xf32>
    %120 = vector.shape_cast %119 : vector<32x128xf32> to vector<2x16x128xf32>
    %121 = arith.truncf %120 : vector<2x16x128xf32> to vector<2x16x128xbf16>
    %c1_144 = arith.constant 1 : index
    %c8_145 = arith.constant 8 : index
    %c0_146 = arith.constant 0 : index
    %122 = vector.load %arg6[%c1_144, %c8_145, %c0_146] : memref<4x32x128xbf16, #tpu.memory_space<vmem>>, vector<2x16x128xbf16>
    tpu.vector_store %arg6[%c1_144, %c8_145, %c0_146], %121 {strides = array<i32>} : memref<4x32x128xbf16, #tpu.memory_space<vmem>>, vector<2x16x128xbf16>,
    %c0_147 = arith.constant 0 : index
    %c7_148 = arith.constant 7 : index
    %c0_149 = arith.constant 0 : index
    %123 = vector.load %arg6[%c0_147, %c7_148, %c0_149] : memref<4x32x128xbf16, #tpu.memory_space<vmem>>, vector<4x16x128xbf16>
    %124 = vector.shape_cast %123 : vector<4x16x128xbf16> to vector<64x128xbf16>
    %c0_150 = arith.constant 0 : index
    %c0_151 = arith.constant 0 : index
    %125 = vector.load %arg7[%c0_150, %c0_151] : memref<64x384xbf16, #tpu.memory_space<vmem>>, vector<64x128xbf16>
    tpu.vector_store %arg7[%c0_150, %c0_151], %124 {strides = array<i32>} : memref<64x384xbf16, #tpu.memory_space<vmem>>, vector<64x128xbf16>,
    %c0_152 = arith.constant 0 : index
    %c8_153 = arith.constant 8 : index
    %c0_154 = arith.constant 0 : index
    %126 = vector.load %arg6[%c0_152, %c8_153, %c0_154] : memref<4x32x128xbf16, #tpu.memory_space<vmem>>, vector<4x16x128xbf16>
    %127 = vector.shape_cast %126 : vector<4x16x128xbf16> to vector<64x128xbf16>
    %c0_155 = arith.constant 0 : index
    %c128_156 = arith.constant 128 : index
    %128 = vector.load %arg7[%c0_155, %c128_156] : memref<64x384xbf16, #tpu.memory_space<vmem>>, vector<64x128xbf16>
    tpu.vector_store %arg7[%c0_155, %c128_156], %127 {strides = array<i32>} : memref<64x384xbf16, #tpu.memory_space<vmem>>, vector<64x128xbf16>,
    %c0_157 = arith.constant 0 : index
    %c9_158 = arith.constant 9 : index
    %c0_159 = arith.constant 0 : index
    %129 = vector.load %arg6[%c0_157, %c9_158, %c0_159] : memref<4x32x128xbf16, #tpu.memory_space<vmem>>, vector<4x16x128xbf16>
    %130 = vector.shape_cast %129 : vector<4x16x128xbf16> to vector<64x128xbf16>
    %c0_160 = arith.constant 0 : index
    %c256_161 = arith.constant 256 : index
    %131 = vector.load %arg7[%c0_160, %c256_161] : memref<64x384xbf16, #tpu.memory_space<vmem>>, vector<64x128xbf16>
    tpu.vector_store %arg7[%c0_160, %c256_161], %130 {strides = array<i32>} : memref<64x384xbf16, #tpu.memory_space<vmem>>, vector<64x128xbf16>,
    %c0_162 = arith.constant 0 : index
    %c0_163 = arith.constant 0 : index
    %132 = vector.load %arg7[%c0_162, %c0_163] : memref<64x384xbf16, #tpu.memory_space<vmem>>, vector<32x384xbf16>
    %c3_164 = arith.constant 3 : index
    %c0_165 = arith.constant 0 : index
    %c0_166 = arith.constant 0 : index
    %c0_167 = arith.constant 0 : index
    %133 = vector.load %arg2[%c3_164, %c0_165, %c0_166, %c0_167] : memref<5x3x384x128xbf16, #tpu.memory_space<vmem>>, vector<1x1x384x128xbf16>
    %134 = vector.shape_cast %133 : vector<1x1x384x128xbf16> to vector<384x128xbf16>
    %cst_168 = arith.constant dense<0.000000e+00> : vector<32x128xf32>
    %135 = tpu.matmul %132, %134, %cst_168 {dimension_numbers = #tpu.dot_dimension_numbers<[1], [0], [0], [1], [0, 0, 1, 1], [], []>} : vector<32x384xbf16>, vector<384x128xbf16>, vector<32x128xf32> -> vector<32x128xf32>
    %c16_169 = arith.constant 16 : index
    %c0_170 = arith.constant 0 : index
    %136 = vector.load %arg7[%c16_169, %c0_170] : memref<64x384xbf16, #tpu.memory_space<vmem>>, vector<32x384xbf16>
    %c3_171 = arith.constant 3 : index
    %c1_172 = arith.constant 1 : index
    %c0_173 = arith.constant 0 : index
    %c0_174 = arith.constant 0 : index
    %137 = vector.load %arg2[%c3_171, %c1_172, %c0_173, %c0_174] : memref<5x3x384x128xbf16, #tpu.memory_space<vmem>>, vector<1x1x384x128xbf16>
    %138 = vector.shape_cast %137 : vector<1x1x384x128xbf16> to vector<384x128xbf16>
    %cst_175 = arith.constant dense<0.000000e+00> : vector<32x128xf32>
    %139 = tpu.matmul %136, %138, %cst_175 {dimension_numbers = #tpu.dot_dimension_numbers<[1], [0], [0], [1], [0, 0, 1, 1], [], []>} : vector<32x384xbf16>, vector<384x128xbf16>, vector<32x128xf32> -> vector<32x128xf32>
    %140 = arith.addf %135, %139 : vector<32x128xf32>
    %c32_176 = arith.constant 32 : index
    %c0_177 = arith.constant 0 : index
    %141 = vector.load %arg7[%c32_176, %c0_177] : memref<64x384xbf16, #tpu.memory_space<vmem>>, vector<32x384xbf16>
    %c3_178 = arith.constant 3 : index
    %c2_179 = arith.constant 2 : index
    %c0_180 = arith.constant 0 : index
    %c0_181 = arith.constant 0 : index
    %142 = vector.load %arg2[%c3_178, %c2_179, %c0_180, %c0_181] : memref<5x3x384x128xbf16, #tpu.memory_space<vmem>>, vector<1x1x384x128xbf16>
    %143 = vector.shape_cast %142 : vector<1x1x384x128xbf16> to vector<384x128xbf16>
    %cst_182 = arith.constant dense<0.000000e+00> : vector<32x128xf32>
    %144 = tpu.matmul %141, %143, %cst_182 {dimension_numbers = #tpu.dot_dimension_numbers<[1], [0], [0], [1], [0, 0, 1, 1], [], []>} : vector<32x384xbf16>, vector<384x128xbf16>, vector<32x128xf32> -> vector<32x128xf32>
    %145 = arith.addf %140, %144 : vector<32x128xf32>
    %c3_183 = arith.constant 3 : index
    %c0_184 = arith.constant 0 : index
    %c0_185 = arith.constant 0 : index
    %146 = vector.load %arg3[%c3_183, %c0_184, %c0_185] : memref<5x1x128xf32, #tpu.memory_space<vmem>>, vector<1x1x128xf32>
    %147 = vector.shape_cast %146 : vector<1x1x128xf32> to vector<1x128xf32>
    %148 = vector.broadcast %147 : vector<1x128xf32> to vector<32x128xf32>
    %149 = arith.mulf %145, %148 : vector<32x128xf32>
    %c3_186 = arith.constant 3 : index
    %c0_187 = arith.constant 0 : index
    %c0_188 = arith.constant 0 : index
    %150 = vector.load %arg4[%c3_186, %c0_187, %c0_188] : memref<5x1x128xf32, #tpu.memory_space<vmem>>, vector<1x1x128xf32>
    %151 = vector.shape_cast %150 : vector<1x1x128xf32> to vector<1x128xf32>
    %152 = vector.broadcast %151 : vector<1x128xf32> to vector<32x128xf32>
    %153 = arith.addf %149, %152 : vector<32x128xf32>
    %cst_189 = arith.constant 0.000000e+00 : f32
    %154 = vector.broadcast %cst_189 : f32 to vector<32x128xf32>
    %155 = arith.maximumf %153, %154 : vector<32x128xf32>
    %156 = vector.shape_cast %155 : vector<32x128xf32> to vector<2x16x128xf32>
    %157 = arith.truncf %156 : vector<2x16x128xf32> to vector<2x16x128xbf16>
    %c1_190 = arith.constant 1 : index
    %c8_191 = arith.constant 8 : index
    %c0_192 = arith.constant 0 : index
    %158 = vector.load %arg6[%c1_190, %c8_191, %c0_192] : memref<4x32x128xbf16, #tpu.memory_space<vmem>>, vector<2x16x128xbf16>
    tpu.vector_store %arg6[%c1_190, %c8_191, %c0_192], %157 {strides = array<i32>} : memref<4x32x128xbf16, #tpu.memory_space<vmem>>, vector<2x16x128xbf16>,
    %c0_193 = arith.constant 0 : index
    %c7_194 = arith.constant 7 : index
    %c0_195 = arith.constant 0 : index
    %159 = vector.load %arg6[%c0_193, %c7_194, %c0_195] : memref<4x32x128xbf16, #tpu.memory_space<vmem>>, vector<4x16x128xbf16>
    %160 = vector.shape_cast %159 : vector<4x16x128xbf16> to vector<64x128xbf16>
    %c0_196 = arith.constant 0 : index
    %c0_197 = arith.constant 0 : index
    %161 = vector.load %arg7[%c0_196, %c0_197] : memref<64x384xbf16, #tpu.memory_space<vmem>>, vector<64x128xbf16>
    tpu.vector_store %arg7[%c0_196, %c0_197], %160 {strides = array<i32>} : memref<64x384xbf16, #tpu.memory_space<vmem>>, vector<64x128xbf16>,
    %c0_198 = arith.constant 0 : index
    %c8_199 = arith.constant 8 : index
    %c0_200 = arith.constant 0 : index
    %162 = vector.load %arg6[%c0_198, %c8_199, %c0_200] : memref<4x32x128xbf16, #tpu.memory_space<vmem>>, vector<4x16x128xbf16>
    %163 = vector.shape_cast %162 : vector<4x16x128xbf16> to vector<64x128xbf16>
    %c0_201 = arith.constant 0 : index
    %c128_202 = arith.constant 128 : index
    %164 = vector.load %arg7[%c0_201, %c128_202] : memref<64x384xbf16, #tpu.memory_space<vmem>>, vector<64x128xbf16>
    tpu.vector_store %arg7[%c0_201, %c128_202], %163 {strides = array<i32>} : memref<64x384xbf16, #tpu.memory_space<vmem>>, vector<64x128xbf16>,
    %c0_203 = arith.constant 0 : index
    %c9_204 = arith.constant 9 : index
    %c0_205 = arith.constant 0 : index
    %165 = vector.load %arg6[%c0_203, %c9_204, %c0_205] : memref<4x32x128xbf16, #tpu.memory_space<vmem>>, vector<4x16x128xbf16>
    %166 = vector.shape_cast %165 : vector<4x16x128xbf16> to vector<64x128xbf16>
    %c0_206 = arith.constant 0 : index
    %c256_207 = arith.constant 256 : index
    %167 = vector.load %arg7[%c0_206, %c256_207] : memref<64x384xbf16, #tpu.memory_space<vmem>>, vector<64x128xbf16>
    tpu.vector_store %arg7[%c0_206, %c256_207], %166 {strides = array<i32>} : memref<64x384xbf16, #tpu.memory_space<vmem>>, vector<64x128xbf16>,
    %c0_208 = arith.constant 0 : index
    %c0_209 = arith.constant 0 : index
    %168 = vector.load %arg7[%c0_208, %c0_209] : memref<64x384xbf16, #tpu.memory_space<vmem>>, vector<32x384xbf16>
    %c4 = arith.constant 4 : index
    %c0_210 = arith.constant 0 : index
    %c0_211 = arith.constant 0 : index
    %c0_212 = arith.constant 0 : index
    %169 = vector.load %arg2[%c4, %c0_210, %c0_211, %c0_212] : memref<5x3x384x128xbf16, #tpu.memory_space<vmem>>, vector<1x1x384x128xbf16>
    %170 = vector.shape_cast %169 : vector<1x1x384x128xbf16> to vector<384x128xbf16>
    %cst_213 = arith.constant dense<0.000000e+00> : vector<32x128xf32>
    %171 = tpu.matmul %168, %170, %cst_213 {dimension_numbers = #tpu.dot_dimension_numbers<[1], [0], [0], [1], [0, 0, 1, 1], [], []>} : vector<32x384xbf16>, vector<384x128xbf16>, vector<32x128xf32> -> vector<32x128xf32>
    %c16_214 = arith.constant 16 : index
    %c0_215 = arith.constant 0 : index
    %172 = vector.load %arg7[%c16_214, %c0_215] : memref<64x384xbf16, #tpu.memory_space<vmem>>, vector<32x384xbf16>
    %c4_216 = arith.constant 4 : index
    %c1_217 = arith.constant 1 : index
    %c0_218 = arith.constant 0 : index
    %c0_219 = arith.constant 0 : index
    %173 = vector.load %arg2[%c4_216, %c1_217, %c0_218, %c0_219] : memref<5x3x384x128xbf16, #tpu.memory_space<vmem>>, vector<1x1x384x128xbf16>
    %174 = vector.shape_cast %173 : vector<1x1x384x128xbf16> to vector<384x128xbf16>
    %cst_220 = arith.constant dense<0.000000e+00> : vector<32x128xf32>
    %175 = tpu.matmul %172, %174, %cst_220 {dimension_numbers = #tpu.dot_dimension_numbers<[1], [0], [0], [1], [0, 0, 1, 1], [], []>} : vector<32x384xbf16>, vector<384x128xbf16>, vector<32x128xf32> -> vector<32x128xf32>
    %176 = arith.addf %171, %175 : vector<32x128xf32>
    %c32_221 = arith.constant 32 : index
    %c0_222 = arith.constant 0 : index
    %177 = vector.load %arg7[%c32_221, %c0_222] : memref<64x384xbf16, #tpu.memory_space<vmem>>, vector<32x384xbf16>
    %c4_223 = arith.constant 4 : index
    %c2_224 = arith.constant 2 : index
    %c0_225 = arith.constant 0 : index
    %c0_226 = arith.constant 0 : index
    %178 = vector.load %arg2[%c4_223, %c2_224, %c0_225, %c0_226] : memref<5x3x384x128xbf16, #tpu.memory_space<vmem>>, vector<1x1x384x128xbf16>
    %179 = vector.shape_cast %178 : vector<1x1x384x128xbf16> to vector<384x128xbf16>
    %cst_227 = arith.constant dense<0.000000e+00> : vector<32x128xf32>
    %180 = tpu.matmul %177, %179, %cst_227 {dimension_numbers = #tpu.dot_dimension_numbers<[1], [0], [0], [1], [0, 0, 1, 1], [], []>} : vector<32x384xbf16>, vector<384x128xbf16>, vector<32x128xf32> -> vector<32x128xf32>
    %181 = arith.addf %176, %180 : vector<32x128xf32>
    %c4_228 = arith.constant 4 : index
    %c0_229 = arith.constant 0 : index
    %c0_230 = arith.constant 0 : index
    %182 = vector.load %arg3[%c4_228, %c0_229, %c0_230] : memref<5x1x128xf32, #tpu.memory_space<vmem>>, vector<1x1x128xf32>
    %183 = vector.shape_cast %182 : vector<1x1x128xf32> to vector<1x128xf32>
    %184 = vector.broadcast %183 : vector<1x128xf32> to vector<32x128xf32>
    %185 = arith.mulf %181, %184 : vector<32x128xf32>
    %c4_231 = arith.constant 4 : index
    %c0_232 = arith.constant 0 : index
    %c0_233 = arith.constant 0 : index
    %186 = vector.load %arg4[%c4_231, %c0_232, %c0_233] : memref<5x1x128xf32, #tpu.memory_space<vmem>>, vector<1x1x128xf32>
    %187 = vector.shape_cast %186 : vector<1x1x128xf32> to vector<1x128xf32>
    %188 = vector.broadcast %187 : vector<1x128xf32> to vector<32x128xf32>
    %189 = arith.addf %185, %188 : vector<32x128xf32>
    %c0_234 = arith.constant 0 : index
    %c0_235 = arith.constant 0 : index
    %c0_236 = arith.constant 0 : index
    %c0_237 = arith.constant 0 : index
    %190 = vector.load %arg1[%c0_234, %c0_235, %c0_236, %c0_237] : memref<1x2x16x128xf32, #tpu.memory_space<vmem>>, vector<1x2x16x128xf32>
    %191 = vector.shape_cast %190 : vector<1x2x16x128xf32> to vector<2x16x128xf32>
    %192 = vector.shape_cast %191 : vector<2x16x128xf32> to vector<32x128xf32>
    %193 = arith.addf %189, %192 : vector<32x128xf32>
    %194 = vector.shape_cast %193 : vector<32x128xf32> to vector<2x16x128xf32>
    %c0_238 = arith.constant 0 : index
    %c0_239 = arith.constant 0 : index
    %c0_240 = arith.constant 0 : index
    %c0_241 = arith.constant 0 : index
    %195 = vector.load %arg5[%c0_238, %c0_239, %c0_240, %c0_241] : memref<1x2x16x128xf32, #tpu.memory_space<vmem>>, vector<1x2x16x128xf32>
    %196 = vector.shape_cast %195 : vector<1x2x16x128xf32> to vector<2x16x128xf32>
    %197 = vector.shape_cast %194 : vector<2x16x128xf32> to vector<1x2x16x128xf32>
    tpu.vector_store %arg5[%c0_238, %c0_239, %c0_240, %c0_241], %197 {strides = array<i32>} : memref<1x2x16x128xf32, #tpu.memory_space<vmem>>, vector<1x2x16x128xf32>,
    return
  }
  func.func @transform_0(%arg0: i32) -> (i32, i32, i32, i32) {
    %c0_i32 = arith.constant 0 : i32
    %c0_i32_0 = arith.constant 0 : i32
    %c0_i32_1 = arith.constant 0 : i32
    %c0_i32_2 = arith.constant 0 : i32
    return %arg0, %c0_i32, %c0_i32_0, %c0_i32_1 : i32, i32, i32, i32
  }
  func.func @transform_1(%arg0: i32) -> (i32, i32, i32, i32) {
    %c0_i32 = arith.constant 0 : i32
    %c0_i32_0 = arith.constant 0 : i32
    %c0_i32_1 = arith.constant 0 : i32
    %c0_i32_2 = arith.constant 0 : i32
    %c0_i32_3 = arith.constant 0 : i32
    return %c0_i32, %c0_i32_0, %c0_i32_1, %c0_i32_2 : i32, i32, i32, i32
  }
  func.func @transform_2(%arg0: i32) -> (i32, i32, i32) {
    %c0_i32 = arith.constant 0 : i32
    %c0_i32_0 = arith.constant 0 : i32
    %c0_i32_1 = arith.constant 0 : i32
    %c0_i32_2 = arith.constant 0 : i32
    return %c0_i32, %c0_i32_0, %c0_i32_1 : i32, i32, i32
  }
  func.func @transform_3(%arg0: i32) -> (i32, i32, i32) {
    %c0_i32 = arith.constant 0 : i32
    %c0_i32_0 = arith.constant 0 : i32
    %c0_i32_1 = arith.constant 0 : i32
    %c0_i32_2 = arith.constant 0 : i32
    return %c0_i32, %c0_i32_0, %c0_i32_1 : i32, i32, i32
  }
  func.func @transform_4(%arg0: i32) -> (i32, i32, i32, i32) {
    %c0_i32 = arith.constant 0 : i32
    %c0_i32_0 = arith.constant 0 : i32
    %c0_i32_1 = arith.constant 0 : i32
    %c0_i32_2 = arith.constant 0 : i32
    return %arg0, %c0_i32, %c0_i32_0, %c0_i32_1 : i32, i32, i32, i32
  }
}

</mosaic_0001>

<bundles_post_ra>
// kernel: tpu_custom_call.1
= control target key start
LH: loop header
LB: loop body
LE: loop exit
PB: predicated region body
PF: predicated region fallthrough
CT: control target
= control target key end

     0   :  { %9 = vsyncpa [#allocation5], 0  ;;  %s9663_s0 = inlined_call_operand.hbm [shape: f32[2,2,16,128], index: 0, kind: input, shape index: {}]   ;;  %s9664_s1 = inlined_call_operand.hbm [shape: bf16[5,3,384,128], index: 1, kind: input, shape index: {}]   ;;  %s9665_s2 = inlined_call_operand.hbm [shape: f32[5,1,128], index: 2, kind: input, shape index: {}]   ;;  %s9666_s3 = inlined_call_operand.hbm [shape: f32[5,1,128], index: 3, kind: input, shape index: {}]   ;;  %s9667_s4 = inlined_call_operand.hbm [shape: f32[2,2,16,128], index: 4, kind: output, shape index: {}]  }
   0x1   :  { %11 = vsyncpa [#allocation5 + $0x1], 0 }
   0x2   :  { %12 = vsyncpa [#allocation8], 0 }
   0x3   :  { %13 = vsyncpa [#allocation11], 0 }
   0x4   :  { %14 = vsyncpa [#allocation6], 0 }
   0x5   :  { %16 = vsyncpa [#allocation6 + $0x1], 0  ;;  %s8957_s15 = smov 0   ;;  %s8959_s16 = smov 0  }
   0x6   :  { %s8961_s17 = smov 0   ;;  %s8963_s18 = smov 0  }
   0x7 LB: > { %s8978_s19 = sadd.s32 4294967295, %s8916_s18   ;;  %s6815_s20 = sadd.s32 4294967294, %s8916_s18   ;;  %s8916_s18 = sphi %s8963_s18, %s9694_s18   ;;  %s8912_s17 = sphi %s8961_s17, %s9693_s17   ;;  %s8908_s16 = sphi %s8959_s16, %s9692_s16   ;;  %s8904_s15 = sphi %s8957_s15, %s9691_s15  }
   0x8   : > { %p42_p0 = scmp.ne.s32.totalorder %s8908_s16, %s8904_s15  ;;  %p9668_p1 = scmp.eq.s32.totalorder %s8978_s19, 0 }
   0x9   : > { %p129_p2 = scmp.eq.s32.totalorder %s8978_s19, 1  ;;  %p135_p3 = scmp.eq.s32.totalorder %s6815_s20, 1 }
   0xa   : > { %p8987_p4 = por %p9668_p1, %p42_p0  ;;  %p6816_p5 = scmp.ge.s32.totalorder %s8916_s18, 1 }
   0xb   : > { %p8992_p6 = por %p135_p3, %p42_p0  ;;  %p142_p7 = scmp.lt.s32.totalorder %s8916_s18, 3 }
   0xc   : > { %s9672_s21 = scalar_select %p8987_p4, 1, 0 }
   0xd   : > { %s9673_s22 = scalar_select %p8992_p6, 1, 0 }
   0xe   : > { %p8997_p8 = pnand %p6816_p5, %p142_p7  ;;  %s8918_s24 = smov [#allocation7]  }
   0xf   : > { %s154_s25 = sshll.u32 %s8918_s24, 4  ;;  %s8919_s27 = smov [#allocation9]   ;;  %s155_s25 = int_to_ptr.vmem [resolvable:$true] %s154_s25 }
  0x10   : > { %s9674_s23 = scalar_select %p8997_p8, 1, 0 }
  0x11   : > { %p8228_p9 = pneg %p8997_p8  ;;  %s167_s28 = sshll.u32 %s8919_s27, 4  ;;  %s9010_s28 = int_to_ptr.vmem [resolvable:$true] %s167_s28 }
  0x12   : > { %s8749_s29 = scalar_lea.vmem %s155_s25, 46080  ;;  %p8757_p5 = scmp.lt.s32.totalorder %s155_s25, %s155_s25 }
  0x13   : > { %p9006_p11 = pnand %p8228_p9, %p9668_p1  ;;  %p8750_p13 = scmp.ne.s32.totalorder %s155_s25, %s8749_s29 }
  0x14   : > { %p8758_p7 = scmp.lt.s32.totalorder %s8749_s29, %s8749_s29 }
  0x15   : > { %p8740_p12 = pneg %p9006_p11 }
  0x16   : > { %p8759_p9 = por %p8758_p7, %p8757_p5 }
  0x17   : > { %p8752_p0 = pnand %p8750_p13, %p8740_p12 }
  0x19   : > { %p8753_p3 = pneg %p8752_p0 }
  0x1b   : > { %p8760_p10 = pnand %p8759_p9, %p8753_p3 }
  0x1d   : > { %8763 = shalt.err (!%p8760_p10)
}
  0x1e   : > { %s8920_s30 = smov 64   ;;  %s8921_s5 = smov 4  }
  0x1f   : > { %8231 = dma.hbm_to_vmem [thread:$0]  (!%p9006_p11), %s9664_s1, 46080, %s155_s25, [#allocation8], %s8920_s30, %s8920_s30, %s8921_s5  }
  0x20   : > { %s8775_s8 = scalar_lea.vmem %s9010_s28, 80  ;;  %s8782_s9 = scalar_lea.vmem %s9010_s28, 96 }
  0x21   : > { %p8776_p13 = scmp.ne.s32.totalorder %s9010_s28, %s8775_s8  ;;  %p8783_p10 = scmp.lt.s32.totalorder %s9010_s28, %s9010_s28 }
  0x22   : > { %p8784_p5 = scmp.lt.s32.totalorder %s8782_s9, %s8775_s8 }
  0x23   : > { %p8778_p0 = pnand %p8776_p13, %p8740_p12 }
  0x24   : > { %p8785_p7 = por %p8784_p5, %p8783_p10 }
  0x25   : > { %p8779_p3 = pneg %p8778_p0 }
  0x27   : > { %p8786_p9 = pnand %p8785_p7, %p8779_p3 }
  0x29   : > { %8789 = shalt.err (!%p8786_p9)
}
  0x2a   : > { %s8922_s10 = smov 16   ;;  %s8923_s11 = smov 1  }
  0x2b   : > { %8234 = dma.hbm_to_vmem [thread:$0]  (!%p9006_p11), %s9665_s2, 80, %s9010_s28, [#allocation8], %s8922_s10, %s8922_s10, %s8923_s11  }
  0x2c   : > { %s8924_s14 = smov [#allocation10]   ;;  %s9037_s24 = sadd.s32 1, %s8916_s18  }
  0x2d   : > { %s180_s20 = sshll.u32 %s8924_s14, 4  ;;  %s181_s20 = int_to_ptr.vmem [resolvable:$true] %s180_s20 }
  0x2e   : > { %s8801_s25 = scalar_lea.vmem %s181_s20, 80  ;;  %s8808_s27 = scalar_lea.vmem %s181_s20, 96 }
  0x2f   : > { %p8802_p13 = scmp.ne.s32.totalorder %s181_s20, %s8801_s25  ;;  %p8809_p10 = scmp.lt.s32.totalorder %s181_s20, %s181_s20 }
  0x30   : > { %p8810_p5 = scmp.lt.s32.totalorder %s8808_s27, %s8801_s25 }
  0x31   : > { %p8804_p0 = pnand %p8802_p13, %p8740_p12 }
  0x32   : > { %p8811_p7 = por %p8810_p5, %p8809_p10 }
  0x33   : > { %p8805_p3 = pneg %p8804_p0 }
  0x35   : > { %p8812_p9 = pnand %p8811_p7, %p8805_p3 }
  0x37   : > { %8815 = shalt.err (!%p8812_p9)
}
  0x38   : > { %8237 = dma.hbm_to_vmem [thread:$0]  (!%p9006_p11), %s9666_s3, 80, %s181_s20, [#allocation11], %s8922_s10, %s8922_s10, %s8923_s11  }
  0x39   : > { %s26_s30 = ssub.s32 %s8916_s18, %s9037_s24  ;;  %s29_s5 = sadd.s32 1, %s8912_s17 }
  0x3a   : > { %p27_p12 = scmp.eq.s32.totalorder %s26_s30, 0  ;;  %p36_p13 = scmp.ne.s32.totalorder %s8912_s17, %s8908_s16 }
  0x3b   : > { %p37_p0 = scmp.eq.s32.totalorder %s8916_s18, 0  ;;  %p8249_p3 = scmp.lt.s32.totalorder %s8916_s18, 2 }
  0x3c   : > { %s9055_s26 = scalar_select %p27_p12, %s8912_s17, %s29_s5  }
  0x3d   : > { %p38_p10 = por %p37_p0, %p36_p13  ;;  %p9059_p5 = por %p129_p2, %p36_p13 }
  0x3e   : > { %s194_s7 = sand.u32 1, %s8912_s17   ;;  %s7320_s8 = sshll.u32 %s8916_s18, 9 }
  0x3f   : > { %s9676_s6 = scalar_select %p9059_p5, 1, 0 }
  0x40   : > { %s6821_s9 = sshll.u32 %s194_s7, 5  ;;  %s9068_s10 = scalar_lea.hbm %s9663_s0, %s7320_s8 }
  0x41   : > { %s198_s11 = scalar_lea.vmem [#allocation4], %s6821_s9  ;;  %p9070_p11 = pnand %p8249_p3, %p38_p10 }
  0x42   : > { %s205_s14 = sshll.u32 %s198_s11, 4  ;;  %s9076_s25 = scalar_lea.sflag [#allocation5], %s194_s7  ;;  %s9074_s14 = int_to_ptr.vmem [resolvable:$true] %s205_s14 }
  0x43   : > { %s8816_s27 = scalar_lea.hbm %s9068_s10, 512  ;;  %p8818_p7 = pneg %p9070_p11 }
  0x44   : > { %p8817_p2 = scmp.ne.s32.totalorder %s9068_s10, %s8816_s27  ;;  %s8821_s30 = scalar_lea.hbm %s9663_s0, 1024 }
  0x45   : > { %p8822_p13 = scmp.lt.s32.totalorder %s9068_s10, %s9663_s0  ;;  %p8823_p0 = scmp.lt.s32.totalorder %s8821_s30, %s8816_s27 }
  0x46   : > { %p8819_p9 = pnand %p8818_p7, %p8817_p2 }
  0x47   : > { %p8824_p3 = por %p8823_p0, %p8822_p13 }
  0x48   : > { %p8820_p12 = pneg %p8819_p9 }
  0x4a   : > { %p8825_p10 = pnand %p8824_p3, %p8820_p12 }
  0x4c   : > { %8828 = shalt.err (!%p8825_p10)
}
  0x4d   : > { %s8829_s7 = scalar_lea.vmem %s9074_s14, 512  ;;  %s8925_s9 = smov [#allocation4]  }
  0x4e   : > { %p8830_p1 = scmp.ne.s32.totalorder %s9074_s14, %s8829_s7  ;;  %s8834_s12 = sshll.u32 %s8925_s9, 4  ;;  %s8835_s12 = int_to_ptr.vmem [resolvable:$false] %s8834_s12 }
  0x4f   : > { %s8836_s13 = scalar_lea.vmem %s8835_s12, 1024  ;;  %p8837_p9 = scmp.lt.s32.totalorder %s9074_s14, %s8835_s12 }
  0x50   : > { %p8832_p6 = pnand %p8830_p1, %p8818_p7  ;;  %p8838_p5 = scmp.lt.s32.totalorder %s8836_s13, %s8829_s7 }
  0x52   : > { %p8833_p2 = pneg %p8832_p6  ;;  %p8839_p4 = por %p8838_p5, %p8837_p9 }
  0x54   : > { %p8840_p8 = pnand %p8839_p4, %p8833_p2 }
  0x56   : > { %8843 = shalt.err (!%p8840_p8)
}
  0x57   : > { %s8926_s11 = smov 128   ;;  %s8927_s27 = smov 8  }
  0x58   : > { %8241 = dma.hbm_to_vmem [thread:$0]  (!%p9070_p11), %s9068_s10, 512, %s9074_s14, %s9076_s25, %s8926_s11, %s8926_s11, %s8927_s27  }
  0x59   : > { %p9678_p1 = scmp.ne.s32.totalorder %s9674_s23, 0 }
  0x5a   : > { %s9100_s28 = sand.u32 (!%p9678_p1), 1, %s8908_s16   ;;  %p9679_p4 = scmp.ne.s32.totalorder (!%p9678_p1), %s9672_s21, 0 }
  0x5b   : > { %217 = sbr.rel (%p9678_p1) target bundleno = 1668 (0x684), region = 36  ;;  %s6825_s29 = sshll.u32 (!%p9678_p1), %s9100_s28, 5 }
  0x5c   : > { %s220_s30 = scalar_lea.sflag (!%p9678_p1), [#allocation5], %s9100_s28  ;;  %s9106_s5 = scalar_lea.vmem (!%p9678_p1), [#allocation4], %s6825_s29 }
  0x60   : > { %8887 = dma.done.wait (%p9679_p4), %s220_s30, 512  }
  0x61   : > { %8889 = vsyncadd (%p9679_p4), %s220_s30, 4294966784  ;;  %p9680_p6 = scmp.eq.s32.totalorder %s8978_s19, 0 }
  0x63   : > { %8891 = dma.done.wait (%p9680_p6), [#allocation8], 46160   ;;  %p9681_p8 = pmov %p9680_p6 }
  0x64   : > { %p9682_p5 = pmov %p9680_p6 }
  0x65   : > { %8893 = vsyncadd (%p9681_p8), [#allocation8], 4294921136 }
  0x66   : > { %8895 = dma.done.wait (%p9682_p5), [#allocation11], 80   ;;  %p9683_p11 = pmov %p9682_p5 }
  0x67   : > { %v8928_v0 = vmov 0   ;;  %v8298_v1 = vld [vmem:[#allocation7 + $0x138] sm:$0xff]   ;;  %v8301_v4 = vld [vmem:[#allocation7 + $0x130] sm:$0xff]   ;;  %v8304_v7 = vld [vmem:[#allocation7 + $0x128] sm:$0xff]   ;;  %vm315_vm0 = vsmask.f32 256 }
  0x68   : > { %8897 = vsyncadd (%p9683_p11), [#allocation11], 4294967216  ;;  %271 = vst [vmem:[#allocation2 + $0x10] sm:$0xf] %v8928_v0  ;;  %v8299_v2 = vld [vmem:[#allocation7 + $0xf8] sm:$0xff]   ;;  %7342 = vmatprep.subr.bf16.mxu0 %v8298_v1  ;;  %v8302_v5 = vld [vmem:[#allocation7 + $0xf0] sm:$0xff]  }
  0x69   : > { %261 = vst [vmem:[#allocation2] sm:$0xf] %v8928_v0  ;;  %262 = vst [vmem:[#allocation2 + $0x4] sm:$0xf] %v8928_v0  ;;  %v8300_v3 = vld [vmem:[#allocation7 + $0x178] sm:$0xff]   ;;  %7343 = vmatpush3.bf16.msra.mxu0 %v8299_v2  ;;  %v8303_v6 = vld [vmem:[#allocation7 + $0x170] sm:$0xff]  }
  0x6a   : > { %263 = vst [vmem:[#allocation2 + $0x8] sm:$0xf] %v8928_v0  ;;  %264 = vst [vmem:[#allocation2 + $0xc] sm:$0xf] %v8928_v0  ;;  %7912 = vmatprep.subr.bf16.mxu1 %v8300_v3  ;;  %7344 = vmatprep.subr.bf16.mxu0 %v8301_v4  ;;  %v8305_v8 = vld [vmem:[#allocation7 + $0xe8] sm:$0xff]   ;;  %v8307_v10 = vld [vmem:[#allocation7 + $0x120] sm:$0xff]  }
  0x6b   : > { %266 = vst [vmem:[#allocation2 + $0x30] sm:$0xf] %v8928_v0  ;;  %267 = vst [vmem:[#allocation2 + $0x34] sm:$0xf] %v8928_v0  ;;  %7913 = vmatpush3.bf16.msra.mxu1 %v8300_v3  ;;  %v8306_v9 = vld [vmem:[#allocation7 + $0x168] sm:$0xff]   ;;  %v8308_v11 = vld [vmem:[#allocation7 + $0xe0] sm:$0xff]  }
  0x6c   : > { %268 = vst [vmem:[#allocation2 + $0x38] sm:$0xf] %v8928_v0  ;;  %269 = vst [vmem:[#allocation2 + $0x3c] sm:$0xf] %v8928_v0  ;;  %7914 = vmatprep.subr.bf16.mxu1 %v8303_v6  ;;  %v8309_v12 = vld [vmem:[#allocation7 + $0x160] sm:$0xff]   ;;  %v8310_v13 = vld [vmem:[#allocation7 + $0x118] sm:$0xff]  }
  0x6d   : > { %272 = vst [vmem:[#allocation2 + $0x20] sm:$0xf] %v8928_v0  ;;  %275 = vst [vmem:[#allocation2 + $0x1c] sm:$0xf] %v8928_v0  ;;  %7345 = vmatpush3.bf16.msra.mxu0 %v8302_v5  ;;  %v8312_v14 = vld [vmem:[#allocation7 + $0x158] sm:$0xff]   ;;  %v8313_v16 = vld [vmem:[#allocation7 + $0x110] sm:$0xff]  }
  0x6e   : > { %276 = vst [vmem:[#allocation2 + $0x2c] sm:$0xf] %v8928_v0  ;;  %270 = vst [vmem:[#allocation2] sm:$0xf] %v8928_v0  ;;  %7346 = vmatprep.subr.bf16.mxu0 %v8304_v7  ;;  %v8311_v15 = vld [vmem:[#allocation7 + $0xd8] sm:$0xff]   ;;  %v8315_v17 = vld [vmem:[#allocation7 + $0x150] sm:$0xff]  }
  0x6f   : > { %273 = vst [vmem:[#allocation2 + $0x30] sm:$0xf] %v8928_v0  ;;  %274 = vst [vmem:[#allocation2 + $0xc] sm:$0xf] %v8928_v0  ;;  %7915 = vmatpush3.bf16.msra.mxu1 %v8303_v6  ;;  %v8314_v18 = vld [vmem:[#allocation7 + $0xd0] sm:$0xff]   ;;  %v8316_v19 = vld [vmem:[#allocation7 + $0x108] sm:$0xff]  }
  0x70   : > { %277 = vst [vmem:[#allocation2 + $0x3c] sm:$0xf] %v8928_v0  ;;  %7916 = vmatprep.subr.bf16.mxu1 %v8306_v9  ;;  %v8317_v20 = vld [vmem:[#allocation7 + $0xc8] sm:$0xff]   ;;  %v8319_v22 = vld [vmem:[#allocation7 + $0x100] sm:$0xff]   ;;  %v306_v25 = vld [vmem:[#allocation2 + $0x10] sm:$0x8] }
  0x71   : > { %7347 = vmatpush3.bf16.msra.mxu0 %v8305_v8  ;;  %v8318_v21 = vld [vmem:[#allocation7 + $0x148] sm:$0xff]   ;;  %v278_v23 = vld [vmem:[%s9106_s5] sm:$0xff]  ;;  %v341_v31 = vshrl.u32 %v306_v25, 16  ;;  %v280_v32 = vld [vmem:[%s9106_s5 + $0x10] sm:$0xff]  ;;  %vm316_vm1 = vsmask.f32 4368 }
  0x72   : > { %7348 = vmatprep.subr.bf16.mxu0 %v8307_v10  ;;  %v279_v24 = vld [vmem:[%s9106_s5 + $0x8] sm:$0xff]  ;;  %v8321_v26 = vld [vmem:[#allocation7 + $0x140] sm:$0xff]   ;;  %v7321_v27 = vpack.c.bf16 %v278_v23, %v278_v23  ;;  %v281_v33 = vld [vmem:[%s9106_s5 + $0x18] sm:$0xff]  ;;  %v7323_v35 = vpack.c.bf16 %v280_v32, %v280_v32  ;;  %vm450_vm2 = vsmask.f32 3328  ;;  %s259_s21 = scalar_lea.vmem [#allocation12], %s6825_s29 }
  0x73   : > { %7917 = vmatpush3.bf16.msra.mxu1 %v8306_v9  ;;  %v7322_v28 = vpack.c.bf16 %v279_v24, %v279_v24  ;;  %v8320_v30 = vld [vmem:[#allocation7 + $0xc0] sm:$0xff]   ;;  %v8325_v34 = vld [vmem:[#allocation7 + $0x78] sm:$0xff]   ;;  %v7324_v36 = vpack.c.bf16 %v281_v33, %v281_v33  ;;  %v6835_v39 = vrot.slane %v341_v31, 11  ;;  %vm451_vm3 = vsmask.f32 7440  ;;  %vm9136_vm4 = vmor %vm315_vm0, %vm316_vm1  ;;  %s7341_s23 = sshll.u32 %s8978_s19, 9 }
  0x74   : > { %7918 = vmatprep.subr.bf16.mxu1 %v8309_v12  ;;  %v443_v29 = vld [vmem:[#allocation2 + $0x1c] sm:$0x1]  ;;  %299 = vst [vmem:[#allocation2 + $0x14] sm:$0xf] %v7321_v27  ;;  %301 = vst [vmem:[#allocation2 + $0x24] sm:$0xf] %v7323_v35  ;;  %s9618_s25 = scalar_lea.hbm %s9667_s4, %s7341_s23 }
  0x75   : > { %7349 = vmatpush3.bf16.msra.mxu0 %v8308_v11  ;;  %300 = vst [vmem:[#allocation2 + $0x18] sm:$0xf] %v7322_v28  ;;  %v497_v37 = vshll.u32 %v443_v29, 16  ;;  %v9124_v38 = vld [vmem:[#allocation7 + $0xb8] sm:$0xff]   ;;  %302 = vst [vmem:[#allocation2 + $0x28] sm:$0xf] %v7324_v36 }
  0x76   : > { %7350 = vmatprep.subr.bf16.mxu0 %v8310_v13  ;;  %v9126_v40 = vld [vmem:[#allocation2 + $0x2c] sm:$0x1]  ;;  %v309_v41 = vld [vmem:[#allocation2 + $0x20] sm:$0x8]  ;;  %vm9146_vm5 = vmor %vm450_vm2, %vm451_vm3  ;;  %s6713_s10 = sshll.u32 %s259_s21, 4  ;;  %s6700_s8 = scalar_lea.sflag [#allocation6], %s9100_s28  ;;  %s9620_s10 = int_to_ptr.vmem [resolvable:$true] %s6713_s10 }
  0x77   : > { %7919 = vmatpush3.bf16.msra.mxu1 %v8309_v12  ;;  %v9128_v42 = vrot.slane %v497_v37, 5  ;;  %v363_v43 = vshrl.u32 %v309_v41, 16  ;;  %v521_v54 = vshll.u32 %v9126_v40, 16  ;;  %v8685_v23 = vld [vmem:[#allocation7 + $0x9b0] sm:$0xff]   ;;  %s8844_s7 = scalar_lea.vmem %s9620_s10, 512  ;;  %p9688_p12 = scmp.ne.s32.totalorder %s9676_s6, 0 }
  0x78   : > { %7920 = vmatprep.subr.bf16.mxu1 %v8312_v14  ;;  %p8845_p7 = scmp.ne.s32.totalorder %s9620_s10, %s8844_s7  ;;  %s8929_s19 = smov [#allocation12]  }
  0x79   : > { %7351 = vmatpush3.bf16.msra.mxu0 %v8311_v15  ;;  %v9132_v55 = vrot.slane %v363_v43, 11  ;;  %v523_v33 = vrot.slane %v521_v54, 5  ;;  %s8848_s9 = sshll.u32 %s8929_s19, 4  ;;  %s8849_s9 = int_to_ptr.vmem [resolvable:$false] %s8848_s9 }
  0x7a   : > { %7352 = vmatprep.subr.bf16.mxu0 %v8313_v16  ;;  %p8846_p13 = pnand %p8845_p7, %p9688_p12  ;;  %s8850_s12 = scalar_lea.vmem %s8849_s9, 1024 }
  0x7b   : > { %7921 = vmatpush3.bf16.msra.mxu1 %v8312_v14  ;;  %v307_v44 = vld [vmem:[#allocation2 + $0x14] sm:$0xf]  ;;  %v444_v60 = vld [vmem:[#allocation2 + $0x24] sm:$0xf]  ;;  %p8851_p3 = scmp.lt.s32.totalorder %s9620_s10, %s8849_s9  ;;  %p8852_p10 = scmp.lt.s32.totalorder %s8850_s12, %s8844_s7 }
  0x7c   : > { %7922 = vmatprep.subr.bf16.mxu1 %v8315_v17  ;;  %v308_v45 = vld [vmem:[#allocation2 + $0x18] sm:$0xf]  ;;  %v424_v46 = vld [vmem:[#allocation2 + $0x14] sm:$0xf]  ;;  %v346_v47 = vshrl.u32 %v307_v44, 16  ;;  %v349_v48 = vshll.u32 %v307_v44, 16  ;;  %p8847_p0 = pneg %p8846_p13 }
  0x7d   : > { %7353 = vmatpush3.bf16.msra.mxu0 %v8314_v18  ;;  %v355_v49 = vshrl.u32 %v308_v45, 16  ;;  %v358_v50 = vshll.u32 %v308_v45, 16  ;;  %v425_v51 = vld [vmem:[#allocation2 + $0x18] sm:$0xf]  ;;  %432 = vst [vmem:[#allocation3 + $0x1c] sm:$0xf] %v424_v46  ;;  %p8853_p2 = por %p8852_p10, %p8851_p3 }
  0x7e   : > { %7354 = vmatprep.subr.bf16.mxu0 %v8316_v19  ;;  %433 = vst [vmem:[#allocation3 + $0x28] sm:$0xf] %v425_v51  ;;  %v441_v52 = vld [vmem:[#allocation2 + $0x14] sm:$0xf]  ;;  %v442_v53 = vld [vmem:[#allocation2 + $0x18] sm:$0xf] }
  0x7f   : > { %7923 = vmatpush3.bf16.msra.mxu1 %v8315_v17  ;;  %v348_v56 = vrot.slane %v346_v47, 7  ;;  %v357_v57 = vrot.slane %v355_v49, 7  ;;  %v478_v58 = vshrl.u32 %v441_v52, 16  ;;  %v481_v59 = vshll.u32 %v441_v52, 16  ;;  %v445_v0 = vld [vmem:[#allocation2 + $0x28] sm:$0xf]  ;;  %p8854_p9 = pnand %p8853_p2, %p8847_p0 }
  0x80   : > { %7924 = vmatprep.subr.bf16.mxu1 %v8318_v21  ;;  %v487_v62 = vshll.u32 %v442_v53, 16  ;;  %v491_v63 = vshrl.u32 %v442_v53, 16  ;;  %v502_v1 = vshrl.u32 %v444_v60, 16  ;;  %v505_v2 = vshll.u32 %v444_v60, 16  ;;  %v310_v7 = vld [vmem:[#allocation2 + $0x24] sm:$0xf] }
  0x81   : > { %7355 = vmatpush3.bf16.msra.mxu0 %v8317_v20  ;;  %v351_v3 = vor.u32 %v349_v48, %v348_v56  ;;  %v353_v4 = vrot.slane %v348_v56, 4  ;;  %v360_v5 = vor.u32 %v358_v50, %v357_v57  ;;  %v480_v6 = vrot.slane %v478_v58, 4  ;;  %v311_v8 = vld [vmem:[#allocation2 + $0x28] sm:$0xf]  ;;  %v426_v13 = vld [vmem:[#allocation2 + $0x24] sm:$0xf] }
  0x82   : > { %7356 = vmatprep.subr.bf16.mxu0 %v8319_v22  ;;  %v483_v9 = vrot.slane %v481_v59, 5  ;;  %v489_v10 = vrot.slane %v487_v62, 5  ;;  %v493_v11 = vrot.slane %v491_v63, 4  ;;  %v504_v12 = vrot.slane %v502_v1, 4  ;;  %v427_v18 = vld [vmem:[#allocation2 + $0x28] sm:$0xf] }
  0x83   : > { %7925 = vmatpush3.bf16.msra.mxu1 %v8318_v21  ;;  %v352_v14 = vsel %vm9136_vm4, %v6835_v39, %v351_v3  ;;  %v361_v15 = vsel %vm9136_vm4, %v353_v4, %v360_v5  ;;  %v507_v16 = vrot.slane %v505_v2, 5  ;;  %v511_v17 = vshll.u32 %v445_v0, 16  ;;  %434 = vst [vmem:[#allocation3 + $0x34] sm:$0xf] %v426_v13  ;;  %435 = vst [vmem:[#allocation3 + $0x40] sm:$0xf] %v427_v18 }
  0x84   : > { %7926 = vmatprep.subr.bf16.mxu1 %v8321_v26  ;;  %416 = vst [vmem:[#allocation3 + $0x18] sm:$0xf] %v352_v14  ;;  %417 = vst [vmem:[#allocation3 + $0x24] sm:$0xf] %v361_v15  ;;  %v484_v19 = vor.u32 %v483_v9, %v480_v6  ;;  %v494_v20 = vor.u32 %v493_v11, %v489_v10  ;;  %v515_v21 = vshrl.u32 %v445_v0, 16  ;;  %v368_v22 = vshrl.u32 %v310_v7, 16 }
  0x85   : > { %7357 = vmatpush3.bf16.msra.mxu0 %v8320_v30  ;;  %v508_v24 = vor.u32 %v507_v16, %v504_v12  ;;  %v513_v25 = vrot.slane %v511_v17, 5  ;;  %v377_v27 = vshrl.u32 %v311_v8, 16  ;;  %v380_v35 = vshll.u32 %v311_v8, 16  ;;  %v8327_v45 = vld [vmem:[#allocation7 + $0x38] sm:$0xff]   ;;  %v8330_v51 = vld [vmem:[#allocation7 + $0x70] sm:$0xff]   ;;  %v8336_v53 = vld [vmem:[#allocation7 + $0x68] sm:$0xff]  }
  0x86   : > { %7380 = vmatprep.subr.bf16.mxu0 %v8325_v34  ;;  %v485_v28 = vrot.slane %v484_v19, 4  ;;  %v495_v29 = vrot.slane %v494_v20, 4  ;;  %v517_v30 = vrot.slane %v515_v21, 4  ;;  %v370_v31 = vrot.slane %v368_v22, 7  ;;  %v9160_v48 = vld [vmem:[#allocation3 + $0x1c] ss:$12 sps:$4 sm:$0xff]  }
  0x87   : > { %7927 = vmatpush3.bf16.msra.mxu1 %v8321_v26  ;;  %v371_v26 = vshll.u32 %v310_v7, 16  ;;  %v509_v32 = vrot.slane %v508_v24, 4  ;;  %v379_v34 = vrot.slane %v377_v27, 7  ;;  %882 = vmatprep.mubr.bf16.mxu0 %v9160_v48  ;;  %v8331_v52 = vld [vmem:[#allocation7 + $0x30] sm:$0xff]   ;;  %v8339_v57 = vld [vmem:[#allocation7 + $0x60] sm:$0xff]   ;;  %v8338_v62 = vld [vmem:[#allocation7 + $0xa8] sm:$0xff]  }
  0x88   : > { %7932 = vmatprep.subr.bf16.mxu1 %v9124_v38  ;;  %v490_v36 = vsel %vm9146_vm5, %v485_v28, %v489_v10  ;;  %v500_v37 = vsel %vm9146_vm5, %v495_v29, %v9128_v42  ;;  %v518_v39 = vor.u32 %v517_v30, %v513_v25  ;;  %v375_v43 = vrot.slane %v370_v31, 4  ;;  %v8332_v56 = vld [vmem:[#allocation7 + $0xb0] sm:$0xff]   ;;  %v8340_v63 = vld [vmem:[#allocation7 + $0x20] sm:$0xff]   ;;  %v8342_v0 = vld [vmem:[#allocation7 + $0x58] sm:$0xff]  }
  0x89   : > { %v373_v40 = vor.u32 %v371_v26, %v370_v31  ;;  %559 = vst [vmem:[#allocation3 + $0x20] sm:$0xf] %v490_v36  ;;  %560 = vst [vmem:[#allocation3 + $0x2c] sm:$0xf] %v500_v37  ;;  %v514_v41 = vsel %vm9146_vm5, %v509_v32, %v513_v25  ;;  %v382_v44 = vor.u32 %v380_v35, %v379_v34  ;;  %v8341_v1 = vld [vmem:[#allocation7 + $0xa0] sm:$0xff]   ;;  %v8343_v2 = vld [vmem:[#allocation7 + $0x18] sm:$0xff]  }
  0x8a   : > { %v519_v46 = vrot.slane %v518_v39, 4  ;;  %561 = vst [vmem:[#allocation3 + $0x38] sm:$0xf] %v514_v41  ;;  %v9173_v58 = vld [vmem:[#allocation3 + $0x34] ss:$12 sps:$4 sm:$0xff]   ;;  %v8344_v15 = vld [vmem:[#allocation7 + $0x98] sm:$0xff]  }
  0x8b   : > { %v374_v47 = vsel %vm9136_vm4, %v9132_v55, %v373_v40  ;;  %v383_v42 = vsel %vm9136_vm4, %v375_v43, %v382_v44  ;;  %v9164_v49 = vld [vmem:[#allocation3 + $0x18] ss:$12 sps:$4 sm:$0xff]   ;;  %v8337_v55 = vld [vmem:[#allocation7 + $0x28] sm:$0xff]   ;;  %v303_v3 = vld [vmem:[#allocation2] sm:$0x8] }
  0x8c   : > { %418 = vst [vmem:[#allocation3 + $0x30] sm:$0xf] %v374_v47  ;;  %v524_v50 = vsel %vm9146_vm5, %v519_v46, %v523_v33  ;;  %419 = vst [vmem:[#allocation3 + $0x3c] sm:$0xf] %v383_v42  ;;  %883 = vmatmul.mubr.bf16.vlgmr.msra.gmra.mxu0 %v9164_v49  ;;  %v304_v4 = vld [vmem:[#allocation2 + $0x4] sm:$0xf] }
  0x8d   : > { %562 = vst [vmem:[#allocation3 + $0x44] sm:$0xf] %v524_v50  ;;  %7381 = vmatpush3.bf16.msra.mxu0 %v8327_v45  ;;  %890 = vmatprep.mubr.bf16.mxu0 %v9173_v58  ;;  %v8345_v5 = vld [vmem:[#allocation7 + $0x50] sm:$0xff]   ;;  %v305_v6 = vld [vmem:[#allocation2 + $0x8] sm:$0xf]  ;;  %v319_v7 = vshrl.u32 %v303_v3, 16 }
  0x8e   : > { %7382 = vmatprep.subr.bf16.mxu0 %v8330_v51  ;;  %v324_v8 = vshrl.u32 %v304_v4, 16  ;;  %v327_v9 = vshll.u32 %v304_v4, 16  ;;  %v333_v10 = vshrl.u32 %v305_v6, 16  ;;  %v422_v11 = vld [vmem:[#allocation2 + $0x4] sm:$0xf]  ;;  %v8346_v17 = vld [vmem:[#allocation7 + $0x10] sm:$0xff]  }
  0x8f   : > { %v423_v12 = vld [vmem:[#allocation2 + $0x8] sm:$0xf]  ;;  %v6834_v13 = vrot.slane %v319_v7, 11  ;;  %430 = vst [vmem:[#allocation3 + $0x4] sm:$0xf] %v422_v11  ;;  %v8347_v34 = vld [vmem:[#allocation7 + $0x90] sm:$0xff]  }
  0x90   : > { %v9170_v54 = vld [vmem:[#allocation3 + $0x20] ss:$12 sps:$4 sm:$0xff]   ;;  %v326_v14 = vrot.slane %v324_v8, 7  ;;  %431 = vst [vmem:[#allocation3 + $0x10] sm:$0xf] %v423_v12  ;;  %v335_v16 = vrot.slane %v333_v10, 7 }
  0x91   : > { %7928 = vmatprep.mubr.bf16.mxu1 %v9170_v54  ;;  %7383 = vmatpush3.bf16.msra.mxu0 %v8331_v52  ;;  %v438_v20 = vld [vmem:[#allocation2 + $0x4] sm:$0xf]  ;;  %v439_v21 = vld [vmem:[#allocation2 + $0x8] sm:$0xf]  ;;  %v440_v25 = vld [vmem:[#allocation2 + $0xc] sm:$0x1] }
  0x92   : > { %7384 = vmatprep.subr.bf16.mxu0 %v8336_v53  ;;  %v329_v18 = vor.u32 %v327_v9, %v326_v14  ;;  %v331_v19 = vrot.slane %v326_v14, 4  ;;  %v8348_v22 = vld [vmem:[#allocation7 + $0x48] sm:$0xff]   ;;  %v454_v26 = vshrl.u32 %v438_v20, 16  ;;  %v457_v27 = vshll.u32 %v438_v20, 16  ;;  %v1719_v32 = vld [vmem:[#allocation2 + $0x4] sm:$0xf] }
  0x93   : > { %v9175_v59 = vld [vmem:[#allocation3 + $0x30] ss:$12 sps:$4 sm:$0xff]   ;;  %v463_v28 = vshll.u32 %v439_v21, 16  ;;  %v467_v30 = vshrl.u32 %v439_v21, 16  ;;  %v473_v31 = vshll.u32 %v440_v25, 16  ;;  %v8349_v41 = vld [vmem:[#allocation7 + $0x8] sm:$0xff]  }
  0x94   : > { %v8328_v60 = vld [vmem:[#allocation3 + $0x38] ss:$12 sps:$4 sm:$0xff]   ;;  %891 = vmatmul.mubr.bf16.gmra.mxu0 %v9175_v59  ;;  %v330_v29 = vsel %vm9136_vm4, %v6834_v13, %v329_v18  ;;  %v1720_v33 = vld [vmem:[#allocation2 + $0x8] sm:$0xf]  ;;  %v456_v36 = vrot.slane %v454_v26, 4  ;;  %v459_v37 = vrot.slane %v457_v27, 5 }
  0x95   : > { %7929 = vmatmul.mubr.bf16.vlgmr.msra.gmra.mxu1 %v8328_v60  ;;  %7385 = vmatpush3.bf16.msra.mxu0 %v8337_v55  ;;  %414 = vst [vmem:[#allocation3] sm:$0xf] %v330_v29  ;;  %v465_v39 = vrot.slane %v463_v28, 5  ;;  %v1721_v40 = vld [vmem:[#allocation2 + $0xc] sm:$0x1]  ;;  %v469_v43 = vrot.slane %v467_v30, 4 }
  0x96   : > { %7933 = vmatpush3.bf16.msra.mxu1 %v9124_v38  ;;  %7386 = vmatprep.subr.bf16.mxu0 %v8339_v57  ;;  %v336_v38 = vshll.u32 %v305_v6, 16  ;;  %v1732_v44 = vshrl.u32 %v1719_v32, 16  ;;  %v1735_v45 = vshll.u32 %v1719_v32, 16  ;;  %v8351_v46 = vld [vmem:[#allocation7 + $0x40] sm:$0xff]   ;;  %v460_v47 = vor.u32 %v459_v37, %v456_v36  ;;  %v8350_v57 = vld [vmem:[#allocation7 + $0x88] sm:$0xff]   ;;  %v8358_v6 = vld [vmem:[#allocation7 + $0x1b8] sm:$0xff]  }
  0x97   : > { %7934 = vmatprep.subr.bf16.mxu1 %v8332_v56  ;;  %v475_v42 = vrot.slane %v473_v31, 5  ;;  %v1741_v50 = vshll.u32 %v1720_v33, 16  ;;  %v1745_v51 = vshrl.u32 %v1720_v33, 16  ;;  %v8352_v52 = vld [vmem:[#allocation7] sm:$0xff]   ;;  %v470_v53 = vor.u32 %v469_v43, %v465_v39  ;;  %v8361_v13 = vld [vmem:[#allocation7 + $0x1f0] sm:$0xff]   ;;  %v8360_v14 = vld [vmem:[#allocation7 + $0x238] sm:$0xff]  }
  0x98   : > { %v338_v24 = vor.u32 %v336_v38, %v335_v16  ;;  %v1734_v55 = vrot.slane %v1732_v44, 4  ;;  %v461_v60 = vrot.slane %v460_v47, 4  ;;  %v8353_v8 = vld [vmem:[#allocation7 + $0x80] sm:$0xff]   ;;  %v8364_v18 = vld [vmem:[#allocation7 + $0x1e8] sm:$0xff]   ;;  %v8363_v20 = vld [vmem:[#allocation7 + $0x230] sm:$0xff]  }
  0x99   : > { %7387 = vmatpush3.bf16.msra.mxu0 %v8340_v63  ;;  %v1747_v63 = vrot.slane %v1745_v51, 4  ;;  %v8354_v9 = vld [vmem:[#allocation3 + $0x4] ss:$12 sps:$4 sm:$0xff]   ;;  %v8365_v21 = vld [vmem:[#allocation7 + $0x1a8] sm:$0xff]   ;;  %v8370_v25 = vld [vmem:[#allocation7 + $0x1d8] sm:$0xff]  }
  0x9a   : > { %7935 = vmatpush3.bf16.msra.mxu1 %v8332_v56  ;;  %7388 = vmatprep.subr.bf16.mxu0 %v8342_v0  ;;  %v339_v35 = vsel %vm9136_vm4, %v331_v19, %v338_v24  ;;  %v1737_v56 = vrot.slane %v1735_v45, 5  ;;  %v1751_v0 = vshll.u32 %v1721_v40, 16  ;;  %v466_v4 = vsel %vm9146_vm5, %v461_v60, %v465_v39  ;;  %v8366_v24 = vld [vmem:[#allocation7 + $0x228] sm:$0xff]   ;;  %v8369_v26 = vld [vmem:[#allocation7 + $0x220] sm:$0xff]   ;;  %v8371_v27 = vld [vmem:[#allocation7 + $0x198] sm:$0xff]  }
  0x9b   : > { %7936 = vmatprep.subr.bf16.mxu1 %v8338_v62  ;;  %415 = vst [vmem:[#allocation3 + $0xc] sm:$0xf] %v339_v35  ;;  %557 = vst [vmem:[#allocation3 + $0x8] sm:$0xf] %v466_v4  ;;  %1140 = vmatprep.mubr.bf16.mxu0 %v8354_v9  ;;  %v8373_v28 = vld [vmem:[#allocation7 + $0x1d0] sm:$0xff]   ;;  %v8376_v36 = vld [vmem:[#allocation7 + $0x1c8] sm:$0xff]  }
  0x9c   : > { %v1738_v3 = vor.u32 %v1737_v56, %v1734_v55  ;;  %v1753_v38 = vrot.slane %v1751_v0, 5  ;;  %v8382_v29 = vld [vmem:[#allocation3 + $0x38] ss:$12 sps:$4 sm:$0xff]   ;;  %v8374_v31 = vld [vmem:[#allocation7 + $0x190] sm:$0xff]   ;;  %v449_v32 = vld [vmem:[#allocation2 + $0x3c] sm:$0x1] }
  0x9d   : > { %7389 = vmatpush3.bf16.msra.mxu0 %v8343_v2  ;;  %v471_v2 = vrot.slane %v470_v53, 4  ;;  %v448_v30 = vld [vmem:[#allocation2 + $0x38] sm:$0xf]  ;;  %v545_v37 = vshll.u32 %v449_v32, 16  ;;  %v1728_v39 = vld [vmem:[#allocation2 + $0x34] sm:$0xf] }
  0x9e   : > { %7937 = vmatpush3.bf16.msra.mxu1 %v8338_v62  ;;  %7390 = vmatprep.subr.bf16.mxu0 %v8345_v5  ;;  %v1743_v62 = vrot.slane %v1741_v50, 5  ;;  %v1739_v11 = vrot.slane %v1738_v3, 4  ;;  %v539_v35 = vshrl.u32 %v448_v30, 16  ;;  %v1729_v40 = vld [vmem:[#allocation2 + $0x38] sm:$0xf]  ;;  %v1807_v50 = vshll.u32 %v1728_v39, 16 }
  0x9f   : > { %7938 = vmatprep.subr.bf16.mxu1 %v8341_v1  ;;  %v476_v7 = vsel %vm9146_vm5, %v471_v2, %v475_v42  ;;  %v547_v47 = vrot.slane %v545_v37, 5  ;;  %v1804_v42 = vshrl.u32 %v1728_v39, 16  ;;  %v1813_v51 = vshll.u32 %v1729_v40, 16  ;;  %v8375_v53 = vld [vmem:[#allocation7 + $0x210] sm:$0xff]   ;;  %v429_v9 = vld [vmem:[#allocation2 + $0x38] sm:$0xf] }
  0xa0   : > { %v1748_v5 = vor.u32 %v1747_v63, %v1743_v62  ;;  %558 = vst [vmem:[#allocation3 + $0x14] sm:$0xf] %v476_v7  ;;  %v541_v45 = vrot.slane %v539_v35, 4  ;;  %v314_v63 = vld [vmem:[#allocation2 + $0x38] sm:$0xf]  ;;  %v8390_v37 = vld [vmem:[#allocation7 + $0x330] sm:$0xff]  }
  0xa1   : > { %7391 = vmatpush3.bf16.msra.mxu0 %v8346_v17  ;;  %v8362_v17 = vld [vmem:[#allocation7 + $0x1b0] sm:$0xff]   ;;  %v1806_v0 = vrot.slane %v1804_v42, 4  ;;  %v1815_v2 = vrot.slane %v1813_v51, 5  ;;  %437 = vst [vmem:[#allocation3 + $0x58] sm:$0xf] %v429_v9  ;;  %v8388_v35 = vld [vmem:[#allocation7 + $0x338] sm:$0xff]  }
  0xa2   : > { %7939 = vmatpush3.bf16.msra.mxu1 %v8341_v1  ;;  %7392 = vmatprep.subr.bf16.mxu0 %v8348_v22  ;;  %v8357_v1 = vld [vmem:[#allocation7 + $0x1f8] sm:$0xff]   ;;  %v8356_v10 = vld [vmem:[#allocation3] ss:$12 sps:$4 sm:$0xff]   ;;  %v1749_v12 = vrot.slane %v1748_v5, 4  ;;  %v428_v4 = vld [vmem:[#allocation2 + $0x34] sm:$0xf] }
  0xa3   : > { %7940 = vmatprep.subr.bf16.mxu1 %v8344_v15  ;;  %v8367_v22 = vld [vmem:[#allocation7 + $0x1e0] sm:$0xff]   ;;  %v8377_v5 = vld [vmem:[#allocation7 + $0x188] sm:$0xff]   ;;  %436 = vst [vmem:[#allocation3 + $0x4c] sm:$0xf] %v428_v4  ;;  %v8400_v42 = vld [vmem:[#allocation7 + $0x350] sm:$0xff]  }
  0xa4   : > { %v1754_v16 = vsel %vm9146_vm5, %v1749_v12, %v1753_v38  ;;  %v8391_v39 = vld [vmem:[#allocation7 + $0x368] sm:$0xff]   ;;  %v8402_v51 = vld [vmem:[#allocation7 + $0x3a0] sm:$0xff]  }
  0xa5   : > { %7393 = vmatpush3.bf16.msra.mxu0 %v8349_v41 }
  0xa6   : > { %7941 = vmatpush3.bf16.msra.mxu1 %v8344_v15  ;;  %7394 = vmatprep.subr.bf16.mxu0 %v8351_v46  ;;  %v1744_v15 = vsel %vm9146_vm5, %v1739_v11, %v1743_v62  ;;  %v1730_v46 = vld [vmem:[#allocation2 + $0x3c] sm:$0x1]  ;;  %v313_v62 = vld [vmem:[#allocation2 + $0x34] sm:$0xf] }
  0xa7   : > { %7942 = vmatprep.subr.bf16.mxu1 %v8347_v34  ;;  %v8359_v19 = vld [vmem:[#allocation3 + $0x8] ss:$12 sps:$4 sm:$0xff]   ;;  %v1823_v60 = vshll.u32 %v1730_v46, 16  ;;  %v390_v12 = vshrl.u32 %v313_v62, 16  ;;  %v8398_v46 = vld [vmem:[#allocation7 + $0x318] sm:$0xff]  }
  0xa8   : > { %1835 = vst [vmem:[#allocation3 + $0x8] sm:$0xf] %v1744_v15  ;;  %1836 = vst [vmem:[#allocation3 + $0x14] sm:$0xf] %v1754_v16  ;;  %7948 = vmatprep.mubr.bf16.mxu1 %v8359_v19  ;;  %v8380_v15 = vld [vmem:[#allocation7 + $0x180] sm:$0xff]   ;;  %v399_v19 = vshrl.u32 %v314_v63, 16 }
  0xa9   : > { %7395 = vmatpush3.bf16.msra.mxu0 %v8352_v52  ;;  %v312_v52 = vld [vmem:[#allocation2 + $0x30] sm:$0x8]  ;;  %v1825_v11 = vrot.slane %v1823_v60, 5  ;;  %v8407_v60 = vld [vmem:[#allocation7 + $0x300] sm:$0xff]  }
  0xaa   : > { %7943 = vmatpush3.bf16.msra.mxu1 %v8347_v34  ;;  %7418 = vmatprep.subr.bf16.mxu0 %v8357_v1  ;;  %v535_v34 = vshll.u32 %v448_v30, 16  ;;  %v1809_v1 = vrot.slane %v1807_v50, 5  ;;  %v385_v3 = vshrl.u32 %v312_v52, 16  ;;  %v8401_v50 = vld [vmem:[#allocation7 + $0x310] sm:$0xff]   ;;  %v8403_v52 = vld [vmem:[#allocation7 + $0x348] sm:$0xff]  }
  0xab   : > { %7944 = vmatprep.subr.bf16.mxu1 %v8350_v57 }
  0xac   : > { %1141 = vmatmul.mubr.bf16.vlgmr.msra.gmra.mxu0 %v8356_v10  ;;  %v537_v44 = vrot.slane %v535_v34, 5  ;;  %v8379_v10 = vld [vmem:[#allocation7 + $0x1c0] sm:$0xff]   ;;  %v1810_v38 = vor.u32 %v1809_v1, %v1806_v0  ;;  %v8387_v34 = vld [vmem:[#allocation7 + $0x378] sm:$0xff]  }
  0xad   : > { %7419 = vmatpush3.bf16.msra.mxu0 %v8358_v6  ;;  %1148 = vmatprep.mubr.bf16.mxu0 %v9160_v48  ;;  %v8368_v48 = vld [vmem:[#allocation7 + $0x1a0] sm:$0xff]   ;;  %v8424_v1 = vld [vmem:[#allocation7 + $0x2f8] sm:$0xff]  }
  0xae   : > { %7945 = vmatpush3.bf16.msra.mxu1 %v8350_v57  ;;  %7420 = vmatprep.subr.bf16.mxu0 %v8361_v13  ;;  %v542_v56 = vor.u32 %v541_v45, %v537_v44  ;;  %v1817_v57 = vshrl.u32 %v1729_v40, 16  ;;  %v393_v13 = vshll.u32 %v313_v62, 16  ;;  %v8392_v40 = vld [vmem:[#allocation7 + $0x328] sm:$0xff]   ;;  %v8397_v45 = vld [vmem:[#allocation7 + $0x358] sm:$0xff]   ;;  %v8417_v0 = vld [vmem:[#allocation7 + $0x380] sm:$0xff]  }
  0xaf   : > { %7946 = vmatprep.subr.bf16.mxu1 %v8353_v8  ;;  %v8411_v62 = vld [vmem:[#allocation7 + $0x2b8] sm:$0xff]  }
  0xb0   : > { %v543_v7 = vrot.slane %v542_v56, 4  ;;  %v8406_v56 = vld [vmem:[#allocation7 + $0x340] sm:$0xff]  }
  0xb1   : > { %7421 = vmatpush3.bf16.msra.mxu0 %v8362_v17 }
  0xb2   : > { %7947 = vmatpush3.bf16.msra.mxu1 %v8353_v8  ;;  %7422 = vmatprep.subr.bf16.mxu0 %v8364_v18  ;;  %v1819_v8 = vrot.slane %v1817_v57, 4  ;;  %v548_v17 = vsel %vm9146_vm5, %v543_v7, %v547_v47  ;;  %v8399_v47 = vld [vmem:[#allocation7 + $0x3a8] sm:$0xff]   ;;  %v8408_v57 = vld [vmem:[#allocation7 + $0x390] sm:$0xff]   ;;  %v1587_v7 = vld [vmem:[#allocation2] sm:$0x8] }
  0xb3   : > { %7952 = vmatprep.subr.bf16.mxu1 %v8360_v14  ;;  %564 = vst [vmem:[#allocation3 + $0x5c] sm:$0xf] %v548_v17 }
  0xb4   : > { %1149 = vmatmul.mubr.bf16.gmra.mxu0 %v9164_v49  ;;  %v8372_v49 = vld [vmem:[#allocation7 + $0x218] sm:$0xff]   ;;  %v1820_v18 = vor.u32 %v1819_v8, %v1815_v2  ;;  %v1600_v8 = vshrl.u32 %v1587_v7, 16 }
  0xb5   : > { %7949 = vmatmul.mubr.bf16.vlgmr.msra.gmra.mxu1 %v9170_v54  ;;  %1471 = vmatprep.mubr.bf16.mxu0 %v9173_v58  ;;  %v447_v54 = vld [vmem:[#allocation2 + $0x34] sm:$0xf] }
  0xb6   : > { %7953 = vmatpush3.bf16.msra.mxu1 %v8360_v14  ;;  %7423 = vmatpush3.bf16.msra.mxu0 %v8365_v21  ;;  %v526_v33 = vshrl.u32 %v447_v54, 16  ;;  %v529_v58 = vshll.u32 %v447_v54, 16  ;;  %v8378_v14 = vld [vmem:[#allocation7 + $0x208] sm:$0xff]   ;;  %v6837_v21 = vrot.slane %v385_v3, 11 }
  0xb7   : > { %7954 = vmatprep.subr.bf16.mxu1 %v8363_v20  ;;  %7424 = vmatprep.subr.bf16.mxu0 %v8367_v22  ;;  %v392_v22 = vrot.slane %v390_v12, 7  ;;  %v1589_v3 = vld [vmem:[#allocation2 + $0x8] sm:$0xf] }
  0xb8   : > { %7968 = vmatprep.mubr.bf16.mxu1 %v8382_v29  ;;  %v528_v41 = vrot.slane %v526_v33, 4  ;;  %v531_v43 = vrot.slane %v529_v58, 5  ;;  %v8384_v33 = vld [vmem:[#allocation3 + $0x4c] ss:$12 sps:$4 sm:$0xff]  }
  0xba   : > { %7955 = vmatpush3.bf16.msra.mxu1 %v8363_v20  ;;  %7425 = vmatpush3.bf16.msra.mxu0 %v8368_v48  ;;  %v532_v55 = vor.u32 %v531_v43, %v528_v41  ;;  %v1811_v20 = vrot.slane %v1810_v38, 4  ;;  %v1821_v48 = vrot.slane %v1820_v18, 4  ;;  %v8394_v41 = vld [vmem:[#allocation7 + $0x360] sm:$0xff]  }
  0xbb   : > { %7956 = vmatprep.subr.bf16.mxu1 %v8366_v24  ;;  %7426 = vmatprep.subr.bf16.mxu0 %v8370_v25  ;;  %v401_v25 = vrot.slane %v399_v19, 7  ;;  %v8395_v43 = vld [vmem:[#allocation7 + $0x320] sm:$0xff]   ;;  %v1704_v19 = vld [vmem:[#allocation2 + $0x8] sm:$0xf] }
  0xbc   : > { %v533_v6 = vrot.slane %v532_v55, 4  ;;  %v1816_v30 = vsel %vm9146_vm5, %v1811_v20, %v1815_v2  ;;  %v8404_v55 = vld [vmem:[#allocation7 + $0x308] sm:$0xff]   ;;  %v1588_v2 = vld [vmem:[#allocation2 + $0x4] sm:$0xf]  ;;  %1712 = vst [vmem:[#allocation3 + $0x10] sm:$0xf] %v1704_v19 }
  0xbd   : > { %v1703_v18 = vld [vmem:[#allocation2 + $0x4] sm:$0xf]  ;;  %v3010_v19 = vld [vmem:[#allocation2 + $0x38] sm:$0xf] }
  0xbe   : > { %7957 = vmatpush3.bf16.msra.mxu1 %v8366_v24  ;;  %7427 = vmatpush3.bf16.msra.mxu0 %v8371_v27  ;;  %v538_v16 = vsel %vm9146_vm5, %v533_v6, %v537_v44  ;;  %v402_v24 = vshll.u32 %v314_v63, 16  ;;  %v397_v27 = vrot.slane %v392_v22, 4  ;;  %v8396_v44 = vld [vmem:[#allocation7 + $0x3b0] sm:$0xff]   ;;  %v8413_v63 = vld [vmem:[#allocation7 + $0x388] sm:$0xff]   ;;  %v1614_v6 = vshrl.u32 %v1589_v3, 16 }
  0xbf   : > { %7958 = vmatprep.subr.bf16.mxu1 %v8369_v26  ;;  %7428 = vmatprep.subr.bf16.mxu0 %v8373_v28  ;;  %563 = vst [vmem:[#allocation3 + $0x50] sm:$0xf] %v538_v16  ;;  %v8381_v28 = vld [vmem:[#allocation7 + $0x200] sm:$0xff]   ;;  %1711 = vst [vmem:[#allocation3 + $0x4] sm:$0xf] %v1703_v18 }
  0xc0   : > { %v404_v29 = vor.u32 %v402_v24, %v401_v25  ;;  %v1616_v38 = vrot.slane %v1614_v6, 7  ;;  %v3000_v25 = vld [vmem:[#allocation2 + $0x4] sm:$0xf] }
  0xc2   : > { %7959 = vmatpush3.bf16.msra.mxu1 %v8369_v26  ;;  %7429 = vmatpush3.bf16.msra.mxu0 %v8374_v31  ;;  %v395_v26 = vor.u32 %v393_v13, %v392_v22  ;;  %v405_v31 = vsel %vm9136_vm4, %v397_v27, %v404_v29  ;;  %v6931_v13 = vrot.slane %v1600_v8, 11  ;;  %v3013_v29 = vshrl.u32 %v3000_v25, 16  ;;  %v1709_v8 = vld [vmem:[#allocation2 + $0x34] sm:$0xf] }
  0xc3   : > { %7960 = vmatprep.subr.bf16.mxu1 %v8372_v49  ;;  %7430 = vmatprep.subr.bf16.mxu0 %v8376_v36  ;;  %421 = vst [vmem:[#allocation3 + $0x54] sm:$0xf] %v405_v31  ;;  %v8389_v36 = vld [vmem:[#allocation7 + $0x370] sm:$0xff]   ;;  %1717 = vst [vmem:[#allocation3 + $0x4c] sm:$0xf] %v1709_v8 }
  0xc4   : > { %v396_v54 = vsel %vm9136_vm4, %v6837_v21, %v395_v26  ;;  %v3001_v26 = vld [vmem:[#allocation2 + $0x8] sm:$0xf] }
  0xc5   : > { %420 = vst [vmem:[#allocation3 + $0x48] sm:$0xf] %v396_v54  ;;  %v3016_v54 = vshll.u32 %v3000_v25, 16 }
  0xc6   : > { %7961 = vmatpush3.bf16.msra.mxu1 %v8372_v49  ;;  %7431 = vmatpush3.bf16.msra.mxu0 %v8377_v5  ;;  %v1826_v49 = vsel %vm9146_vm5, %v1821_v48, %v1825_v11  ;;  %v8383_v32 = vld [vmem:[#allocation3 + $0x50] ss:$12 sps:$4 sm:$0xff]   ;;  %v1605_v5 = vshrl.u32 %v1588_v2, 16  ;;  %v1617_v11 = vshll.u32 %v1589_v3, 16 }
  0xc7   : > { %7962 = vmatprep.subr.bf16.mxu1 %v8375_v53  ;;  %7432 = vmatprep.subr.bf16.mxu0 %v8379_v10  ;;  %1841 = vst [vmem:[#allocation3 + $0x50] sm:$0xf] %v1816_v30  ;;  %1842 = vst [vmem:[#allocation3 + $0x5c] sm:$0xf] %v1826_v49  ;;  %v1608_v10 = vshll.u32 %v1588_v2, 16  ;;  %v3022_v30 = vshll.u32 %v3001_v26, 16 }
  0xc8   : > { %v1607_v9 = vrot.slane %v1605_v5, 7  ;;  %v1619_v16 = vor.u32 %v1617_v11, %v1616_v38  ;;  %v3026_v49 = vshrl.u32 %v3001_v26, 16 }
  0xca   : > { %7963 = vmatpush3.bf16.msra.mxu1 %v8375_v53  ;;  %7433 = vmatpush3.bf16.msra.mxu0 %v8380_v15  ;;  %v8405_v53 = vld [vmem:[#allocation7 + $0x398] sm:$0xff]   ;;  %v1612_v15 = vrot.slane %v1607_v9, 4 }
  0xcb   : > { %7964 = vmatprep.subr.bf16.mxu1 %v8378_v14  ;;  %7456 = vmatprep.subr.bf16.mxu0 %v8387_v34  ;;  %v3028_v34 = vrot.slane %v3026_v49, 4  ;;  %v9247_v49 = vld [vmem:[#allocation2 + $0x10] sm:$0x8] }
  0xcc   : > { %v8386_v58 = vld [vmem:[#allocation3 + $0x48] ss:$12 sps:$4 sm:$0xff]   ;;  %v1620_v20 = vsel %vm9136_vm4, %v1612_v15, %v1619_v16 }
  0xcd   : > { %1472 = vmatmul.mubr.bf16.vlgmr.msra.gmra.mxu0 %v9175_v59  ;;  %v8393_v59 = vld [vmem:[#allocation7 + $0x3b8] sm:$0xff]   ;;  %1696 = vst [vmem:[#allocation3 + $0xc] sm:$0xf] %v1620_v20 }
  0xce   : > { %7965 = vmatpush3.bf16.msra.mxu1 %v8378_v14  ;;  %1479 = vmatprep.mubr.bf16.mxu0 %v8384_v33  ;;  %v1610_v14 = vor.u32 %v1608_v10, %v1607_v9  ;;  %v3018_v33 = vrot.slane %v3016_v54, 5  ;;  %v1710_v9 = vld [vmem:[#allocation2 + $0x38] sm:$0xf]  ;;  %v3011_v20 = vld [vmem:[#allocation2 + $0x3c] sm:$0x1]  ;;  %v3098_v54 = vshrl.u32 %v3010_v19, 16 }
  0xcf   : > { %7966 = vmatprep.subr.bf16.mxu1 %v8381_v28  ;;  %7457 = vmatpush3.bf16.msra.mxu0 %v8388_v35  ;;  %1718 = vst [vmem:[#allocation3 + $0x58] sm:$0xf] %v1710_v9 }
  0xd0   : > { %7458 = vmatprep.subr.bf16.mxu0 %v8389_v36  ;;  %v1611_v17 = vsel %vm9136_vm4, %v6931_v13, %v1610_v14 }
  0xd1   : > { %1695 = vst [vmem:[#allocation3] sm:$0xf] %v1611_v17  ;;  %v3009_v17 = vld [vmem:[#allocation2 + $0x34] sm:$0xf] }
  0xd2   : > { %7967 = vmatpush3.bf16.msra.mxu1 %v8381_v28  ;;  %v3002_v28 = vld [vmem:[#allocation2 + $0xc] sm:$0x1]  ;;  %v3085_v25 = vshrl.u32 %v3009_v17, 16  ;;  %v3088_v26 = vshll.u32 %v3009_v17, 16  ;;  %v6926_v17 = vld [vmem:[#allocation10] ss:$0 sm:$0xff] }
  0xd3   : > { %7459 = vmatpush3.bf16.msra.mxu0 %v8390_v37  ;;  %7972 = vmatprep.subr.bf16.mxu1 %v8393_v59  ;;  %v3032_v31 = vshll.u32 %v3002_v28, 16 }
  0xd4   : > { %7460 = vmatprep.subr.bf16.mxu0 %v8391_v39 }
  0xd5   : > { %7969 = vmatmul.mubr.bf16.vlgmr.msra.gmra.mxu1 %v8383_v32  ;;  %1480 = vmatmul.mubr.bf16.gmra.mxu0 %v8386_v58  ;;  %v3015_v32 = vrot.slane %v3013_v29, 4  ;;  %v3024_v58 = vrot.slane %v3022_v30, 5  ;;  %v3034_v39 = vrot.slane %v3032_v31, 5  ;;  %v3094_v29 = vshll.u32 %v3010_v19, 16 }
  0xd6   : > { %7973 = vmatpush3.bf16.msra.mxu1 %v8393_v59  ;;  %v3104_v30 = vshll.u32 %v3011_v20, 16  ;;  %v3087_v31 = vrot.slane %v3085_v25, 4 }
  0xd7   : > { %7461 = vmatpush3.bf16.msra.mxu0 %v8392_v40  ;;  %7974 = vmatprep.subr.bf16.mxu1 %v8396_v44  ;;  %v3019_v36 = vor.u32 %v3018_v33, %v3015_v32  ;;  %v3029_v37 = vor.u32 %v3028_v34, %v3024_v58  ;;  %v3090_v32 = vrot.slane %v3088_v26, 5  ;;  %v3096_v34 = vrot.slane %v3094_v29, 5 }
  0xd8   : > { %7462 = vmatprep.subr.bf16.mxu0 %v8394_v41 }
  0xd9   : > { %v3020_v59 = vrot.slane %v3019_v36, 4  ;;  %v3030_v41 = vrot.slane %v3029_v37, 4  ;;  %v3100_v36 = vrot.slane %v3098_v54, 4  ;;  %v3106_v37 = vrot.slane %v3104_v30, 5 }
  0xda   : > { %7975 = vmatpush3.bf16.msra.mxu1 %v8396_v44 }
  0xdb   : > { %7463 = vmatpush3.bf16.msra.mxu0 %v8395_v43  ;;  %7976 = vmatprep.subr.bf16.mxu1 %v8399_v47  ;;  %v9229_v43 = vld [vmem:[#allocation3 + $0x8] ss:$12 sps:$4 sm:$0xff]   ;;  %v3025_v44 = vsel %vm9146_vm5, %v3020_v59, %v3024_v58  ;;  %v3091_v59 = vor.u32 %v3090_v32, %v3087_v31 }
  0xdc   : > { %7464 = vmatprep.subr.bf16.mxu0 %v8397_v45  ;;  %v3035_v45 = vsel %vm9146_vm5, %v3030_v41, %v3034_v39  ;;  %3116 = vst [vmem:[#allocation3 + $0x8] sm:$0xf] %v3025_v44 }
  0xdd   : > { %3117 = vst [vmem:[#allocation3 + $0x14] sm:$0xf] %v3035_v45  ;;  %v3101_v45 = vor.u32 %v3100_v36, %v3096_v34 }
  0xde   : > { %7977 = vmatpush3.bf16.msra.mxu1 %v8399_v47 }
  0xdf   : > { %7465 = vmatpush3.bf16.msra.mxu0 %v8398_v46  ;;  %7978 = vmatprep.subr.bf16.mxu1 %v8402_v51 }
  0xe0   : > { %7466 = vmatprep.subr.bf16.mxu0 %v8400_v42 }
  0xe2   : > { %7979 = vmatpush3.bf16.msra.mxu1 %v8402_v51  ;;  %v1598_v51 = vld [vmem:[#allocation2 + $0x38] sm:$0xf] }
  0xe3   : > { %7467 = vmatpush3.bf16.msra.mxu0 %v8401_v50  ;;  %7980 = vmatprep.subr.bf16.mxu1 %v8405_v53  ;;  %v1597_v50 = vld [vmem:[#allocation2 + $0x34] sm:$0xf] }
  0xe4   : > { %7468 = vmatprep.subr.bf16.mxu0 %v8403_v52  ;;  %v1671_v52 = vshrl.u32 %v1597_v50, 16 }
  0xe6   : > { %7981 = vmatpush3.bf16.msra.mxu1 %v8405_v53  ;;  %v1680_v53 = vshrl.u32 %v1598_v51, 16 }
  0xe7   : > { %7469 = vmatpush3.bf16.msra.mxu0 %v8404_v55  ;;  %7982 = vmatprep.subr.bf16.mxu1 %v8408_v57  ;;  %v1596_v55 = vld [vmem:[#allocation2 + $0x30] sm:$0x8] }
  0xe8   : > { %7470 = vmatprep.subr.bf16.mxu0 %v8406_v56 }
  0xea   : > { %7983 = vmatpush3.bf16.msra.mxu1 %v8408_v57  ;;  %v1666_v57 = vshrl.u32 %v1596_v55, 16 }
  0xeb   : > { %7471 = vmatpush3.bf16.msra.mxu0 %v8407_v60  ;;  %7984 = vmatprep.subr.bf16.mxu1 %v8413_v63 }
  0xec   : > { %7494 = vmatprep.subr.bf16.mxu0 %v8411_v62  ;;  %v1673_v62 = vrot.slane %v1671_v52, 7  ;;  %v6934_v2 = vrot.slane %v1666_v57, 11  ;;  %v3092_v52 = vrot.slane %v3091_v59, 4  ;;  %v3102_v57 = vrot.slane %v3101_v45, 4  ;;  %v1593_v45 = vld [vmem:[#allocation2 + $0x20] sm:$0x8] }
  0xee   : > { %7985 = vmatpush3.bf16.msra.mxu1 %v8413_v63  ;;  %v1674_v63 = vshll.u32 %v1597_v50, 16  ;;  %v1678_v5 = vrot.slane %v1673_v62, 4 }
  0xef   : > { %7986 = vmatprep.subr.bf16.mxu1 %v8417_v0 }
  0xf0   : > { %v1676_v3 = vor.u32 %v1674_v63, %v1673_v62 }
  0xf2   : > { %7987 = vmatpush3.bf16.msra.mxu1 %v8417_v0  ;;  %v1682_v0 = vrot.slane %v1680_v53, 7  ;;  %v1677_v38 = vsel %vm9136_vm4, %v6934_v2, %v1676_v3 }
  0xf3   : > { %7992 = vmatprep.subr.bf16.mxu1 %v8424_v1  ;;  %v1683_v1 = vshll.u32 %v1598_v51, 16  ;;  %1701 = vst [vmem:[#allocation3 + $0x48] sm:$0xf] %v1677_v38  ;;  %v9253_v51 = vld [vmem:[#allocation3 + $0x50] ss:$12 sps:$4 sm:$0xff]  }
  0xf5   : > { %v1685_v6 = vor.u32 %v1683_v1, %v1682_v0 }
  0xf7   : > { %v1686_v11 = vsel %vm9136_vm4, %v1678_v5, %v1685_v6 }
  0xf8   : > { %1702 = vst [vmem:[#allocation3 + $0x54] sm:$0xf] %v1686_v11 }
 0x14c   : > { %v9209_v4 = vpop.f32.mrf.mxu0 }
 0x14e   : > { %v9211_v12 = vpop.f32.mrf.mxu0 }
 0x14f   : > { %v7360_v33 = vadd.f32 %v9211_v12, %v9209_v4  ;;  %v1622_v12 = vshrl.u32 %v9247_v49, 16 }
 0x150   : > { %v9217_v21 = vpop.f32.mrf.mxu0 }
 0x152   : > { %v9219_v22 = vpop.f32.mrf.mxu0 }
 0x153   : > { %v7363_v55 = vadd.f32 %v9219_v22, %v9217_v21 }
 0x154   : > { %v9221_v24 = vpop.f32.mrf.mxu0 }
 0x155   : > { %v9237_v42 = vpop.f32.mrf.mxu1 }
 0x156   : > { %v9223_v48 = vpop.f32.mrf.mxu0 }
 0x157   : > { %v933_v60 = vpop.f32.mrf.mxu1  ;;  %v7366_v50 = vadd.f32 %v9223_v48, %v9221_v24 }
 0x158   : > { %v9225_v27 = vpop.f32.mrf.mxu0  ;;  %v934_v53 = vadd.f32 %v7360_v33, %v933_v60  ;;  %v3107_v60 = vsel %vm9146_vm5, %v3102_v57, %v3106_v37 }
 0x159   : > { %v9239_v10 = vpop.f32.mrf.mxu1  ;;  %v942_v21 = vadd.f32 %v9237_v42, %v7366_v50  ;;  %3123 = vst [vmem:[#allocation3 + $0x5c] sm:$0xf] %v3107_v60 }
 0x15a   : > { %v9227_v35 = vpop.f32.mrf.mxu0 }
 0x15b   : > { %v936_v14 = vpop.f32.mrf.mxu1  ;;  %v7369_v22 = vadd.f32 %v9227_v35, %v9225_v27 }
 0x15c   : > { %v937_v2 = vadd.f32 %v7363_v55, %v936_v14 }
 0x16c   : > { %v7396_v40 = vpop.f32.mrf.mxu0 }
 0x16e   : > { %v7397_v46 = vpop.f32.mrf.mxu0 }
 0x16f   : > { %v7398_v41 = vadd.f32 %v7397_v46, %v7396_v40  ;;  %v3097_v40 = vsel %vm9146_vm5, %v3092_v52, %v3096_v34 }
 0x170   : > { %v9235_v47 = vpop.f32.mrf.mxu0  ;;  %3122 = vst [vmem:[#allocation3 + $0x50] sm:$0xf] %v3097_v40  ;;  %v1644_v40 = vshrl.u32 %v1593_v45, 16 }
 0x171   : > { %v1143_v0 = vadd.f32 %v7398_v41, %v934_v53  ;;  %v6932_v53 = vrot.slane %v1622_v12, 11 }
 0x172   : > { %v7400_v56 = vpop.f32.mrf.mxu0 }
 0x173   : > { %v7401_v46 = vadd.f32 %v7400_v56, %v9235_v47  ;;  %v6925_v47 = vld [vmem:[#allocation9] ss:$0 sm:$0xff] }
 0x174   : > { %v7402_v7 = vpop.f32.mrf.mxu0 }
 0x175   : > { %v9245_v15 = vpop.f32.mrf.mxu1  ;;  %v1146_v8 = vadd.f32 %v7401_v46, %v937_v2 }
 0x176   : > { %v7403_v13 = vpop.f32.mrf.mxu0 }
 0x177   : > { %v1191_v18 = vpop.f32.mrf.mxu1  ;;  %v7404_v62 = vadd.f32 %v7403_v13, %v7402_v7  ;;  %v945_v13 = vadd.f32 %v9239_v10, %v7369_v22 }
 0x178   : > { %v7405_v16 = vpop.f32.mrf.mxu0  ;;  %v1192_v56 = vadd.f32 %v1191_v18, %v1143_v0  ;;  %v9270_v0 = vld [vmem:[#allocation2 + $0x2c] sm:$0x1] }
 0x179   : > { %v7951_v39 = vpop.f32.mrf.mxu1  ;;  %v1151_v5 = vadd.f32 %v7404_v62, %v942_v21 }
 0x17a   : > { %v7406_v28 = vpop.f32.mrf.mxu0 }
 0x17b   : > { %v1194_v63 = vpop.f32.mrf.mxu1  ;;  %v7407_v6 = vadd.f32 %v7406_v28, %v7405_v16  ;;  %v1200_v35 = vadd.f32 %v9245_v15, %v1151_v5  ;;  %v1724_v16 = vld [vmem:[#allocation2 + $0x1c] sm:$0x1] }
 0x17c   : > { %v1195_v28 = vadd.f32 %v1194_v63, %v1146_v8  ;;  %v1775_v37 = vshll.u32 %v1724_v16, 16 }
 0x17d   : > { %v1154_v14 = vadd.f32 %v7407_v6, %v945_v13 }
 0x17f   : > { %v1203_v10 = vadd.f32 %v7951_v39, %v1154_v14 }
 0x18d   : > { %v7434_v58 = vpop.f32.mrf.mxu0 }
 0x18f   : > { %v7435_v44 = vpop.f32.mrf.mxu0 }
 0x190   : > { %v7436_v24 = vadd.f32 %v7435_v44, %v7434_v58 }
 0x191   : > { %v7437_v4 = vpop.f32.mrf.mxu0 }
 0x193   : > { %v7438_v48 = vpop.f32.mrf.mxu0 }
 0x194   : > { %v7439_v38 = vadd.f32 %v7438_v48, %v7437_v4  ;;  %v9268_v4 = vrot.slane %v1775_v37, 5 }
 0x195   : > { %v7970_v1 = vpop.f32.mrf.mxu1  ;;  %v7440_v3 = vpop.f32.mrf.mxu0 }
 0x197   : > { %v1522_v7 = vpop.f32.mrf.mxu1  ;;  %v7441_v11 = vpop.f32.mrf.mxu0 }
 0x198   : > { %v1523_v9 = vadd.f32 %v7436_v24, %v1522_v7  ;;  %v7442_v19 = vadd.f32 %v7441_v11, %v7440_v3  ;;  %v1799_v7 = vshll.u32 %v9270_v0, 16 }
 0x199   : > { %v7971_v42 = vpop.f32.mrf.mxu1  ;;  %v7443_v27 = vpop.f32.mrf.mxu0 }
 0x19a   : > { %v1537_v20 = vadd.f32 %v1523_v9, %v1192_v56  ;;  %v1531_v26 = vadd.f32 %v7970_v1, %v7442_v19  ;;  %v6933_v1 = vrot.slane %v1644_v40, 11 }
 0x19b   : > { %v1525_v25 = vpop.f32.mrf.mxu1  ;;  %v7444_v54 = vpop.f32.mrf.mxu0 }
 0x19c   : > { %v1548_v29 = vmul.f32 %v6925_v47, %v1537_v20  ;;  %v1526_v18 = vadd.f32 %v7439_v38, %v1525_v25  ;;  %v1539_v30 = vadd.f32 %v1531_v26, %v1200_v35  ;;  %v7445_v49 = vadd.f32 %v7444_v54, %v7443_v27 }
 0x19e   : > { %v1559_v31 = vadd.f32 %v6926_v17, %v1548_v29  ;;  %v1538_v32 = vadd.f32 %v1526_v18, %v1195_v28  ;;  %v1550_v33 = vmul.f32 %v6925_v47, %v1539_v30  ;;  %v1534_v58 = vadd.f32 %v7971_v42, %v7445_v49 }
 0x1a0   : > { %v1563_v34 = vmax.f32 %v1559_v31, 0.0  ;;  %v1549_v36 = vmul.f32 %v6925_v47, %v1538_v32  ;;  %v1561_v59 = vadd.f32 %v6926_v17, %v1550_v33  ;;  %v1540_v15 = vadd.f32 %v1534_v58, %v1203_v10 }
 0x1a2   : > { %v7325_v41 = vpack.c.bf16 %v1563_v34, %v1563_v34  ;;  %v1560_v44 = vadd.f32 %v6926_v17, %v1549_v36  ;;  %v1565_v50 = vmax.f32 %v1561_v59, 0.0  ;;  %v1551_v52 = vmul.f32 %v6925_v47, %v1540_v15 }
 0x1a4   : > { %1583 = vst [vmem:[#allocation2 + $0x14] sm:$0xf] %v7325_v41  ;;  %v1564_v55 = vmax.f32 %v1560_v44, 0.0  ;;  %v7327_v57 = vpack.c.bf16 %v1565_v50, %v1565_v50  ;;  %v1562_v62 = vadd.f32 %v6926_v17, %v1551_v52 }
 0x1a6   : > { %v7326_v39 = vpack.c.bf16 %v1564_v55, %v1564_v55  ;;  %1585 = vst [vmem:[#allocation2 + $0x24] sm:$0xf] %v7327_v57  ;;  %v1566_v63 = vmax.f32 %v1562_v62, 0.0 }
 0x1a8   : > { %1584 = vst [vmem:[#allocation2 + $0x18] sm:$0xf] %v7326_v39  ;;  %v7328_v46 = vpack.c.bf16 %v1566_v63, %v1566_v63 }
 0x1aa   : > { %1586 = vst [vmem:[#allocation2 + $0x28] sm:$0xf] %v7328_v46 }
 0x1ab   : > { %v1591_v24 = vld [vmem:[#allocation2 + $0x14] sm:$0xf] }
 0x1ac   : > { %v1722_v48 = vld [vmem:[#allocation2 + $0x14] sm:$0xf]  ;;  %v1627_v21 = vshrl.u32 %v1591_v24, 16  ;;  %v1630_v5 = vshll.u32 %v1591_v24, 16  ;;  %v8414_v24 = vld [vmem:[#allocation7 + $0x278] sm:$0xff]  }
 0x1ad   : > { %v1705_v60 = vld [vmem:[#allocation2 + $0x14] sm:$0xf]  ;;  %v1756_v12 = vshrl.u32 %v1722_v48, 16  ;;  %v1759_v22 = vshll.u32 %v1722_v48, 16  ;;  %v1594_v2 = vld [vmem:[#allocation2 + $0x24] sm:$0xf] }
 0x1ae   : > { %1713 = vst [vmem:[#allocation3 + $0x1c] sm:$0xf] %v1705_v60  ;;  %v1629_v3 = vrot.slane %v1627_v21, 7  ;;  %v1725_v56 = vld [vmem:[#allocation2 + $0x24] sm:$0xf]  ;;  %v1649_v35 = vshrl.u32 %v1594_v2, 16 }
 0x1af   : > { %v1758_v6 = vrot.slane %v1756_v12, 4  ;;  %v1592_v47 = vld [vmem:[#allocation2 + $0x18] sm:$0xf]  ;;  %v1707_v42 = vld [vmem:[#allocation2 + $0x24] sm:$0xf]  ;;  %v1761_v19 = vrot.slane %v1759_v22, 5 }
 0x1b0   : > { %v1706_v8 = vld [vmem:[#allocation2 + $0x18] sm:$0xf]  ;;  %v1632_v38 = vor.u32 %v1630_v5, %v1629_v3  ;;  %v1634_v11 = vrot.slane %v1629_v3, 4  ;;  %v1636_v13 = vshrl.u32 %v1592_v47, 16  ;;  %v1639_v17 = vshll.u32 %v1592_v47, 16  ;;  %v8416_v12 = vld [vmem:[#allocation7 + $0x2b0] sm:$0xff]  }
 0x1b1   : > { %v1723_v9 = vld [vmem:[#allocation2 + $0x18] sm:$0xf]  ;;  %1714 = vst [vmem:[#allocation3 + $0x28] sm:$0xf] %v1706_v8  ;;  %1715 = vst [vmem:[#allocation3 + $0x34] sm:$0xf] %v1707_v42  ;;  %v1762_v29 = vor.u32 %v1761_v19, %v1758_v6 }
 0x1b2   : > { %v1765_v20 = vshll.u32 %v1723_v9, 16  ;;  %v1769_v27 = vshrl.u32 %v1723_v9, 16  ;;  %v1595_v14 = vld [vmem:[#allocation2 + $0x28] sm:$0xf]  ;;  %v1633_v26 = vsel %vm9136_vm4, %v6932_v53, %v1632_v38  ;;  %v1638_v16 = vrot.slane %v1636_v13, 7  ;;  %v8418_v3 = vld [vmem:[#allocation7 + $0x270] sm:$0xff]  }
 0x1b3   : > { %v1726_v25 = vld [vmem:[#allocation2 + $0x28] sm:$0xf]  ;;  %v1652_v28 = vshll.u32 %v1594_v2, 16  ;;  %1697 = vst [vmem:[#allocation3 + $0x18] sm:$0xf] %v1633_v26  ;;  %v1651_v30 = vrot.slane %v1649_v35, 7 }
 0x1b4   : > { %v1767_v18 = vrot.slane %v1765_v20, 5  ;;  %v1771_v54 = vrot.slane %v1769_v27, 4  ;;  %v1708_v49 = vld [vmem:[#allocation2 + $0x28] sm:$0xf]  ;;  %v1641_v31 = vor.u32 %v1639_v17, %v1638_v16  ;;  %v1658_v32 = vshrl.u32 %v1595_v14, 16  ;;  %v8426_v9 = vld [vmem:[#allocation7 + $0x2a0] sm:$0xff]  }
 0x1b5   : > { %v1661_v10 = vshll.u32 %v1595_v14, 16  ;;  %1716 = vst [vmem:[#allocation3 + $0x40] sm:$0xf] %v1708_v49  ;;  %v1780_v33 = vshrl.u32 %v1725_v56, 16  ;;  %v1763_v58 = vrot.slane %v1762_v29, 4  ;;  %v1654_v36 = vor.u32 %v1652_v28, %v1651_v30  ;;  %v8421_v47 = vld [vmem:[#allocation7 + $0x2a8] sm:$0xff]  }
 0x1b6   : > { %v1772_v34 = vor.u32 %v1771_v54, %v1767_v18  ;;  %v1656_v37 = vrot.slane %v1651_v30, 4  ;;  %v1642_v59 = vsel %vm9136_vm4, %v1634_v11, %v1641_v31  ;;  %v1660_v15 = vrot.slane %v1658_v32, 7  ;;  %v8423_v8 = vld [vmem:[#allocation7 + $0x268] sm:$0xff]   ;;  %v8428_v38 = vld [vmem:[#allocation7 + $0x2f0] sm:$0xff]   ;;  %v8427_v17 = vld [vmem:[#allocation7 + $0x260] sm:$0xff]  }
 0x1b7   : > { %v1782_v41 = vrot.slane %v1780_v33, 4  ;;  %v1783_v44 = vshll.u32 %v1725_v56, 16  ;;  %1698 = vst [vmem:[#allocation3 + $0x24] sm:$0xf] %v1642_v59  ;;  %v1768_v45 = vsel %vm9146_vm5, %v1763_v58, %v1767_v18  ;;  %v1655_v52 = vsel %vm9136_vm4, %v6933_v1, %v1654_v36  ;;  %v8441_v11 = vld [vmem:[#allocation3 + $0x4] ss:$12 sps:$4 sm:$0xff]  }
 0x1b8   : > { %v1773_v50 = vrot.slane %v1772_v34, 4  ;;  %v1789_v53 = vshll.u32 %v1726_v25, 16  ;;  %1837 = vst [vmem:[#allocation3 + $0x20] sm:$0xf] %v1768_v45  ;;  %v1663_v55 = vor.u32 %v1661_v10, %v1660_v15  ;;  %1699 = vst [vmem:[#allocation3 + $0x30] sm:$0xf] %v1655_v52 }
 0x1b9   : > { %v1785_v57 = vrot.slane %v1783_v44, 5  ;;  %v1793_v62 = vshrl.u32 %v1726_v25, 16  ;;  %v1801_v21 = vrot.slane %v1799_v7, 5  ;;  %v9286_v22 = vld [vmem:[#allocation3 + $0x1c] ss:$12 sps:$4 sm:$0xff]   ;;  %v8432_v35 = vld [vmem:[#allocation7 + $0x290] sm:$0xff]  }
 0x1ba   : > { %v1778_v39 = vsel %vm9146_vm5, %v1773_v50, %v9268_v4  ;;  %v1791_v63 = vrot.slane %v1789_v53, 5  ;;  %v1664_v40 = vsel %vm9136_vm4, %v1656_v37, %v1663_v55  ;;  %2161 = vmatprep.mubr.bf16.mxu0 %v9286_v22  ;;  %v8737_v42 = vld [vmem:[#allocation7 + $0x2f8] sm:$0xff]   ;;  %v8431_v20 = vld [vmem:[#allocation7 + $0x2e8] sm:$0xff]   ;;  %v8434_v14 = vld [vmem:[#allocation7 + $0x2e0] sm:$0xff]  }
 0x1bb   : > { %1838 = vst [vmem:[#allocation3 + $0x2c] sm:$0xf] %v1778_v39  ;;  %v1786_v46 = vor.u32 %v1785_v57, %v1782_v41  ;;  %v1795_v0 = vrot.slane %v1793_v62, 4  ;;  %1700 = vst [vmem:[#allocation3 + $0x3c] sm:$0xf] %v1664_v40  ;;  %v8429_v19 = vld [vmem:[#allocation7 + $0x298] sm:$0xff]  }
 0x1bc   : > { %v9298_v7 = vld [vmem:[#allocation3 + $0x34] ss:$12 sps:$4 sm:$0xff]   ;;  %v8430_v27 = vld [vmem:[#allocation7 + $0x258] sm:$0xff]   ;;  %v8435_v26 = vld [vmem:[#allocation7 + $0x288] sm:$0xff]  }
 0x1bd   : > { %v1787_v48 = vrot.slane %v1786_v46, 4  ;;  %v1796_v60 = vor.u32 %v1795_v0, %v1791_v63  ;;  %v8433_v25 = vld [vmem:[#allocation7 + $0x250] sm:$0xff]   ;;  %v8437_v16 = vld [vmem:[#allocation7 + $0x2d8] sm:$0xff]   ;;  %v8436_v28 = vld [vmem:[#allocation7 + $0x248] sm:$0xff]  }
 0x1be   : > { %v9288_v1 = vld [vmem:[#allocation3 + $0x18] ss:$12 sps:$4 sm:$0xff]   ;;  %v8445_v30 = vld [vmem:[#allocation7 + $0x2c8] sm:$0xff]   ;;  %v8447_v32 = vld [vmem:[#allocation7 + $0x430] sm:$0xff]  }
 0x1bf   : > { %v1792_v4 = vsel %vm9146_vm5, %v1787_v48, %v1791_v63  ;;  %v1797_v2 = vrot.slane %v1796_v60, 4  ;;  %2162 = vmatmul.mubr.bf16.vlgmr.msra.gmra.mxu0 %v9288_v1  ;;  %v8438_v29 = vld [vmem:[#allocation7 + $0x280] sm:$0xff]   ;;  %v8444_v54 = vld [vmem:[#allocation7 + $0x438] sm:$0xff]   ;;  %v8449_v33 = vld [vmem:[#allocation7 + $0x3f0] sm:$0xff]  }
 0x1c0   : > { %1839 = vst [vmem:[#allocation3 + $0x38] sm:$0xf] %v1792_v4  ;;  %7495 = vmatpush3.bf16.msra.mxu0 %v8414_v24  ;;  %2169 = vmatprep.mubr.bf16.mxu0 %v9298_v7  ;;  %v8439_v18 = vld [vmem:[#allocation7 + $0x240] sm:$0xff]   ;;  %v8446_v31 = vld [vmem:[#allocation7 + $0x3f8] sm:$0xff]   ;;  %v8451_v58 = vld [vmem:[#allocation7 + $0x428] sm:$0xff]  }
 0x1c1   : > { %v1802_v5 = vsel %vm9146_vm5, %v1797_v2, %v1801_v21  ;;  %7496 = vmatprep.subr.bf16.mxu0 %v8416_v12  ;;  %v8443_v49 = vld [vmem:[#allocation3] ss:$12 sps:$4 sm:$0xff]   ;;  %v8453_v34 = vld [vmem:[#allocation7 + $0x478] sm:$0xff]   ;;  %v8457_v59 = vld [vmem:[#allocation7 + $0x470] sm:$0xff]  }
 0x1c2   : > { %v9296_v6 = vld [vmem:[#allocation3 + $0x20] ss:$12 sps:$4 sm:$0xff]   ;;  %1840 = vst [vmem:[#allocation3 + $0x44] sm:$0xf] %v1802_v5  ;;  %v9301_v56 = vld [vmem:[#allocation3 + $0x30] ss:$12 sps:$4 sm:$0xff]  }
 0x1c3   : > { %7988 = vmatprep.mubr.bf16.mxu1 %v9296_v6  ;;  %v8448_v10 = vld [vmem:[#allocation7 + $0x2c0] sm:$0xff]   ;;  %v8452_v36 = vld [vmem:[#allocation7 + $0x3e8] sm:$0xff]   ;;  %v8458_v44 = vld [vmem:[#allocation7 + $0x418] sm:$0xff]  }
 0x1c4   : > { %7497 = vmatpush3.bf16.msra.mxu0 %v8418_v3  ;;  %v8455_v37 = vld [vmem:[#allocation7 + $0x420] sm:$0xff]   ;;  %v8460_v45 = vld [vmem:[#allocation7 + $0x468] sm:$0xff]   ;;  %v8459_v50 = vld [vmem:[#allocation7 + $0x3d8] sm:$0xff]  }
 0x1c5   : > { %7498 = vmatprep.subr.bf16.mxu0 %v8421_v47  ;;  %v8456_v41 = vld [vmem:[#allocation7 + $0x3e0] sm:$0xff]   ;;  %v8461_v52 = vld [vmem:[#allocation7 + $0x410] sm:$0xff]   ;;  %v8464_v57 = vld [vmem:[#allocation7 + $0x408] sm:$0xff]  }
 0x1c6   : > { %v8463_v53 = vld [vmem:[#allocation7 + $0x460] sm:$0xff]   ;;  %v8462_v55 = vld [vmem:[#allocation7 + $0x3d0] sm:$0xff]   ;;  %v8466_v62 = vld [vmem:[#allocation7 + $0x458] sm:$0xff]  }
 0x1c7   : > { %2170 = vmatmul.mubr.bf16.gmra.mxu0 %v9301_v56  ;;  %v8465_v39 = vld [vmem:[#allocation7 + $0x3c8] sm:$0xff]   ;;  %v8467_v63 = vld [vmem:[#allocation7 + $0x400] sm:$0xff]   ;;  %v8469_v40 = vld [vmem:[#allocation7 + $0x450] sm:$0xff]  }
 0x1c8   : > { %7499 = vmatpush3.bf16.msra.mxu0 %v8423_v8  ;;  %2419 = vmatprep.mubr.bf16.mxu0 %v8441_v11  ;;  %v8468_v46 = vld [vmem:[#allocation7 + $0x3c0] sm:$0xff]   ;;  %v8470_v0 = vld [vmem:[#allocation7 + $0x448] sm:$0xff]   ;;  %v8476_v21 = vld [vmem:[#allocation7 + $0x5b8] sm:$0xff]  }
 0x1c9   : > { %v8425_v13 = vld [vmem:[#allocation3 + $0x38] ss:$12 sps:$4 sm:$0xff]   ;;  %7500 = vmatprep.subr.bf16.mxu0 %v8426_v9  ;;  %v8474_v60 = vld [vmem:[#allocation3 + $0x48] ss:$12 sps:$4 sm:$0xff]  }
 0x1ca   : > { %7989 = vmatmul.mubr.bf16.vlgmr.msra.gmra.mxu1 %v8425_v13  ;;  %v8454_v15 = vld [vmem:[#allocation3 + $0x38] ss:$12 sps:$4 sm:$0xff]   ;;  %v8480_v4 = vld [vmem:[#allocation7 + $0x570] sm:$0xff]   ;;  %v8482_v3 = vld [vmem:[#allocation7 + $0x5a8] sm:$0xff]  }
 0x1cb   : > { %7993 = vmatpush3.bf16.msra.mxu1 %v8737_v42  ;;  %8008 = vmatprep.mubr.bf16.mxu1 %v9229_v43  ;;  %v8440_v43 = vld [vmem:[#allocation7 + $0x2d0] sm:$0xff]   ;;  %v8472_v24 = vld [vmem:[#allocation3 + $0x4c] ss:$12 sps:$4 sm:$0xff]   ;;  %v8471_v48 = vld [vmem:[#allocation7 + $0x440] sm:$0xff]  }
 0x1cc   : > { %7994 = vmatprep.subr.bf16.mxu1 %v8428_v38  ;;  %7501 = vmatpush3.bf16.msra.mxu0 %v8427_v17  ;;  %v8477_v12 = vld [vmem:[#allocation7 + $0x578] sm:$0xff]   ;;  %v8481_v2 = vld [vmem:[#allocation7 + $0x5f0] sm:$0xff]   ;;  %v8483_v5 = vld [vmem:[#allocation7 + $0x568] sm:$0xff]  }
 0x1cd   : > { %7502 = vmatprep.subr.bf16.mxu0 %v8429_v19  ;;  %v8486_v47 = vld [vmem:[#allocation7 + $0x560] sm:$0xff]   ;;  %v8490_v8 = vld [vmem:[#allocation7 + $0x5d8] sm:$0xff]   ;;  %v8493_v11 = vld [vmem:[#allocation7 + $0x5d0] sm:$0xff]  }
 0x1ce   : > { %v8489_v9 = vld [vmem:[#allocation7 + $0x558] sm:$0xff]   ;;  %v8492_v13 = vld [vmem:[#allocation7 + $0x550] sm:$0xff]   ;;  %v8494_v17 = vld [vmem:[#allocation7 + $0x588] sm:$0xff]  }
 0x1cf   : > { %7995 = vmatpush3.bf16.msra.mxu1 %v8428_v38  ;;  %v8491_v38 = vld [vmem:[#allocation7 + $0x590] sm:$0xff]   ;;  %v8496_v42 = vld [vmem:[#allocation7 + $0x5c8] sm:$0xff]  }
 0x1d0   : > { %7996 = vmatprep.subr.bf16.mxu1 %v8431_v20  ;;  %7503 = vmatpush3.bf16.msra.mxu0 %v8430_v27  ;;  %v8495_v19 = vld [vmem:[#allocation7 + $0x548] sm:$0xff]   ;;  %v8499_v27 = vld [vmem:[#allocation7 + $0x5c0] sm:$0xff]  }
 0x1d1   : > { %7504 = vmatprep.subr.bf16.mxu0 %v8432_v35  ;;  %v8498_v35 = vld [vmem:[#allocation7 + $0x540] sm:$0xff]  }
 0x1d3   : > { %7997 = vmatpush3.bf16.msra.mxu1 %v8431_v20  ;;  %v8497_v20 = vld [vmem:[#allocation7 + $0x580] sm:$0xff]  }
 0x1d4   : > { %7998 = vmatprep.subr.bf16.mxu1 %v8434_v14  ;;  %7505 = vmatpush3.bf16.msra.mxu0 %v8433_v25  ;;  %v9312_v25 = vld [vmem:[#allocation7 + $0x538] sm:$0xff]  }
 0x1d5   : > { %7506 = vmatprep.subr.bf16.mxu0 %v8435_v26 }
 0x1d7   : > { %7999 = vmatpush3.bf16.msra.mxu1 %v8434_v14  ;;  %v8502_v14 = vld [vmem:[#allocation7 + $0x4f8] sm:$0xff]  }
 0x1d8   : > { %8000 = vmatprep.subr.bf16.mxu1 %v8437_v16  ;;  %7507 = vmatpush3.bf16.msra.mxu0 %v8436_v28  ;;  %v2869_v28 = vld [vmem:[#allocation2 + $0x4] sm:$0xf] }
 0x1d9   : > { %7508 = vmatprep.subr.bf16.mxu0 %v8438_v29  ;;  %v2870_v29 = vld [vmem:[#allocation2 + $0x8] sm:$0xf] }
 0x1db   : > { %8001 = vmatpush3.bf16.msra.mxu1 %v8437_v16 }
 0x1dc   : > { %8002 = vmatprep.subr.bf16.mxu1 %v8440_v43  ;;  %7509 = vmatpush3.bf16.msra.mxu0 %v8439_v18  ;;  %v2895_v18 = vshrl.u32 %v2870_v29, 16 }
 0x1dd   : > { %7532 = vmatprep.subr.bf16.mxu0 %v8444_v54  ;;  %v2868_v54 = vld [vmem:[#allocation2] sm:$0x8] }
 0x1df   : > { %8003 = vmatpush3.bf16.msra.mxu1 %v8440_v43  ;;  %2420 = vmatmul.mubr.bf16.vlgmr.msra.gmra.mxu0 %v8443_v49  ;;  %v2886_v43 = vshrl.u32 %v2869_v28, 16 }
 0x1e0   : > { %8004 = vmatprep.subr.bf16.mxu1 %v8445_v30  ;;  %2427 = vmatprep.mubr.bf16.mxu0 %v9286_v22  ;;  %v8478_v22 = vld [vmem:[#allocation7 + $0x5f8] sm:$0xff]  }
 0x1e1   : > { %7533 = vmatpush3.bf16.msra.mxu0 %v8446_v31  ;;  %v2888_v49 = vrot.slane %v2886_v43, 7  ;;  %v2889_v31 = vshll.u32 %v2869_v28, 16  ;;  %v9343_v43 = vld [vmem:[#allocation3 + $0x8] ss:$12 sps:$4 sm:$0xff]  }
 0x1e2   : > { %7534 = vmatprep.subr.bf16.mxu0 %v8447_v32 }
 0x1e3   : > { %8005 = vmatpush3.bf16.msra.mxu1 %v8445_v30  ;;  %v2881_v30 = vshrl.u32 %v2868_v54, 16 }
 0x1e4   : > { %8006 = vmatprep.subr.bf16.mxu1 %v8448_v10 }
 0x1e5   : > { %7535 = vmatpush3.bf16.msra.mxu0 %v8449_v33  ;;  %v2898_v33 = vshll.u32 %v2870_v29, 16 }
 0x1e6   : > { %7536 = vmatprep.subr.bf16.mxu0 %v8451_v58  ;;  %v7028_v58 = vrot.slane %v2881_v30, 11 }
 0x1e7   : > { %8007 = vmatpush3.bf16.msra.mxu1 %v8448_v10  ;;  %2428 = vmatmul.mubr.bf16.gmra.mxu0 %v9288_v1  ;;  %v8479_v1 = vld [vmem:[#allocation7 + $0x5b0] sm:$0xff]   ;;  %v2897_v10 = vrot.slane %v2895_v18, 7 }
 0x1e8   : > { %8012 = vmatprep.subr.bf16.mxu1 %v8453_v34  ;;  %2750 = vmatprep.mubr.bf16.mxu0 %v9298_v7  ;;  %v8485_v7 = vld [vmem:[#allocation7 + $0x5a0] sm:$0xff]  }
 0x1e9   : > { %7537 = vmatpush3.bf16.msra.mxu0 %v8452_v36  ;;  %v2893_v36 = vrot.slane %v2888_v49, 4 }
 0x1ea   : > { %8009 = vmatmul.mubr.bf16.vlgmr.msra.gmra.mxu1 %v9296_v6  ;;  %7538 = vmatprep.subr.bf16.mxu0 %v8455_v37  ;;  %v8484_v6 = vld [vmem:[#allocation7 + $0x5e8] sm:$0xff]   ;;  %v2900_v37 = vor.u32 %v2898_v33, %v2897_v10  ;;  %v2878_v33 = vld [vmem:[#allocation2 + $0x34] sm:$0xf] }
 0x1eb   : > { %8013 = vmatpush3.bf16.msra.mxu1 %v8453_v34  ;;  %8028 = vmatprep.mubr.bf16.mxu1 %v8454_v15  ;;  %v2891_v34 = vor.u32 %v2889_v31, %v2888_v49  ;;  %v2984_v15 = vld [vmem:[#allocation2 + $0x4] sm:$0xf] }
 0x1ec   : > { %8014 = vmatprep.subr.bf16.mxu1 %v8457_v59  ;;  %2992 = vst [vmem:[#allocation3 + $0x4] sm:$0xf] %v2984_v15  ;;  %v2877_v15 = vld [vmem:[#allocation2 + $0x30] sm:$0x8] }
 0x1ed   : > { %7539 = vmatpush3.bf16.msra.mxu0 %v8456_v41  ;;  %v2985_v41 = vld [vmem:[#allocation2 + $0x8] sm:$0xf] }
 0x1ee   : > { %7540 = vmatprep.subr.bf16.mxu0 %v8458_v44  ;;  %2993 = vst [vmem:[#allocation3 + $0x10] sm:$0xf] %v2985_v41  ;;  %v2947_v41 = vshrl.u32 %v2877_v15, 16 }
 0x1ef   : > { %8015 = vmatpush3.bf16.msra.mxu1 %v8457_v59  ;;  %v2892_v59 = vsel %vm9136_vm4, %v7028_v58, %v2891_v34  ;;  %v2879_v58 = vld [vmem:[#allocation2 + $0x38] sm:$0xf] }
 0x1f0   : > { %8016 = vmatprep.subr.bf16.mxu1 %v8460_v45  ;;  %2976 = vst [vmem:[#allocation3] sm:$0xf] %v2892_v59 }
 0x1f1   : > { %7541 = vmatpush3.bf16.msra.mxu0 %v8459_v50 }
 0x1f2   : > { %7542 = vmatprep.subr.bf16.mxu0 %v8461_v52  ;;  %v4149_v52 = vld [vmem:[#allocation2] sm:$0x8] }
 0x1f3   : > { %8017 = vmatpush3.bf16.msra.mxu1 %v8460_v45  ;;  %v2901_v45 = vsel %vm9136_vm4, %v2893_v36, %v2900_v37  ;;  %v2952_v36 = vshrl.u32 %v2878_v33, 16  ;;  %v2961_v37 = vshrl.u32 %v2879_v58, 16 }
 0x1f4   : > { %8018 = vmatprep.subr.bf16.mxu1 %v8463_v53  ;;  %2977 = vst [vmem:[#allocation3 + $0xc] sm:$0xf] %v2901_v45 }
 0x1f5   : > { %7543 = vmatpush3.bf16.msra.mxu0 %v8462_v55  ;;  %v4151_v55 = vld [vmem:[#allocation2 + $0x8] sm:$0xf]  ;;  %v2954_v45 = vrot.slane %v2952_v36, 7 }
 0x1f6   : > { %7544 = vmatprep.subr.bf16.mxu0 %v8464_v57  ;;  %v4162_v57 = vshrl.u32 %v4149_v52, 16  ;;  %v2955_v52 = vshll.u32 %v2878_v33, 16 }
 0x1f7   : > { %8019 = vmatpush3.bf16.msra.mxu1 %v8463_v53  ;;  %v4150_v53 = vld [vmem:[#allocation2 + $0x4] sm:$0xf] }
 0x1f8   : > { %8020 = vmatprep.subr.bf16.mxu1 %v8466_v62 }
 0x1f9   : > { %7545 = vmatpush3.bf16.msra.mxu0 %v8465_v39  ;;  %v4170_v39 = vshll.u32 %v4150_v53, 16 }
 0x1fa   : > { %7546 = vmatprep.subr.bf16.mxu0 %v8467_v63  ;;  %v4176_v63 = vshrl.u32 %v4151_v55, 16 }
 0x1fb   : > { %8021 = vmatpush3.bf16.msra.mxu1 %v8466_v62  ;;  %v4167_v62 = vshrl.u32 %v4150_v53, 16  ;;  %v2963_v53 = vrot.slane %v2961_v37, 7 }
 0x1fc   : > { %8022 = vmatprep.subr.bf16.mxu1 %v8469_v40 }
 0x1fd   : > { %7547 = vmatpush3.bf16.msra.mxu0 %v8468_v46  ;;  %v9331_v46 = vld [vmem:[#allocation3 + $0x4] ss:$12 sps:$4 sm:$0xff]  }
 0x1fe   : > { %7570 = vmatprep.subr.bf16.mxu0 %v8476_v21  ;;  %v4178_v21 = vrot.slane %v4176_v63, 7  ;;  %v2959_v63 = vrot.slane %v2954_v45, 4 }
 0x1ff   : > { %8023 = vmatpush3.bf16.msra.mxu1 %v8469_v40 }
 0x200   : > { %8024 = vmatprep.subr.bf16.mxu1 %v8470_v0  ;;  %2751 = vmatmul.mubr.bf16.vlgmr.msra.gmra.mxu0 %v9301_v56  ;;  %v8488_v56 = vld [vmem:[#allocation7 + $0x598] sm:$0xff]  }
 0x201   : > { %2758 = vmatprep.mubr.bf16.mxu0 %v8472_v24  ;;  %7571 = vmatpush3.bf16.msra.mxu0 %v8477_v12  ;;  %v4265_v24 = vld [vmem:[#allocation2 + $0x4] sm:$0xf]  ;;  %v4266_v12 = vld [vmem:[#allocation2 + $0x8] sm:$0xf] }
 0x202   : > { %7572 = vmatprep.subr.bf16.mxu0 %v8479_v1  ;;  %4273 = vst [vmem:[#allocation3 + $0x4] sm:$0xf] %v4265_v24  ;;  %4274 = vst [vmem:[#allocation3 + $0x10] sm:$0xf] %v4266_v12  ;;  %v4282_v1 = vld [vmem:[#allocation2 + $0x8] sm:$0xf] }
 0x203   : > { %8025 = vmatpush3.bf16.msra.mxu1 %v8470_v0  ;;  %v4179_v0 = vshll.u32 %v4151_v55, 16  ;;  %v2964_v55 = vshll.u32 %v2879_v58, 16 }
 0x204   : > { %8026 = vmatprep.subr.bf16.mxu1 %v8471_v48 }
 0x205   : > { %7573 = vmatpush3.bf16.msra.mxu0 %v8480_v4  ;;  %v2966_v24 = vor.u32 %v2964_v55, %v2963_v53 }
 0x206   : > { %7574 = vmatprep.subr.bf16.mxu0 %v8482_v3  ;;  %v4181_v3 = vor.u32 %v4179_v0, %v4178_v21  ;;  %v2991_v21 = vld [vmem:[#allocation2 + $0x38] sm:$0xf] }
 0x207   : > { %8027 = vmatpush3.bf16.msra.mxu1 %v8471_v48  ;;  %v7125_v48 = vrot.slane %v4162_v57, 11  ;;  %v2967_v12 = vsel %vm9136_vm4, %v2959_v63, %v2966_v24  ;;  %2999 = vst [vmem:[#allocation3 + $0x58] sm:$0xf] %v2991_v21 }
 0x208   : > { %2759 = vmatmul.mubr.bf16.gmra.mxu0 %v8474_v60  ;;  %8032 = vmatprep.subr.bf16.mxu1 %v8478_v22  ;;  %v4169_v60 = vrot.slane %v4167_v62, 7  ;;  %v7031_v62 = vrot.slane %v2947_v41, 11  ;;  %2983 = vst [vmem:[#allocation3 + $0x54] sm:$0xf] %v2967_v12  ;;  %v4271_v41 = vld [vmem:[#allocation2 + $0x34] sm:$0xf] }
 0x209   : > { %7575 = vmatpush3.bf16.msra.mxu0 %v8483_v5  ;;  %v4283_v5 = vld [vmem:[#allocation2 + $0xc] sm:$0x1] }
 0x20a   : > { %8029 = vmatmul.mubr.bf16.vlgmr.msra.gmra.mxu1 %v9253_v51  ;;  %v8487_v51 = vld [vmem:[#allocation7 + $0x5e0] sm:$0xff]   ;;  %7576 = vmatprep.subr.bf16.mxu0 %v8485_v7  ;;  %v4172_v4 = vor.u32 %v4170_v39, %v4169_v60  ;;  %v2957_v39 = vor.u32 %v2955_v52, %v2954_v45  ;;  %v4272_v45 = vld [vmem:[#allocation2 + $0x38] sm:$0xf] }
 0x20b   : > { %8033 = vmatpush3.bf16.msra.mxu1 %v8478_v22  ;;  %v4281_v22 = vld [vmem:[#allocation2 + $0x4] sm:$0xf] }
 0x20c   : > { %8034 = vmatprep.subr.bf16.mxu1 %v8481_v2 }
 0x20d   : > { %7577 = vmatpush3.bf16.msra.mxu0 %v8486_v47  ;;  %v4303_v47 = vshll.u32 %v4282_v1, 16 }
 0x20e   : > { %7578 = vmatprep.subr.bf16.mxu0 %v8488_v56  ;;  %v4307_v56 = vshrl.u32 %v4282_v1, 16 }
 0x20f   : > { %8035 = vmatpush3.bf16.msra.mxu1 %v8481_v2  ;;  %v4174_v2 = vrot.slane %v4169_v60, 4  ;;  %v2990_v60 = vld [vmem:[#allocation2 + $0x34] sm:$0xf] }
 0x210   : > { %8036 = vmatprep.subr.bf16.mxu1 %v8484_v6  ;;  %2998 = vst [vmem:[#allocation3 + $0x4c] sm:$0xf] %v2990_v60 }
 0x211   : > { %7579 = vmatpush3.bf16.msra.mxu0 %v8489_v9  ;;  %v4173_v9 = vsel %vm9136_vm4, %v7125_v48, %v4172_v4  ;;  %v2958_v48 = vsel %vm9136_vm4, %v7031_v62, %v2957_v39 }
 0x212   : > { %7580 = vmatprep.subr.bf16.mxu0 %v8491_v38  ;;  %v4182_v38 = vsel %vm9136_vm4, %v4174_v2, %v4181_v3  ;;  %4257 = vst [vmem:[#allocation3] sm:$0xf] %v4173_v9  ;;  %2982 = vst [vmem:[#allocation3 + $0x48] sm:$0xf] %v2958_v48  ;;  %v4290_v2 = vld [vmem:[#allocation2 + $0x34] sm:$0xf] }
 0x213   : > { %8037 = vmatpush3.bf16.msra.mxu1 %v8484_v6  ;;  %v4294_v6 = vshrl.u32 %v4281_v22, 16  ;;  %4258 = vst [vmem:[#allocation3 + $0xc] sm:$0xf] %v4182_v38  ;;  %v4291_v3 = vld [vmem:[#allocation2 + $0x38] sm:$0xf] }
 0x214   : > { %8038 = vmatprep.subr.bf16.mxu1 %v8487_v51 }
 0x215   : > { %7581 = vmatpush3.bf16.msra.mxu0 %v8492_v13 }
 0x216   : > { %7582 = vmatprep.subr.bf16.mxu0 %v8494_v17  ;;  %v4305_v17 = vrot.slane %v4303_v47, 5  ;;  %v4375_v47 = vshll.u32 %v4291_v3, 16 }
 0x217   : > { %8039 = vmatpush3.bf16.msra.mxu1 %v8487_v51  ;;  %v4297_v51 = vshll.u32 %v4281_v22, 16 }
 0x218   : > { %8040 = vmatprep.subr.bf16.mxu1 %v8490_v8 }
 0x219   : > { %7583 = vmatpush3.bf16.msra.mxu0 %v8495_v19  ;;  %v4299_v13 = vrot.slane %v4297_v51, 5  ;;  %v4369_v51 = vshll.u32 %v4290_v2, 16 }
 0x21a   : > { %7584 = vmatprep.subr.bf16.mxu0 %v8497_v20 }
 0x21b   : > { %8041 = vmatpush3.bf16.msra.mxu1 %v8490_v8  ;;  %v4313_v8 = vshll.u32 %v4283_v5, 16  ;;  %v4292_v5 = vld [vmem:[#allocation2 + $0x3c] sm:$0x1] }
 0x21c   : > { %8042 = vmatprep.subr.bf16.mxu1 %v8493_v11  ;;  %v4385_v38 = vshll.u32 %v4292_v5, 16  ;;  %v9378_v5 = vld [vmem:[#allocation3 + $0x50] ss:$12 sps:$4 sm:$0xff]  }
 0x21d   : > { %7585 = vmatpush3.bf16.msra.mxu0 %v8498_v35  ;;  %v4315_v35 = vrot.slane %v4313_v8, 5  ;;  %v4158_v8 = vld [vmem:[#allocation2 + $0x30] sm:$0x8] }
 0x21e   : > { %7608 = vmatprep.subr.bf16.mxu0 %v8502_v14 }
 0x21f   : > { %8043 = vmatpush3.bf16.msra.mxu1 %v8493_v11  ;;  %v4296_v11 = vrot.slane %v4294_v6, 4  ;;  %v4366_v6 = vshrl.u32 %v4290_v2, 16 }
 0x220   : > { %8044 = vmatprep.subr.bf16.mxu1 %v8496_v42 }
 0x221   : > { %v4300_v20 = vor.u32 %v4299_v13, %v4296_v11  ;;  %v4159_v11 = vld [vmem:[#allocation2 + $0x34] sm:$0xf]  ;;  %v4160_v13 = vld [vmem:[#allocation2 + $0x38] sm:$0xf] }
 0x222   : > { %v4233_v33 = vshrl.u32 %v4159_v11, 16  ;;  %v4236_v37 = vshll.u32 %v4159_v11, 16  ;;  %v4242_v15 = vshrl.u32 %v4160_v13, 16  ;;  %v4245_v62 = vshll.u32 %v4160_v13, 16 }
 0x223   : > { %8045 = vmatpush3.bf16.msra.mxu1 %v8496_v42  ;;  %v4309_v42 = vrot.slane %v4307_v56, 4  ;;  %v4301_v28 = vrot.slane %v4300_v20, 4  ;;  %v4379_v56 = vshrl.u32 %v4291_v3, 16  ;;  %v4368_v20 = vrot.slane %v4366_v6, 4 }
 0x224   : > { %8046 = vmatprep.subr.bf16.mxu1 %v8499_v27  ;;  %v4235_v55 = vrot.slane %v4233_v33, 7  ;;  %v4244_v60 = vrot.slane %v4242_v15, 7 }
 0x225   : > { %v4306_v18 = vsel %vm9146_vm5, %v4301_v28, %v4305_v17  ;;  %v4381_v28 = vrot.slane %v4379_v56, 4 }
 0x226   : > { %4397 = vst [vmem:[#allocation3 + $0x8] sm:$0xf] %v4306_v18  ;;  %v4387_v18 = vrot.slane %v4385_v38, 5  ;;  %v4238_v12 = vor.u32 %v4236_v37, %v4235_v55  ;;  %v4240_v2 = vrot.slane %v4235_v55, 4 }
 0x227   : > { %8047 = vmatpush3.bf16.msra.mxu1 %v8499_v27  ;;  %v4310_v27 = vor.u32 %v4309_v42, %v4305_v17  ;;  %v4228_v17 = vshrl.u32 %v4158_v8, 16 }
 0x228   : > { %8052 = vmatprep.subr.bf16.mxu1 %v9312_v25 }
 0x229   : > { %v4311_v29 = vrot.slane %v4310_v27, 4  ;;  %v4371_v27 = vrot.slane %v4369_v51, 5  ;;  %v7128_v53 = vrot.slane %v4228_v17, 11 }
 0x22b   : > { %v4316_v54 = vsel %vm9146_vm5, %v4311_v29, %v4315_v35  ;;  %v4377_v35 = vrot.slane %v4375_v47, 5  ;;  %v4372_v58 = vor.u32 %v4371_v27, %v4368_v20  ;;  %v4247_v47 = vor.u32 %v4245_v62, %v4244_v60 }
 0x22c   : > { %4398 = vst [vmem:[#allocation3 + $0x14] sm:$0xf] %v4316_v54  ;;  %v9373_v54 = vld [vmem:[#allocation3 + $0x4c] ss:$12 sps:$4 sm:$0xff]  }
 0x22d   : > { %v4382_v36 = vor.u32 %v4381_v28, %v4377_v35  ;;  %4279 = vst [vmem:[#allocation3 + $0x4c] sm:$0xf] %v4271_v41  ;;  %4280 = vst [vmem:[#allocation3 + $0x58] sm:$0xf] %v4272_v45  ;;  %v4373_v24 = vrot.slane %v4372_v58, 4  ;;  %v4248_v11 = vsel %vm9136_vm4, %v4240_v2, %v4247_v47 }
 0x22e   : > { %4264 = vst [vmem:[#allocation3 + $0x54] sm:$0xf] %v4248_v11  ;;  %v7023_v41 = vld [vmem:[#allocation10 + $0x1] ss:$0 sm:$0xff]  ;;  %v9404_v11 = vld [vmem:[#allocation2 + $0x1c] sm:$0x1] }
 0x22f   : > { %v4383_v48 = vrot.slane %v4382_v36, 4  ;;  %v4378_v6 = vsel %vm9146_vm5, %v4373_v24, %v4377_v35 }
 0x230   : > { %4403 = vst [vmem:[#allocation3 + $0x50] sm:$0xf] %v4378_v6 }
 0x231   : > { %v4388_v51 = vsel %vm9146_vm5, %v4383_v48, %v4387_v18 }
 0x232   : > { %4404 = vst [vmem:[#allocation3 + $0x5c] sm:$0xf] %v4388_v51 }
 0x27f   : > { %v9315_v26 = vpop.f32.mrf.mxu0 }
 0x281   : > { %v9317_v16 = vpop.f32.mrf.mxu0 }
 0x283   : > { %v9319_v32 = vpop.f32.mrf.mxu0 }
 0x285   : > { %v9323_v44 = vpop.f32.mrf.mxu0 }
 0x286   : > { %v7477_v17 = vadd.f32 %v9323_v44, %v9319_v32  ;;  %v7022_v32 = vld [vmem:[#allocation9 + $0x1] ss:$0 sm:$0xff] }
 0x287   : > { %v9327_v50 = vpop.f32.mrf.mxu0 }
 0x289   : > { %v9329_v40 = vpop.f32.mrf.mxu0 }
 0x28a   : > { %v9353_v31 = vpop.f32.mrf.mxu1  ;;  %v7480_v39 = vadd.f32 %v9329_v40, %v9327_v50  ;;  %v7474_v50 = vadd.f32 %v9317_v16, %v9315_v26 }
 0x28b   : > { %v9333_v7 = vpop.f32.mrf.mxu0 }
 0x28c   : > { %v9357_v34 = vpop.f32.mrf.mxu1 }
 0x28d   : > { %v9339_v19 = vpop.f32.mrf.mxu0  ;;  %v2213_v26 = vadd.f32 %v7474_v50, %v9357_v34  ;;  %v2871_v50 = vld [vmem:[#allocation2 + $0x10] sm:$0x8] }
 0x28e   : > { %v9361_v57 = vpop.f32.mrf.mxu1  ;;  %v7483_v8 = vadd.f32 %v9339_v19, %v9333_v7 }
 0x290   : > { %v9367_v22 = vpop.f32.mrf.mxu1  ;;  %v2224_v27 = vadd.f32 %v9361_v57, %v7483_v8 }
 0x291   : > { %v2216_v34 = vadd.f32 %v7477_v17, %v9367_v22 }
 0x29f   : > { %v9341_v14 = vpop.f32.mrf.mxu0 }
 0x2a1   : > { %v9349_v30 = vpop.f32.mrf.mxu0 }
 0x2a2   : > { %v7512_v40 = vadd.f32 %v9349_v30, %v9341_v14 }
 0x2a3   : > { %v9351_v49 = vpop.f32.mrf.mxu0 }
 0x2a4   : > { %v2422_v7 = vadd.f32 %v7512_v40, %v2213_v26  ;;  %v2874_v40 = vld [vmem:[#allocation2 + $0x20] sm:$0x8]  ;;  %v9406_v26 = vld [vmem:[#allocation2 + $0x2c] sm:$0x1] }
 0x2a5   : > { %v9355_v10 = vpop.f32.mrf.mxu0  ;;  %v2925_v8 = vshrl.u32 %v2874_v40, 16 }
 0x2a7   : > { %v9359_v59 = vpop.f32.mrf.mxu0 }
 0x2a9   : > { %v7517_v0 = vpop.f32.mrf.mxu0 }
 0x2aa   : > { %v9371_v4 = vpop.f32.mrf.mxu1  ;;  %v7518_v3 = vadd.f32 %v7517_v0, %v9359_v59  ;;  %v4239_v59 = vsel %vm9136_vm4, %v7128_v53, %v4238_v12  ;;  %v2221_v0 = vadd.f32 %v9353_v31, %v7480_v39  ;;  %v7515_v31 = vadd.f32 %v9355_v10, %v9351_v49 }
 0x2ab   : > { %v9369_v1 = vpop.f32.mrf.mxu0  ;;  %4263 = vst [vmem:[#allocation3 + $0x48] sm:$0xf] %v4239_v59 }
 0x2ac   : > { %v2470_v42 = vpop.f32.mrf.mxu1  ;;  %v2430_v14 = vadd.f32 %v7518_v3, %v2221_v0  ;;  %v2425_v37 = vadd.f32 %v7515_v31, %v2216_v34  ;;  %v2903_v0 = vshrl.u32 %v2871_v50, 16 }
 0x2ad   : > { %v7520_v9 = vpop.f32.mrf.mxu0  ;;  %v2471_v18 = vadd.f32 %v2470_v42, %v2422_v7 }
 0x2ae   : > { %v8011_v63 = vpop.f32.mrf.mxu1  ;;  %v7521_v30 = vadd.f32 %v7520_v9, %v9369_v1  ;;  %v2479_v1 = vadd.f32 %v9371_v4, %v2430_v14  ;;  %v7030_v14 = vrot.slane %v2925_v8, 11 }
 0x2b0   : > { %v2473_v38 = vpop.f32.mrf.mxu1  ;;  %v2433_v9 = vadd.f32 %v7521_v30, %v2224_v27  ;;  %v3056_v30 = vshll.u32 %v9404_v11, 16  ;;  %v3080_v27 = vshll.u32 %v9406_v26, 16  ;;  %v8511_v26 = vld [vmem:[#allocation7 + $0x4b0] sm:$0xff]  }
 0x2b2   : > { %v2482_v42 = vadd.f32 %v8011_v63, %v2433_v9 }
 0x2c0   : > { %v7548_v29 = vpop.f32.mrf.mxu0 }
 0x2c2   : > { %v7549_v52 = vpop.f32.mrf.mxu0 }
 0x2c3   : > { %v7550_v19 = vadd.f32 %v7549_v52, %v7548_v29  ;;  %v2474_v52 = vadd.f32 %v2473_v38, %v2425_v37 }
 0x2c4   : > { %v7551_v21 = vpop.f32.mrf.mxu0 }
 0x2c6   : > { %v7552_v56 = vpop.f32.mrf.mxu0 }
 0x2c7   : > { %v7553_v49 = vadd.f32 %v7552_v56, %v7551_v21 }
 0x2c8   : > { %v7554_v16 = vpop.f32.mrf.mxu0 }
 0x2ca   : > { %v8030_v13 = vpop.f32.mrf.mxu1  ;;  %v7555_v20 = vpop.f32.mrf.mxu0 }
 0x2cb   : > { %v7556_v35 = vadd.f32 %v7555_v20, %v7554_v16  ;;  %v7029_v16 = vrot.slane %v2903_v0, 11 }
 0x2cc   : > { %v2801_v28 = vpop.f32.mrf.mxu1  ;;  %v7557_v58 = vpop.f32.mrf.mxu0 }
 0x2cd   : > { %v2802_v33 = vadd.f32 %v7550_v19, %v2801_v28  ;;  %v2810_v36 = vadd.f32 %v8030_v13, %v7556_v35 }
 0x2ce   : > { %v8031_v44 = vpop.f32.mrf.mxu1  ;;  %v7558_v29 = vpop.f32.mrf.mxu0 }
 0x2cf   : > { %v2816_v10 = vadd.f32 %v2802_v33, %v2471_v18  ;;  %v2818_v15 = vadd.f32 %v2810_v36, %v2479_v1  ;;  %v7559_v57 = vadd.f32 %v7558_v29, %v7557_v58 }
 0x2d0   : > { %v2804_v45 = vpop.f32.mrf.mxu1 }
 0x2d1   : > { %v2828_v53 = vmul.f32 %v7022_v32, %v2816_v10  ;;  %v2805_v22 = vadd.f32 %v7553_v49, %v2804_v45  ;;  %v2830_v55 = vmul.f32 %v7022_v32, %v2818_v15  ;;  %v2813_v62 = vadd.f32 %v8031_v44, %v7559_v57 }
 0x2d3   : > { %v2840_v39 = vadd.f32 %v7023_v41, %v2828_v53  ;;  %v2817_v4 = vadd.f32 %v2805_v22, %v2474_v52  ;;  %v2842_v24 = vadd.f32 %v7023_v41, %v2830_v55  ;;  %v2819_v48 = vadd.f32 %v2813_v62, %v2482_v42 }
 0x2d5   : > { %v2844_v60 = vmax.f32 %v2840_v39, 0.0  ;;  %v2829_v12 = vmul.f32 %v7022_v32, %v2817_v4  ;;  %v2846_v2 = vmax.f32 %v2842_v24, 0.0  ;;  %v2831_v21 = vmul.f32 %v7022_v32, %v2819_v48 }
 0x2d7   : > { %v7329_v3 = vpack.c.bf16 %v2844_v60, %v2844_v60  ;;  %v2841_v6 = vadd.f32 %v7023_v41, %v2829_v12  ;;  %v7331_v51 = vpack.c.bf16 %v2846_v2, %v2846_v2  ;;  %v2843_v47 = vadd.f32 %v7023_v41, %v2831_v21 }
 0x2d9   : > { %2864 = vst [vmem:[#allocation2 + $0x14] sm:$0xf] %v7329_v3  ;;  %v2845_v56 = vmax.f32 %v2841_v6, 0.0  ;;  %2866 = vst [vmem:[#allocation2 + $0x24] sm:$0xf] %v7331_v51  ;;  %v2847_v63 = vmax.f32 %v2843_v47, 0.0 }
 0x2db   : > { %v7330_v59 = vpack.c.bf16 %v2845_v56, %v2845_v56  ;;  %v7332_v38 = vpack.c.bf16 %v2847_v63, %v2847_v63 }
 0x2dd   : > { %2865 = vst [vmem:[#allocation2 + $0x18] sm:$0xf] %v7330_v59  ;;  %2867 = vst [vmem:[#allocation2 + $0x28] sm:$0xf] %v7332_v38 }
 0x2e0   : > { %v2872_v13 = vld [vmem:[#allocation2 + $0x14] sm:$0xf]  ;;  %v2875_v19 = vld [vmem:[#allocation2 + $0x24] sm:$0xf] }
 0x2e1   : > { %v2986_v17 = vld [vmem:[#allocation2 + $0x14] sm:$0xf]  ;;  %v2908_v7 = vshrl.u32 %v2872_v13, 16  ;;  %v2988_v20 = vld [vmem:[#allocation2 + $0x24] sm:$0xf]  ;;  %v2911_v35 = vshll.u32 %v2872_v13, 16 }
 0x2e2   : > { %v3003_v31 = vld [vmem:[#allocation2 + $0x14] sm:$0xf]  ;;  %2994 = vst [vmem:[#allocation3 + $0x1c] sm:$0xf] %v2986_v17  ;;  %v2930_v28 = vshrl.u32 %v2875_v19, 16  ;;  %v2933_v34 = vshll.u32 %v2875_v19, 16 }
 0x2e3   : > { %2996 = vst [vmem:[#allocation3 + $0x34] sm:$0xf] %v2988_v20  ;;  %v3037_v18 = vshrl.u32 %v3003_v31, 16  ;;  %v3006_v33 = vld [vmem:[#allocation2 + $0x24] sm:$0xf]  ;;  %v2910_v58 = vrot.slane %v2908_v7, 7 }
 0x2e4   : > { %v3040_v1 = vshll.u32 %v3003_v31, 16  ;;  %v3061_v9 = vshrl.u32 %v3006_v33, 16  ;;  %v3064_v36 = vshll.u32 %v3006_v33, 16  ;;  %v2873_v32 = vld [vmem:[#allocation2 + $0x18] sm:$0xf]  ;;  %v2932_v37 = vrot.slane %v2930_v28, 7 }
 0x2e5   : > { %v2987_v44 = vld [vmem:[#allocation2 + $0x18] sm:$0xf]  ;;  %v3039_v49 = vrot.slane %v3037_v18, 4  ;;  %v2913_v10 = vor.u32 %v2911_v35, %v2910_v58  ;;  %v2915_v29 = vrot.slane %v2910_v58, 4  ;;  %v2917_v15 = vshrl.u32 %v2873_v32, 16 }
 0x2e6   : > { %v2920_v41 = vshll.u32 %v2873_v32, 16  ;;  %2995 = vst [vmem:[#allocation3 + $0x28] sm:$0xf] %v2987_v44  ;;  %v2876_v57 = vld [vmem:[#allocation2 + $0x28] sm:$0xf]  ;;  %v2935_v45 = vor.u32 %v2933_v34, %v2932_v37  ;;  %v2937_v52 = vrot.slane %v2932_v37, 4 }
 0x2e7   : > { %v2939_v53 = vshrl.u32 %v2876_v57, 16  ;;  %v2942_v22 = vshll.u32 %v2876_v57, 16  ;;  %v2989_v42 = vld [vmem:[#allocation2 + $0x28] sm:$0xf]  ;;  %v2914_v55 = vsel %vm9136_vm4, %v7029_v16, %v2913_v10  ;;  %v2919_v62 = vrot.slane %v2917_v15, 7  ;;  %v8504_v34 = vld [vmem:[#allocation7 + $0x4b8] sm:$0xff]  }
 0x2e8   : > { %2997 = vst [vmem:[#allocation3 + $0x40] sm:$0xf] %v2989_v42  ;;  %v3004_v39 = vld [vmem:[#allocation2 + $0x18] sm:$0xf]  ;;  %v3042_v4 = vrot.slane %v3040_v1, 5  ;;  %v2936_v48 = vsel %vm9136_vm4, %v7030_v14, %v2935_v45  ;;  %v3063_v6 = vrot.slane %v3061_v9, 4 }
 0x2e9   : > { %v3007_v24 = vld [vmem:[#allocation2 + $0x28] sm:$0xf]  ;;  %2978 = vst [vmem:[#allocation3 + $0x18] sm:$0xf] %v2914_v55  ;;  %v2941_v60 = vrot.slane %v2939_v53, 7  ;;  %v3046_v12 = vshll.u32 %v3004_v39, 16  ;;  %v2922_v21 = vor.u32 %v2920_v41, %v2919_v62 }
 0x2ea   : > { %v3050_v2 = vshrl.u32 %v3004_v39, 16  ;;  %2980 = vst [vmem:[#allocation3 + $0x30] sm:$0xf] %v2936_v48  ;;  %v3043_v3 = vor.u32 %v3042_v4, %v3039_v49  ;;  %v3066_v51 = vrot.slane %v3064_v36, 5  ;;  %v3070_v56 = vshll.u32 %v3007_v24, 16  ;;  %v8510_v9 = vld [vmem:[#allocation7 + $0x4f0] sm:$0xff]  }
 0x2eb   : > { %v2944_v47 = vor.u32 %v2942_v22, %v2941_v60  ;;  %v3048_v50 = vrot.slane %v3046_v12, 5  ;;  %v2923_v63 = vsel %vm9136_vm4, %v2915_v29, %v2922_v21  ;;  %v3074_v8 = vshrl.u32 %v3007_v24, 16  ;;  %v8513_v36 = vld [vmem:[#allocation7 + $0x4e8] sm:$0xff]   ;;  %v8512_v37 = vld [vmem:[#allocation7 + $0x530] sm:$0xff]   ;;  %v8516_v15 = vld [vmem:[#allocation7 + $0x4e0] sm:$0xff]  }
 0x2ec   : > { %v3052_v40 = vrot.slane %v3050_v2, 4  ;;  %v3044_v59 = vrot.slane %v3043_v3, 4  ;;  %v3067_v0 = vor.u32 %v3066_v51, %v3063_v6  ;;  %2979 = vst [vmem:[#allocation3 + $0x24] sm:$0xf] %v2923_v63  ;;  %v3058_v16 = vrot.slane %v3056_v30, 5  ;;  %v8514_v49 = vld [vmem:[#allocation7 + $0x4a8] sm:$0xff]  }
 0x2ed   : > { %v2945_v38 = vsel %vm9136_vm4, %v2937_v52, %v2944_v47  ;;  %v3072_v14 = vrot.slane %v3070_v56, 5  ;;  %v3076_v31 = vrot.slane %v3074_v8, 4  ;;  %v3082_v35 = vrot.slane %v3080_v27, 5  ;;  %v9426_v18 = vld [vmem:[#allocation3 + $0x1c] ss:$12 sps:$4 sm:$0xff]   ;;  %v8517_v57 = vld [vmem:[#allocation7 + $0x4a0] sm:$0xff]  }
 0x2ee   : > { %v3053_v11 = vor.u32 %v3052_v40, %v3048_v50  ;;  %2981 = vst [vmem:[#allocation3 + $0x3c] sm:$0xf] %v2945_v38  ;;  %v3049_v13 = vsel %vm9146_vm5, %v3044_v59, %v3048_v50  ;;  %v3068_v17 = vrot.slane %v3067_v0, 4  ;;  %3442 = vmatprep.mubr.bf16.mxu0 %v9426_v18  ;;  %v8515_v41 = vld [vmem:[#allocation7 + $0x528] sm:$0xff]   ;;  %v8519_v45 = vld [vmem:[#allocation7 + $0x4d8] sm:$0xff]   ;;  %v8518_v52 = vld [vmem:[#allocation7 + $0x520] sm:$0xff]  }
 0x2ef   : > { %3118 = vst [vmem:[#allocation3 + $0x20] sm:$0xf] %v3049_v13  ;;  %v3077_v20 = vor.u32 %v3076_v31, %v3072_v14  ;;  %v9432_v1 = vld [vmem:[#allocation3 + $0x34] ss:$12 sps:$4 sm:$0xff]   ;;  %v8520_v53 = vld [vmem:[#allocation7 + $0x498] sm:$0xff]   ;;  %v8525_v55 = vld [vmem:[#allocation7 + $0x4c8] sm:$0xff]  }
 0x2f0   : > { %v3054_v7 = vrot.slane %v3053_v11, 4  ;;  %v3073_v19 = vsel %vm9146_vm5, %v3068_v17, %v3072_v14  ;;  %v8522_v22 = vld [vmem:[#allocation7 + $0x4d0] sm:$0xff]   ;;  %v8526_v62 = vld [vmem:[#allocation7 + $0x488] sm:$0xff]   ;;  %v8529_v4 = vld [vmem:[#allocation7 + $0x480] sm:$0xff]  }
 0x2f1   : > { %3120 = vst [vmem:[#allocation3 + $0x38] sm:$0xf] %v3073_v19  ;;  %v3078_v30 = vrot.slane %v3077_v20, 4  ;;  %v3181_v44 = vld [vmem:[#allocation3 + $0x30] sm:$0xff]  ;;  %v8527_v39 = vld [vmem:[#allocation7 + $0x508] sm:$0xff]   ;;  %v3124_v24 = vld [vmem:[#allocation3] sm:$0xff] }
 0x2f2   : > { %v3059_v28 = vsel %vm9146_vm5, %v3054_v7, %v3058_v16  ;;  %v8523_v42 = vld [vmem:[#allocation7 + $0x490] sm:$0xff]   ;;  %v8533_v60 = vld [vmem:[#allocation7 + $0x678] sm:$0xff]   ;;  %v8530_v2 = vld [vmem:[#allocation7 + $0x500] sm:$0xff]  }
 0x2f3   : > { %3119 = vst [vmem:[#allocation3 + $0x2c] sm:$0xf] %v3059_v28  ;;  %v9428_v33 = vld [vmem:[#allocation3 + $0x18] ss:$12 sps:$4 sm:$0xff]   ;;  %v3083_v58 = vsel %vm9146_vm5, %v3078_v30, %v3082_v35  ;;  %v3126_v48 = vld [vmem:[#allocation3 + $0xc] sm:$0xff] }
 0x2f4   : > { %3121 = vst [vmem:[#allocation3 + $0x44] sm:$0xf] %v3083_v58  ;;  %3443 = vmatmul.mubr.bf16.vlgmr.msra.gmra.mxu0 %v9428_v33  ;;  %v7062_v12 = vcombine.low %v3124_v24, %v3126_v48  ;;  %v8535_v21 = vld [vmem:[#allocation7 + $0x638] sm:$0xff]   ;;  %v8538_v3 = vld [vmem:[#allocation7 + $0x670] sm:$0xff]   ;;  %v8541_v47 = vld [vmem:[#allocation7 + $0x668] sm:$0xff]  }
 0x2f5   : > { %7609 = vmatpush3.bf16.msra.mxu0 %v8504_v34  ;;  %3450 = vmatprep.mubr.bf16.mxu0 %v9432_v1  ;;  %v3183_v32 = vld [vmem:[#allocation3 + $0x3c] sm:$0xff]  ;;  %v8539_v51 = vld [vmem:[#allocation7 + $0x630] sm:$0xff]   ;;  %v8542_v56 = vld [vmem:[#allocation7 + $0x628] sm:$0xff]  }
 0x2f6   : > { %7610 = vmatprep.subr.bf16.mxu0 %v8510_v9  ;;  %v9440_v29 = vcombine.low %v3181_v44, %v3183_v32  ;;  %v8536_v6 = vld [vmem:[#allocation7 + $0x6b8] sm:$0xff]   ;;  %v8540_v50 = vld [vmem:[#allocation7 + $0x6b0] sm:$0xff]   ;;  %v8544_v63 = vld [vmem:[#allocation7 + $0x660] sm:$0xff]  }
 0x2f7   : > { %v8543_v59 = vld [vmem:[#allocation7 + $0x6a8] sm:$0xff]   ;;  %v8545_v0 = vld [vmem:[#allocation7 + $0x620] sm:$0xff]   ;;  %v8547_v8 = vld [vmem:[#allocation7 + $0x658] sm:$0xff]  }
 0x2f8   : > { %v8546_v38 = vld [vmem:[#allocation7 + $0x6a0] sm:$0xff]   ;;  %v8548_v11 = vld [vmem:[#allocation7 + $0x618] sm:$0xff]   ;;  %v8550_v16 = vld [vmem:[#allocation7 + $0x650] sm:$0xff]  }
 0x2f9   : > { %7611 = vmatpush3.bf16.msra.mxu0 %v8511_v26  ;;  %v8549_v14 = vld [vmem:[#allocation7 + $0x698] sm:$0xff]   ;;  %v8551_v13 = vld [vmem:[#allocation7 + $0x610] sm:$0xff]   ;;  %v8553_v17 = vld [vmem:[#allocation7 + $0x648] sm:$0xff]  }
 0x2fa   : > { %v9437_v27 = vld [vmem:[#allocation3 + $0x20] ss:$12 sps:$4 sm:$0xff]   ;;  %7612 = vmatprep.subr.bf16.mxu0 %v8513_v36  ;;  %v8552_v31 = vld [vmem:[#allocation7 + $0x690] sm:$0xff]   ;;  %v8563_v58 = vld [vmem:[#allocation7 + $0x7b8] sm:$0xff]  }
 0x2fb   : > { %8048 = vmatprep.mubr.bf16.mxu1 %v9437_v27  ;;  %v8509_v10 = vld [vmem:[#allocation3 + $0x38] ss:$12 sps:$4 sm:$0xff]   ;;  %v8554_v7 = vld [vmem:[#allocation7 + $0x608] sm:$0xff]   ;;  %v8565_v9 = vld [vmem:[#allocation7 + $0x7b0] sm:$0xff]  }
 0x2fc   : > { %8049 = vmatmul.mubr.bf16.vlgmr.msra.gmra.mxu1 %v8509_v10  ;;  %3451 = vmatmul.mubr.bf16.gmra.mxu0 %v9440_v29  ;;  %v8537_v40 = vld [vmem:[#allocation3 + $0x38] ss:$12 sps:$4 sm:$0xff]   ;;  %v8555_v20 = vld [vmem:[#allocation7 + $0x688] sm:$0xff]   ;;  %v8571_v44 = vld [vmem:[#allocation7 + $0x830] sm:$0xff]  }
 0x2fd   : > { %8053 = vmatpush3.bf16.msra.mxu1 %v9312_v25  ;;  %7613 = vmatpush3.bf16.msra.mxu0 %v8514_v49  ;;  %v8521_v25 = vld [vmem:[#allocation7 + $0x518] sm:$0xff]   ;;  %v8556_v19 = vld [vmem:[#allocation7 + $0x640] sm:$0xff]   ;;  %v3770_v30 = vld [vmem:[#allocation3 + $0x48] sm:$0xff] }
 0x2fe   : > { %8054 = vmatprep.subr.bf16.mxu1 %v8512_v37  ;;  %7614 = vmatprep.subr.bf16.mxu0 %v8516_v15  ;;  %v8557_v35 = vld [vmem:[#allocation7 + $0x600] sm:$0xff]   ;;  %v3772_v34 = vld [vmem:[#allocation3 + $0x54] sm:$0xff]  ;;  %v8566_v26 = vld [vmem:[#allocation7 + $0x7e8] sm:$0xff]  }
 0x2ff   : > { %3700 = vmatprep.mubr.bf16.mxu0 %v9331_v46  ;;  %8068 = vmatprep.mubr.bf16.mxu1 %v9343_v43  ;;  %v8524_v46 = vld [vmem:[#allocation7 + $0x510] sm:$0xff]   ;;  %v8528_v43 = vld [vmem:[#allocation7 + $0x4c0] sm:$0xff]   ;;  %v8568_v36 = vld [vmem:[#allocation7 + $0x838] sm:$0xff]  }
 0x300   : > { %v8558_v28 = vld [vmem:[#allocation7 + $0x680] sm:$0xff]   ;;  %v8573_v49 = vld [vmem:[#allocation7 + $0x798] sm:$0xff]   ;;  %v8575_v10 = vld [vmem:[#allocation7 + $0x7d0] sm:$0xff]  }
 0x301   : > { %8055 = vmatpush3.bf16.msra.mxu1 %v8512_v37  ;;  %7615 = vmatpush3.bf16.msra.mxu0 %v8517_v57  ;;  %v8570_v32 = vld [vmem:[#allocation7 + $0x7a0] sm:$0xff]   ;;  %v8574_v37 = vld [vmem:[#allocation7 + $0x828] sm:$0xff]   ;;  %v8576_v15 = vld [vmem:[#allocation7 + $0x790] sm:$0xff]  }
 0x302   : > { %8056 = vmatprep.subr.bf16.mxu1 %v8515_v41  ;;  %7616 = vmatprep.subr.bf16.mxu0 %v8519_v45  ;;  %v8580_v57 = vld [vmem:[#allocation7 + $0x818] sm:$0xff]   ;;  %v8579_v45 = vld [vmem:[#allocation7 + $0x788] sm:$0xff]   ;;  %v5430_v48 = vld [vmem:[#allocation2] sm:$0x8] }
 0x305   : > { %8057 = vmatpush3.bf16.msra.mxu1 %v8515_v41  ;;  %7617 = vmatpush3.bf16.msra.mxu0 %v8520_v53  ;;  %v8578_v41 = vld [vmem:[#allocation7 + $0x7c8] sm:$0xff]   ;;  %v8583_v53 = vld [vmem:[#allocation7 + $0x810] sm:$0xff]  }
 0x306   : > { %8058 = vmatprep.subr.bf16.mxu1 %v8518_v52  ;;  %7618 = vmatprep.subr.bf16.mxu0 %v8522_v22  ;;  %v8582_v22 = vld [vmem:[#allocation7 + $0x780] sm:$0xff]  }
 0x309   : > { %8059 = vmatpush3.bf16.msra.mxu1 %v8518_v52  ;;  %7619 = vmatpush3.bf16.msra.mxu0 %v8523_v42  ;;  %v8581_v52 = vld [vmem:[#allocation7 + $0x7c0] sm:$0xff]   ;;  %v8588_v42 = vld [vmem:[#allocation7 + $0x808] sm:$0xff]  }
 0x30a   : > { %8060 = vmatprep.subr.bf16.mxu1 %v8521_v25  ;;  %7620 = vmatprep.subr.bf16.mxu0 %v8525_v55  ;;  %v8592_v55 = vld [vmem:[#allocation7 + $0x800] sm:$0xff]  }
 0x30d   : > { %8061 = vmatpush3.bf16.msra.mxu1 %v8521_v25  ;;  %7621 = vmatpush3.bf16.msra.mxu0 %v8526_v62  ;;  %v8586_v25 = vld [vmem:[#allocation7 + $0x738] sm:$0xff]  }
 0x30e   : > { %8062 = vmatprep.subr.bf16.mxu1 %v8524_v46  ;;  %7622 = vmatprep.subr.bf16.mxu0 %v8528_v43 }
 0x311   : > { %8063 = vmatpush3.bf16.msra.mxu1 %v8524_v46  ;;  %7623 = vmatpush3.bf16.msra.mxu0 %v8529_v4  ;;  %v9453_v46 = vld [vmem:[#allocation7 + $0x778] sm:$0xff]   ;;  %v9462_v4 = vld [vmem:[#allocation3 + $0x4] ss:$12 sps:$4 sm:$0xff]  }
 0x312   : > { %8064 = vmatprep.subr.bf16.mxu1 %v8527_v39  ;;  %7646 = vmatprep.subr.bf16.mxu0 %v8533_v60  ;;  %v5431_v60 = vld [vmem:[#allocation2 + $0x4] sm:$0xf] }
 0x314   : > { %3701 = vmatmul.mubr.bf16.vlgmr.msra.gmra.mxu0 %v7062_v12  ;;  %v5432_v12 = vld [vmem:[#allocation2 + $0x8] sm:$0xf] }
 0x315   : > { %8065 = vmatpush3.bf16.msra.mxu1 %v8527_v39  ;;  %3708 = vmatprep.mubr.bf16.mxu0 %v9426_v18  ;;  %v7092_v18 = vcombine.low %v3770_v30, %v3772_v34 }
 0x316   : > { %8066 = vmatprep.subr.bf16.mxu1 %v8530_v2  ;;  %7647 = vmatpush3.bf16.msra.mxu0 %v8535_v21  ;;  %v5448_v21 = vshrl.u32 %v5431_v60, 16 }
 0x317   : > { %7648 = vmatprep.subr.bf16.mxu0 %v8538_v3  ;;  %v5451_v3 = vshll.u32 %v5431_v60, 16 }
 0x319   : > { %8067 = vmatpush3.bf16.msra.mxu1 %v8530_v2  ;;  %v5443_v2 = vshrl.u32 %v5430_v48, 16  ;;  %v5441_v48 = vld [vmem:[#allocation2 + $0x38] sm:$0xf] }
 0x31a   : > { %8072 = vmatprep.subr.bf16.mxu1 %v8536_v6  ;;  %7649 = vmatpush3.bf16.msra.mxu0 %v8539_v51  ;;  %v5546_v51 = vld [vmem:[#allocation2 + $0x4] sm:$0xf] }
 0x31b   : > { %7650 = vmatprep.subr.bf16.mxu0 %v8541_v47  ;;  %v5460_v47 = vshll.u32 %v5432_v12, 16  ;;  %5554 = vst [vmem:[#allocation3 + $0x4] sm:$0xf] %v5546_v51  ;;  %v5526_v51 = vshll.u32 %v5441_v48, 16 }
 0x31c   : > { %8069 = vmatmul.mubr.bf16.vlgmr.msra.gmra.mxu1 %v9437_v27  ;;  %3709 = vmatmul.mubr.bf16.gmra.mxu0 %v9428_v33  ;;  %v8562_v33 = vld [vmem:[#allocation7 + $0x7f8] sm:$0xff]   ;;  %v8567_v27 = vld [vmem:[#allocation7 + $0x7a8] sm:$0xff]  }
 0x31d   : > { %8073 = vmatpush3.bf16.msra.mxu1 %v8536_v6  ;;  %8088 = vmatprep.mubr.bf16.mxu1 %v8537_v40  ;;  %v5457_v6 = vshrl.u32 %v5432_v12, 16  ;;  %v7222_v40 = vrot.slane %v5443_v2, 11 }
 0x31e   : > { %8074 = vmatprep.subr.bf16.mxu1 %v8540_v50  ;;  %7651 = vmatpush3.bf16.msra.mxu0 %v8542_v56  ;;  %v5450_v56 = vrot.slane %v5448_v21, 7 }
 0x31f   : > { %4031 = vmatprep.mubr.bf16.mxu0 %v9432_v1  ;;  %7652 = vmatprep.subr.bf16.mxu0 %v8544_v63  ;;  %v8564_v1 = vld [vmem:[#allocation7 + $0x7f0] sm:$0xff]   ;;  %v5459_v63 = vrot.slane %v5457_v6, 7 }
 0x320   : > { %v5552_v6 = vld [vmem:[#allocation2 + $0x34] sm:$0xf] }
 0x321   : > { %8075 = vmatpush3.bf16.msra.mxu1 %v8540_v50  ;;  %v5547_v50 = vld [vmem:[#allocation2 + $0x8] sm:$0xf] }
 0x322   : > { %8076 = vmatprep.subr.bf16.mxu1 %v8543_v59  ;;  %7653 = vmatpush3.bf16.msra.mxu0 %v8545_v0  ;;  %5555 = vst [vmem:[#allocation3 + $0x10] sm:$0xf] %v5547_v50  ;;  %v5453_v0 = vor.u32 %v5451_v3, %v5450_v56  ;;  %v5523_v3 = vshrl.u32 %v5441_v48, 16 }
 0x323   : > { %7654 = vmatprep.subr.bf16.mxu0 %v8547_v8  ;;  %v5455_v8 = vrot.slane %v5450_v56, 4 }
 0x325   : > { %8077 = vmatpush3.bf16.msra.mxu1 %v8543_v59 }
 0x326   : > { %8078 = vmatprep.subr.bf16.mxu1 %v8546_v38  ;;  %7655 = vmatpush3.bf16.msra.mxu0 %v8548_v11  ;;  %v5454_v11 = vsel %vm9136_vm4, %v7222_v40, %v5453_v0  ;;  %v5571_v0 = vld [vmem:[#allocation2 + $0x34] sm:$0xf] }
 0x327   : > { %7656 = vmatprep.subr.bf16.mxu0 %v8550_v16  ;;  %5538 = vst [vmem:[#allocation3] sm:$0xf] %v5454_v11  ;;  %v5573_v11 = vld [vmem:[#allocation2 + $0x3c] sm:$0x1] }
 0x329   : > { %8079 = vmatpush3.bf16.msra.mxu1 %v8546_v38  ;;  %v5462_v38 = vor.u32 %v5460_v47, %v5459_v63  ;;  %v5553_v47 = vld [vmem:[#allocation2 + $0x38] sm:$0xf]  ;;  %v5525_v63 = vrot.slane %v5523_v3, 7 }
 0x32a   : > { %8080 = vmatprep.subr.bf16.mxu1 %v8549_v14  ;;  %7657 = vmatpush3.bf16.msra.mxu0 %v8551_v13  ;;  %v5562_v13 = vld [vmem:[#allocation2 + $0x4] sm:$0xf] }
 0x32b   : > { %7658 = vmatprep.subr.bf16.mxu0 %v8553_v17  ;;  %v5463_v16 = vsel %vm9136_vm4, %v5455_v8, %v5462_v38  ;;  %v5563_v17 = vld [vmem:[#allocation2 + $0x8] sm:$0xf]  ;;  %v5572_v38 = vld [vmem:[#allocation2 + $0x38] sm:$0xf] }
 0x32c   : > { %5539 = vst [vmem:[#allocation3 + $0xc] sm:$0xf] %v5463_v16  ;;  %v5647_v16 = vshrl.u32 %v5571_v0, 16 }
 0x32d   : > { %8081 = vmatpush3.bf16.msra.mxu1 %v8549_v14 }
 0x32e   : > { %8082 = vmatprep.subr.bf16.mxu1 %v8552_v31  ;;  %7659 = vmatpush3.bf16.msra.mxu0 %v8554_v7  ;;  %v5575_v7 = vshrl.u32 %v5562_v13, 16 }
 0x32f   : > { %7660 = vmatprep.subr.bf16.mxu0 %v8556_v19  ;;  %v5578_v19 = vshll.u32 %v5562_v13, 16  ;;  %v5650_v13 = vshll.u32 %v5571_v0, 16 }
 0x330   : > { %v5577_v34 = vrot.slane %v5575_v7, 4 }
 0x331   : > { %8083 = vmatpush3.bf16.msra.mxu1 %v8552_v31  ;;  %v5564_v31 = vld [vmem:[#allocation2 + $0xc] sm:$0x1] }
 0x332   : > { %8084 = vmatprep.subr.bf16.mxu1 %v8555_v20  ;;  %7661 = vmatpush3.bf16.msra.mxu0 %v8557_v35  ;;  %v5588_v35 = vshrl.u32 %v5563_v17, 16  ;;  %v5594_v30 = vshll.u32 %v5564_v31, 16 }
 0x333   : > { %7684 = vmatprep.subr.bf16.mxu0 %v8562_v33 }
 0x335   : > { %8085 = vmatpush3.bf16.msra.mxu1 %v8555_v20  ;;  %4032 = vmatmul.mubr.bf16.vlgmr.msra.gmra.mxu0 %v9440_v29  ;;  %v8577_v29 = vld [vmem:[#allocation7 + $0x820] sm:$0xff]   ;;  %v5584_v20 = vshll.u32 %v5563_v17, 16 }
 0x336   : > { %8086 = vmatprep.subr.bf16.mxu1 %v8558_v28  ;;  %4039 = vmatprep.mubr.bf16.mxu0 %v9373_v54  ;;  %v8569_v54 = vld [vmem:[#allocation7 + $0x7e0] sm:$0xff]  }
 0x337   : > { %7685 = vmatpush3.bf16.msra.mxu0 %v8563_v58  ;;  %v5586_v33 = vrot.slane %v5584_v20, 5  ;;  %v5590_v58 = vrot.slane %v5588_v35, 4  ;;  %v5656_v20 = vshll.u32 %v5572_v38, 16  ;;  %v5649_v35 = vrot.slane %v5647_v16, 4 }
 0x338   : > { %7686 = vmatprep.subr.bf16.mxu0 %v8564_v1 }
 0x339   : > { %8087 = vmatpush3.bf16.msra.mxu1 %v8558_v28 }
 0x33a   : > { %8092 = vmatprep.subr.bf16.mxu1 %v8568_v36 }
 0x33b   : > { %7687 = vmatpush3.bf16.msra.mxu0 %v8565_v9  ;;  %v5591_v9 = vor.u32 %v5590_v58, %v5586_v33 }
 0x33c   : > { %8089 = vmatmul.mubr.bf16.vlgmr.msra.gmra.mxu1 %v9378_v5  ;;  %7688 = vmatprep.subr.bf16.mxu0 %v8566_v26  ;;  %v8572_v5 = vld [vmem:[#allocation7 + $0x7d8] sm:$0xff]   ;;  %v5596_v26 = vrot.slane %v5594_v30, 5  ;;  %v5652_v30 = vrot.slane %v5650_v13, 5 }
 0x33d   : > { %4040 = vmatmul.mubr.bf16.gmra.mxu0 %v7092_v18  ;;  %8093 = vmatpush3.bf16.msra.mxu1 %v8568_v36  ;;  %v5580_v18 = vrot.slane %v5578_v19, 5  ;;  %v5528_v19 = vor.u32 %v5526_v51, %v5525_v63  ;;  %v9504_v51 = vld [vmem:[#allocation3 + $0x50] ss:$12 sps:$4 sm:$0xff]  }
 0x33e   : > { %8094 = vmatprep.subr.bf16.mxu1 %v8571_v44 }
 0x33f   : > { %7689 = vmatpush3.bf16.msra.mxu0 %v8567_v27  ;;  %v5581_v1 = vor.u32 %v5580_v18, %v5577_v34  ;;  %v5660_v34 = vshrl.u32 %v5572_v38, 16  ;;  %v5666_v18 = vshll.u32 %v5573_v11, 16 }
 0x340   : > { %7690 = vmatprep.subr.bf16.mxu0 %v8569_v54  ;;  %v5592_v54 = vrot.slane %v5591_v9, 4 }
 0x341   : > { %8095 = vmatpush3.bf16.msra.mxu1 %v8571_v44  ;;  %v5582_v36 = vrot.slane %v5581_v1, 4  ;;  %v9478_v44 = vld [vmem:[#allocation3 + $0x8] ss:$12 sps:$4 sm:$0xff]  }
 0x342   : > { %8096 = vmatprep.subr.bf16.mxu1 %v8574_v37 }
 0x343   : > { %7691 = vmatpush3.bf16.msra.mxu0 %v8570_v32 }
 0x344   : > { %7692 = vmatprep.subr.bf16.mxu0 %v8572_v5  ;;  %v5587_v5 = vsel %vm9146_vm5, %v5582_v36, %v5586_v33  ;;  %v5662_v36 = vrot.slane %v5660_v34, 4 }
 0x345   : > { %8097 = vmatpush3.bf16.msra.mxu1 %v8574_v37  ;;  %v5597_v37 = vsel %vm9146_vm5, %v5592_v54, %v5596_v26  ;;  %5678 = vst [vmem:[#allocation3 + $0x8] sm:$0xf] %v5587_v5  ;;  %v5653_v26 = vor.u32 %v5652_v30, %v5649_v35 }
 0x346   : > { %8098 = vmatprep.subr.bf16.mxu1 %v8577_v29  ;;  %5679 = vst [vmem:[#allocation3 + $0x14] sm:$0xf] %v5597_v37 }
 0x347   : > { %7693 = vmatpush3.bf16.msra.mxu0 %v8573_v49 }
 0x348   : > { %7694 = vmatprep.subr.bf16.mxu0 %v8575_v10 }
 0x349   : > { %8099 = vmatpush3.bf16.msra.mxu1 %v8577_v29 }
 0x34a   : > { %8100 = vmatprep.subr.bf16.mxu1 %v8580_v57 }
 0x34b   : > { %7695 = vmatpush3.bf16.msra.mxu0 %v8576_v15 }
 0x34c   : > { %7696 = vmatprep.subr.bf16.mxu0 %v8578_v41 }
 0x34d   : > { %8101 = vmatpush3.bf16.msra.mxu1 %v8580_v57 }
 0x34e   : > { %8102 = vmatprep.subr.bf16.mxu1 %v8583_v53 }
 0x34f   : > { %7697 = vmatpush3.bf16.msra.mxu0 %v8579_v45 }
 0x350   : > { %7698 = vmatprep.subr.bf16.mxu0 %v8581_v52 }
 0x351   : > { %8103 = vmatpush3.bf16.msra.mxu1 %v8583_v53 }
 0x352   : > { %8104 = vmatprep.subr.bf16.mxu1 %v8588_v42 }
 0x353   : > { %7699 = vmatpush3.bf16.msra.mxu0 %v8582_v22 }
 0x354   : > { %7722 = vmatprep.subr.bf16.mxu0 %v8586_v25  ;;  %v9490_v25 = vld [vmem:[#allocation3 + $0x4c] ss:$12 sps:$4 sm:$0xff]  }
 0x355   : > { %8105 = vmatpush3.bf16.msra.mxu1 %v8588_v42  ;;  %v5439_v42 = vld [vmem:[#allocation2 + $0x30] sm:$0x8]  ;;  %5560 = vst [vmem:[#allocation3 + $0x4c] sm:$0xf] %v5552_v6  ;;  %5561 = vst [vmem:[#allocation3 + $0x58] sm:$0xf] %v5553_v47 }
 0x356   : > { %8106 = vmatprep.subr.bf16.mxu1 %v8592_v55  ;;  %v5509_v12 = vshrl.u32 %v5439_v42, 16 }
 0x358   : > { %v7225_v40 = vrot.slane %v5509_v12, 11 }
 0x359   : > { %8107 = vmatpush3.bf16.msra.mxu1 %v8592_v55  ;;  %v5440_v55 = vld [vmem:[#allocation2 + $0x34] sm:$0xf] }
 0x35a   : > { %8112 = vmatprep.subr.bf16.mxu1 %v9453_v46  ;;  %v5514_v2 = vshrl.u32 %v5440_v55, 16  ;;  %v5517_v21 = vshll.u32 %v5440_v55, 16  ;;  %v5668_v55 = vrot.slane %v5666_v18, 5 }
 0x35c   : > { %v5516_v56 = vrot.slane %v5514_v2, 7 }
 0x35e   : > { %v5519_v31 = vor.u32 %v5517_v21, %v5516_v56  ;;  %v5521_v7 = vrot.slane %v5516_v56, 4 }
 0x360   : > { %v5520_v9 = vsel %vm9136_vm4, %v7225_v40, %v5519_v31 }
 0x361   : > { %5544 = vst [vmem:[#allocation3 + $0x48] sm:$0xf] %v5520_v9 }
 0x3b4   : > { %v9456_v62 = vpop.f32.mrf.mxu0 }
 0x3b6   : > { %v9458_v43 = vpop.f32.mrf.mxu0 }
 0x3b7   : > { %v7588_v8 = vadd.f32 %v9458_v43, %v9456_v62  ;;  %v5529_v62 = vsel %vm9136_vm4, %v5521_v7, %v5528_v19  ;;  %v5658_v43 = vrot.slane %v5656_v20, 5  ;;  %v7120_v7 = vld [vmem:[#allocation10 + $0x2] ss:$0 sm:$0xff] }
 0x3b8   : > { %v9460_v39 = vpop.f32.mrf.mxu0  ;;  %5545 = vst [vmem:[#allocation3 + $0x54] sm:$0xf] %v5529_v62 }
 0x3b9   : > { %v5663_v42 = vor.u32 %v5662_v36, %v5658_v43 }
 0x3ba   : > { %v9464_v24 = vpop.f32.mrf.mxu0 }
 0x3bb   : > { %v7591_v5 = vadd.f32 %v9464_v24, %v9460_v39  ;;  %v5664_v47 = vrot.slane %v5663_v42, 4 }
 0x3bc   : > { %v9466_v59 = vpop.f32.mrf.mxu0  ;;  %v9484_v10 = vpop.f32.mrf.mxu1 }
 0x3be   : > { %v9472_v14 = vpop.f32.mrf.mxu0  ;;  %v3493_v15 = vpop.f32.mrf.mxu1 }
 0x3bf   : > { %v3494_v54 = vadd.f32 %v7588_v8, %v3493_v15 }
 0x3c0   : > { %v9474_v28 = vpop.f32.mrf.mxu0  ;;  %v9486_v57 = vpop.f32.mrf.mxu1 }
 0x3c2   : > { %v9476_v27 = vpop.f32.mrf.mxu0  ;;  %v3496_v52 = vpop.f32.mrf.mxu1 }
 0x3c3   : > { %v3497_v39 = vadd.f32 %v7591_v5, %v3496_v52  ;;  %v7597_v24 = vadd.f32 %v9476_v27, %v9474_v28  ;;  %v7119_v27 = vld [vmem:[#allocation9 + $0x2] ss:$0 sm:$0xff] }
 0x3c5   : > { %v3505_v28 = vadd.f32 %v9486_v57, %v7597_v24 }
 0x3d4   : > { %v7624_v32 = vpop.f32.mrf.mxu0 }
 0x3d6   : > { %v7625_v49 = vpop.f32.mrf.mxu0 }
 0x3d7   : > { %v7626_v33 = vadd.f32 %v7625_v49, %v7624_v32  ;;  %v7594_v32 = vadd.f32 %v9472_v14, %v9466_v59  ;;  %v5654_v49 = vrot.slane %v5653_v26, 4 }
 0x3d8   : > { %v7627_v29 = vpop.f32.mrf.mxu0 }
 0x3d9   : > { %v3703_v48 = vadd.f32 %v7626_v33, %v3494_v54  ;;  %v5659_v15 = vsel %vm9146_vm5, %v5654_v49, %v5658_v43  ;;  %v3502_v40 = vadd.f32 %v9484_v10, %v7594_v32 }
 0x3da   : > { %v7628_v41 = vpop.f32.mrf.mxu0  ;;  %5684 = vst [vmem:[#allocation3 + $0x50] sm:$0xf] %v5659_v15 }
 0x3db   : > { %v7629_v12 = vadd.f32 %v7628_v41, %v7627_v29  ;;  %v5669_v29 = vsel %vm9146_vm5, %v5664_v47, %v5668_v55 }
 0x3dc   : > { %v7630_v45 = vpop.f32.mrf.mxu0  ;;  %v9488_v22 = vpop.f32.mrf.mxu1  ;;  %5685 = vst [vmem:[#allocation3 + $0x5c] sm:$0xf] %v5669_v29 }
 0x3dd   : > { %v3706_v41 = vadd.f32 %v7629_v12, %v3497_v39  ;;  %v4152_v12 = vld [vmem:[#allocation2 + $0x10] sm:$0x8] }
 0x3de   : > { %v7631_v53 = vpop.f32.mrf.mxu0  ;;  %v3751_v50 = vpop.f32.mrf.mxu1 }
 0x3df   : > { %v7632_v3 = vadd.f32 %v7631_v53, %v7630_v45  ;;  %v3752_v63 = vadd.f32 %v3751_v50, %v3703_v48 }
 0x3e0   : > { %v9492_v60 = vpop.f32.mrf.mxu0  ;;  %v8071_v58 = vpop.f32.mrf.mxu1 }
 0x3e1   : > { %v3711_v0 = vadd.f32 %v7632_v3, %v3502_v40 }
 0x3e2   : > { %v7634_v17 = vpop.f32.mrf.mxu0  ;;  %v3754_v2 = vpop.f32.mrf.mxu1 }
 0x3e3   : > { %v7635_v45 = vadd.f32 %v7634_v17, %v9492_v60  ;;  %v3755_v13 = vadd.f32 %v3754_v2, %v3706_v41  ;;  %v3760_v60 = vadd.f32 %v9488_v22, %v3711_v0  ;;  %v4286_v2 = vld [vmem:[#allocation2 + $0x1c] sm:$0x1] }
 0x3e4   : > { %v4337_v3 = vshll.u32 %v4286_v2, 16 }
 0x3e5   : > { %v3714_v31 = vadd.f32 %v7635_v45, %v3505_v28 }
 0x3e6   : > { %v4339_v45 = vrot.slane %v4337_v3, 5 }
 0x3f5   : > { %v7662_v1 = vpop.f32.mrf.mxu0 }
 0x3f7   : > { %v7663_v37 = vpop.f32.mrf.mxu0 }
 0x3f8   : > { %v7664_v6 = vadd.f32 %v7663_v37, %v7662_v1  ;;  %v3763_v1 = vadd.f32 %v8071_v58, %v3714_v31 }
 0x3f9   : > { %v7665_v21 = vpop.f32.mrf.mxu0 }
 0x3fb   : > { %v7666_v14 = vpop.f32.mrf.mxu0 }
 0x3fc   : > { %v8090_v59 = vpop.f32.mrf.mxu1  ;;  %v7667_v8 = vadd.f32 %v7666_v14, %v7665_v21  ;;  %v4184_v21 = vshrl.u32 %v4152_v12, 16 }
 0x3fd   : > { %v7668_v56 = vpop.f32.mrf.mxu0 }
 0x3fe   : > { %v4082_v53 = vpop.f32.mrf.mxu1  ;;  %v7126_v41 = vrot.slane %v4184_v21, 11 }
 0x3ff   : > { %v4083_v52 = vadd.f32 %v7664_v6, %v4082_v53  ;;  %v7669_v11 = vpop.f32.mrf.mxu0  ;;  %v4155_v6 = vld [vmem:[#allocation2 + $0x20] sm:$0x8]  ;;  %v9516_v53 = vld [vmem:[#allocation2 + $0x2c] sm:$0x1] }
 0x400   : > { %v8091_v38 = vpop.f32.mrf.mxu1  ;;  %v7670_v10 = vadd.f32 %v7669_v11, %v7668_v56  ;;  %v4206_v29 = vshrl.u32 %v4155_v6, 16 }
 0x401   : > { %v4097_v16 = vadd.f32 %v4083_v52, %v3752_v63  ;;  %v7671_v20 = vpop.f32.mrf.mxu0 }
 0x402   : > { %v4085_v19 = vpop.f32.mrf.mxu1  ;;  %v4091_v50 = vadd.f32 %v8090_v59, %v7670_v10  ;;  %v7127_v10 = vrot.slane %v4206_v29, 11 }
 0x403   : > { %v4109_v17 = vmul.f32 %v7119_v27, %v4097_v16  ;;  %v4086_v35 = vadd.f32 %v7667_v8, %v4085_v19  ;;  %v7672_v30 = vpop.f32.mrf.mxu0 }
 0x404   : > { %v4099_v33 = vadd.f32 %v4091_v50, %v3760_v60  ;;  %v7673_v57 = vadd.f32 %v7672_v30, %v7671_v20 }
 0x405   : > { %v4121_v34 = vadd.f32 %v7120_v7, %v4109_v17  ;;  %v4098_v18 = vadd.f32 %v4086_v35, %v3755_v13  ;;  %v4361_v13 = vshll.u32 %v9516_v53, 16 }
 0x406   : > { %v4111_v43 = vmul.f32 %v7119_v27, %v4099_v33  ;;  %v4094_v26 = vadd.f32 %v8091_v38, %v7673_v57 }
 0x407   : > { %v4125_v9 = vmax.f32 %v4121_v34, 0.0  ;;  %v4110_v62 = vmul.f32 %v7119_v27, %v4098_v18 }
 0x408   : > { %v4123_v5 = vadd.f32 %v7120_v7, %v4111_v43  ;;  %v4100_v37 = vadd.f32 %v4094_v26, %v3763_v1 }
 0x409   : > { %v7333_v36 = vpack.c.bf16 %v4125_v9, %v4125_v9  ;;  %v4122_v54 = vadd.f32 %v7120_v7, %v4110_v62 }
 0x40a   : > { %v4127_v22 = vmax.f32 %v4123_v5, 0.0  ;;  %v4112_v49 = vmul.f32 %v7119_v27, %v4100_v37 }
 0x40b   : > { %4145 = vst [vmem:[#allocation2 + $0x14] sm:$0xf] %v7333_v36  ;;  %v4126_v32 = vmax.f32 %v4122_v54, 0.0 }
 0x40c   : > { %v7335_v55 = vpack.c.bf16 %v4127_v22, %v4127_v22  ;;  %v4124_v48 = vadd.f32 %v7120_v7, %v4112_v49 }
 0x40d   : > { %v7334_v42 = vpack.c.bf16 %v4126_v32, %v4126_v32 }
 0x40e   : > { %4147 = vst [vmem:[#allocation2 + $0x24] sm:$0xf] %v7335_v55  ;;  %v4128_v58 = vmax.f32 %v4124_v48, 0.0 }
 0x40f   : > { %4146 = vst [vmem:[#allocation2 + $0x18] sm:$0xf] %v7334_v42 }
 0x410   : > { %v7336_v15 = vpack.c.bf16 %v4128_v58, %v4128_v58 }
 0x412   : > { %v4153_v47 = vld [vmem:[#allocation2 + $0x14] sm:$0xf]  ;;  %4148 = vst [vmem:[#allocation2 + $0x28] sm:$0xf] %v7336_v15 }
 0x413   : > { %v4267_v39 = vld [vmem:[#allocation2 + $0x14] sm:$0xf]  ;;  %v4189_v59 = vshrl.u32 %v4153_v47, 16  ;;  %v4192_v63 = vshll.u32 %v4153_v47, 16 }
 0x414   : > { %v4284_v24 = vld [vmem:[#allocation2 + $0x14] sm:$0xf]  ;;  %4275 = vst [vmem:[#allocation3 + $0x1c] sm:$0xf] %v4267_v39 }
 0x415   : > { %v4318_v14 = vshrl.u32 %v4284_v24, 16  ;;  %v4321_v40 = vshll.u32 %v4284_v24, 16  ;;  %v4191_v56 = vrot.slane %v4189_v59, 7  ;;  %v4156_v16 = vld [vmem:[#allocation2 + $0x24] sm:$0xf] }
 0x416   : > { %v4154_v8 = vld [vmem:[#allocation2 + $0x18] sm:$0xf]  ;;  %v4211_v20 = vshrl.u32 %v4156_v16, 16  ;;  %v4269_v60 = vld [vmem:[#allocation2 + $0x24] sm:$0xf]  ;;  %v4214_v30 = vshll.u32 %v4156_v16, 16 }
 0x417   : > { %v4320_v0 = vrot.slane %v4318_v14, 4  ;;  %v4323_v52 = vrot.slane %v4321_v40, 5  ;;  %v4268_v28 = vld [vmem:[#allocation2 + $0x18] sm:$0xf]  ;;  %v4194_v38 = vor.u32 %v4192_v63, %v4191_v56  ;;  %v4198_v11 = vshrl.u32 %v4154_v8, 16  ;;  %v8596_v16 = vld [vmem:[#allocation7 + $0x728] sm:$0xff]  }
 0x418   : > { %v4285_v27 = vld [vmem:[#allocation2 + $0x18] sm:$0xf]  ;;  %4276 = vst [vmem:[#allocation3 + $0x28] sm:$0xf] %v4268_v28  ;;  %v4201_v50 = vshll.u32 %v4154_v8, 16  ;;  %v4213_v9 = vrot.slane %v4211_v20, 7 }
 0x419   : > { %v4324_v31 = vor.u32 %v4323_v52, %v4320_v0  ;;  %v4327_v7 = vshll.u32 %v4285_v27, 16  ;;  %v4331_v19 = vshrl.u32 %v4285_v27, 16  ;;  %v4195_v17 = vsel %vm9136_vm4, %v7126_v41, %v4194_v38  ;;  %4277 = vst [vmem:[#allocation3 + $0x34] sm:$0xf] %v4269_v60  ;;  %v4287_v34 = vld [vmem:[#allocation2 + $0x24] sm:$0xf] }
 0x41a   : > { %v4200_v35 = vrot.slane %v4198_v11, 7  ;;  %4259 = vst [vmem:[#allocation3 + $0x18] sm:$0xf] %v4195_v17  ;;  %v4157_v1 = vld [vmem:[#allocation2 + $0x28] sm:$0xf]  ;;  %v4196_v62 = vrot.slane %v4191_v56, 4  ;;  %v4216_v32 = vor.u32 %v4214_v30, %v4213_v9 }
 0x41b   : > { %v4325_v18 = vrot.slane %v4324_v31, 4  ;;  %v4329_v33 = vrot.slane %v4327_v7, 5  ;;  %v4333_v57 = vrot.slane %v4331_v19, 4  ;;  %v4220_v26 = vshrl.u32 %v4157_v1, 16  ;;  %v4270_v36 = vld [vmem:[#allocation2 + $0x28] sm:$0xf] }
 0x41c   : > { %v4203_v43 = vor.u32 %v4201_v50, %v4200_v35  ;;  %v4288_v54 = vld [vmem:[#allocation2 + $0x28] sm:$0xf]  ;;  %v4223_v22 = vshll.u32 %v4157_v1, 16  ;;  %4278 = vst [vmem:[#allocation3 + $0x40] sm:$0xf] %v4270_v36  ;;  %v4342_v55 = vshrl.u32 %v4287_v34, 16  ;;  %v4217_v2 = vsel %vm9136_vm4, %v7127_v10, %v4216_v32 }
 0x41d   : > { %v4330_v5 = vsel %vm9146_vm5, %v4325_v18, %v4329_v33  ;;  %v4334_v37 = vor.u32 %v4333_v57, %v4329_v33  ;;  %v4222_v42 = vrot.slane %v4220_v26, 7  ;;  %v4345_v48 = vshll.u32 %v4287_v34, 16  ;;  %4261 = vst [vmem:[#allocation3 + $0x30] sm:$0xf] %v4217_v2  ;;  %v8589_v56 = vld [vmem:[#allocation7 + $0x6f8] sm:$0xff]   ;;  %v8591_v8 = vld [vmem:[#allocation7 + $0x730] sm:$0xff]  }
 0x41e   : > { %v4204_v49 = vsel %vm9136_vm4, %v4196_v62, %v4203_v43  ;;  %4399 = vst [vmem:[#allocation3 + $0x20] sm:$0xf] %v4330_v5  ;;  %v4351_v58 = vshll.u32 %v4288_v54, 16  ;;  %v4355_v21 = vshrl.u32 %v4288_v54, 16  ;;  %v4218_v3 = vrot.slane %v4213_v9, 4  ;;  %v8593_v38 = vld [vmem:[#allocation7 + $0x6f0] sm:$0xff]  }
 0x41f   : > { %4260 = vst [vmem:[#allocation3 + $0x24] sm:$0xf] %v4204_v49  ;;  %v4335_v12 = vrot.slane %v4334_v37, 4  ;;  %v4225_v6 = vor.u32 %v4223_v22, %v4222_v42  ;;  %v4344_v15 = vrot.slane %v4342_v55, 4  ;;  %v4347_v47 = vrot.slane %v4345_v48, 5  ;;  %v8601_v31 = vld [vmem:[#allocation7 + $0x720] sm:$0xff]  }
 0x420   : > { %v4353_v24 = vrot.slane %v4351_v58, 5  ;;  %v4357_v59 = vrot.slane %v4355_v21, 4  ;;  %v4363_v41 = vrot.slane %v4361_v13, 5  ;;  %v9531_v0 = vld [vmem:[#allocation3 + $0x1c] ss:$12 sps:$4 sm:$0xff]   ;;  %v8603_v7 = vld [vmem:[#allocation7 + $0x770] sm:$0xff]  }
 0x421   : > { %v4340_v39 = vsel %vm9146_vm5, %v4335_v12, %v4339_v45  ;;  %v4226_v14 = vsel %vm9136_vm4, %v4218_v3, %v4225_v6  ;;  %v4348_v40 = vor.u32 %v4347_v47, %v4344_v15  ;;  %4723 = vmatprep.mubr.bf16.mxu0 %v9531_v0  ;;  %v8598_v13 = vld [vmem:[#allocation7 + $0x6e8] sm:$0xff]   ;;  %v8602_v20 = vld [vmem:[#allocation7 + $0x6e0] sm:$0xff]   ;;  %v8604_v60 = vld [vmem:[#allocation7 + $0x718] sm:$0xff]  }
 0x422   : > { %4400 = vst [vmem:[#allocation3 + $0x2c] sm:$0xf] %v4340_v39  ;;  %4262 = vst [vmem:[#allocation3 + $0x3c] sm:$0xf] %v4226_v14  ;;  %v4358_v29 = vor.u32 %v4357_v59, %v4353_v24  ;;  %v8606_v17 = vld [vmem:[#allocation7 + $0x768] sm:$0xff]   ;;  %v8605_v35 = vld [vmem:[#allocation7 + $0x6d8] sm:$0xff]  }
 0x423   : > { %v4349_v53 = vrot.slane %v4348_v40, 4  ;;  %v9543_v11 = vld [vmem:[#allocation3 + $0x34] ss:$12 sps:$4 sm:$0xff]   ;;  %v8612_v18 = vld [vmem:[#allocation7 + $0x758] sm:$0xff]   ;;  %v8611_v33 = vld [vmem:[#allocation7 + $0x6c8] sm:$0xff]  }
 0x424   : > { %v4359_v63 = vrot.slane %v4358_v29, 4  ;;  %v8607_v50 = vld [vmem:[#allocation7 + $0x710] sm:$0xff]   ;;  %v8609_v30 = vld [vmem:[#allocation7 + $0x760] sm:$0xff]   ;;  %v8618_v62 = vld [vmem:[#allocation7 + $0x8b8] sm:$0xff]  }
 0x425   : > { %v4354_v45 = vsel %vm9146_vm5, %v4349_v53, %v4353_v24  ;;  %v8608_v34 = vld [vmem:[#allocation7 + $0x6d0] sm:$0xff]   ;;  %v8614_v57 = vld [vmem:[#allocation7 + $0x6c0] sm:$0xff]   ;;  %v8619_v43 = vld [vmem:[#allocation7 + $0x748] sm:$0xff]  }
 0x426   : > { %v9533_v52 = vld [vmem:[#allocation3 + $0x18] ss:$12 sps:$4 sm:$0xff]   ;;  %v4364_v28 = vsel %vm9146_vm5, %v4359_v63, %v4363_v41  ;;  %4401 = vst [vmem:[#allocation3 + $0x38] sm:$0xf] %v4354_v45  ;;  %v4407_v9 = vld [vmem:[#allocation3 + $0xc] sm:$0xff] }
 0x427   : > { %4402 = vst [vmem:[#allocation3 + $0x44] sm:$0xf] %v4364_v28  ;;  %4724 = vmatmul.mubr.bf16.vlgmr.msra.gmra.mxu0 %v9533_v52  ;;  %v4405_v1 = vld [vmem:[#allocation3] sm:$0xff]  ;;  %v8620_v36 = vld [vmem:[#allocation7 + $0x878] sm:$0xff]   ;;  %v8621_v54 = vld [vmem:[#allocation7 + $0x8b0] sm:$0xff]  }
 0x428   : > { %7723 = vmatpush3.bf16.msra.mxu0 %v8589_v56  ;;  %4731 = vmatprep.mubr.bf16.mxu0 %v9543_v11  ;;  %v7159_v26 = vcombine.low %v4405_v1, %v4407_v9  ;;  %v8622_v5 = vld [vmem:[#allocation7 + $0x740] sm:$0xff]   ;;  %v8623_v37 = vld [vmem:[#allocation7 + $0x870] sm:$0xff]   ;;  %v8625_v32 = vld [vmem:[#allocation7 + $0x8a8] sm:$0xff]  }
 0x429   : > { %v9541_v27 = vld [vmem:[#allocation3 + $0x20] ss:$12 sps:$4 sm:$0xff]   ;;  %7724 = vmatprep.subr.bf16.mxu0 %v8591_v8  ;;  %v9547_v10 = vld [vmem:[#allocation3 + $0x30] ss:$12 sps:$4 sm:$0xff]   ;;  %v5053_v56 = vld [vmem:[#allocation3 + $0x54] sm:$0xff] }
 0x42a   : > { %8108 = vmatprep.mubr.bf16.mxu1 %v9541_v27  ;;  %v8627_v22 = vld [vmem:[#allocation7 + $0x8f8] sm:$0xff]   ;;  %v8626_v49 = vld [vmem:[#allocation7 + $0x868] sm:$0xff]   ;;  %v8629_v42 = vld [vmem:[#allocation7 + $0x8a0] sm:$0xff]  }
 0x42b   : > { %v8631_v55 = vld [vmem:[#allocation7 + $0x8f0] sm:$0xff]   ;;  %v8630_v12 = vld [vmem:[#allocation7 + $0x860] sm:$0xff]   ;;  %v8632_v2 = vld [vmem:[#allocation7 + $0x898] sm:$0xff]  }
 0x42c   : > { %7725 = vmatpush3.bf16.msra.mxu0 %v8593_v38  ;;  %v8634_v58 = vld [vmem:[#allocation7 + $0x8e8] sm:$0xff]   ;;  %v8633_v21 = vld [vmem:[#allocation7 + $0x858] sm:$0xff]   ;;  %v8635_v3 = vld [vmem:[#allocation7 + $0x890] sm:$0xff]  }
 0x42d   : > { %7726 = vmatprep.subr.bf16.mxu0 %v8596_v16  ;;  %v8637_v6 = vld [vmem:[#allocation7 + $0x8e0] sm:$0xff]   ;;  %v8636_v15 = vld [vmem:[#allocation7 + $0x850] sm:$0xff]   ;;  %v8638_v47 = vld [vmem:[#allocation7 + $0x888] sm:$0xff]  }
 0x42e   : > { %v8600_v19 = vld [vmem:[#allocation3 + $0x38] ss:$12 sps:$4 sm:$0xff]   ;;  %v8639_v24 = vld [vmem:[#allocation7 + $0x848] sm:$0xff]   ;;  %v8643_v14 = vld [vmem:[#allocation7 + $0x8d0] sm:$0xff]  }
 0x42f   : > { %4732 = vmatmul.mubr.bf16.gmra.mxu0 %v9547_v10  ;;  %8109 = vmatmul.mubr.bf16.vlgmr.msra.gmra.mxu1 %v8600_v19  ;;  %v8628_v48 = vld [vmem:[#allocation3 + $0x38] ss:$12 sps:$4 sm:$0xff]   ;;  %v8644_v29 = vld [vmem:[#allocation7 + $0x8c8] sm:$0xff]   ;;  %v8652_v8 = vld [vmem:[#allocation7 + $0xa30] sm:$0xff]  }
 0x430   : > { %7727 = vmatpush3.bf16.msra.mxu0 %v8598_v13  ;;  %8113 = vmatpush3.bf16.msra.mxu1 %v9453_v46  ;;  %v8610_v46 = vld [vmem:[#allocation7 + $0x708] sm:$0xff]   ;;  %v8640_v39 = vld [vmem:[#allocation7 + $0x8d8] sm:$0xff]   ;;  %v8641_v59 = vld [vmem:[#allocation7 + $0x880] sm:$0xff]  }
 0x431   : > { %7728 = vmatprep.subr.bf16.mxu0 %v8601_v31  ;;  %8114 = vmatprep.subr.bf16.mxu1 %v8603_v7  ;;  %v8642_v40 = vld [vmem:[#allocation7 + $0x840] sm:$0xff]   ;;  %v5051_v53 = vld [vmem:[#allocation3 + $0x48] sm:$0xff]  ;;  %v8651_v45 = vld [vmem:[#allocation7 + $0xa78] sm:$0xff]  }
 0x432   : > { %4981 = vmatprep.mubr.bf16.mxu0 %v9462_v4  ;;  %8128 = vmatprep.mubr.bf16.mxu1 %v9478_v44  ;;  %v8613_v4 = vld [vmem:[#allocation7 + $0x700] sm:$0xff]   ;;  %v8615_v44 = vld [vmem:[#allocation7 + $0x750] sm:$0xff]   ;;  %v7189_v63 = vcombine.low %v5051_v53, %v5053_v56  ;;  %v8656_v38 = vld [vmem:[#allocation7 + $0x9e8] sm:$0xff]  }
 0x433   : > { %v8645_v41 = vld [vmem:[#allocation7 + $0x8c0] sm:$0xff]   ;;  %v8653_v28 = vld [vmem:[#allocation7 + $0x9f0] sm:$0xff]   ;;  %v8661_v13 = vld [vmem:[#allocation7 + $0xa18] sm:$0xff]  }
 0x434   : > { %7729 = vmatpush3.bf16.msra.mxu0 %v8602_v20  ;;  %8115 = vmatpush3.bf16.msra.mxu1 %v8603_v7  ;;  %v8658_v16 = vld [vmem:[#allocation7 + $0xa20] sm:$0xff]   ;;  %v8663_v31 = vld [vmem:[#allocation7 + $0xa58] sm:$0xff]   ;;  %v8664_v19 = vld [vmem:[#allocation7 + $0xa10] sm:$0xff]  }
 0x435   : > { %7730 = vmatprep.subr.bf16.mxu0 %v8604_v60  ;;  %8116 = vmatprep.subr.bf16.mxu1 %v8606_v17  ;;  %v8662_v7 = vld [vmem:[#allocation7 + $0x9d8] sm:$0xff]   ;;  %v8666_v20 = vld [vmem:[#allocation7 + $0xa50] sm:$0xff]  }
 0x436   : > { %v8665_v60 = vld [vmem:[#allocation7 + $0x9d0] sm:$0xff]  }
 0x438   : > { %7731 = vmatpush3.bf16.msra.mxu0 %v8605_v35  ;;  %8117 = vmatpush3.bf16.msra.mxu1 %v8606_v17  ;;  %v8667_v17 = vld [vmem:[#allocation7 + $0xa08] sm:$0xff]  }
 0x439   : > { %7732 = vmatprep.subr.bf16.mxu0 %v8607_v50  ;;  %8118 = vmatprep.subr.bf16.mxu1 %v8609_v30  ;;  %v8669_v35 = vld [vmem:[#allocation7 + $0xa48] sm:$0xff]  }
 0x43a   : > { %v8668_v50 = vld [vmem:[#allocation7 + $0x9c8] sm:$0xff]  }
 0x43c   : > { %7733 = vmatpush3.bf16.msra.mxu0 %v8608_v34  ;;  %8119 = vmatpush3.bf16.msra.mxu1 %v8609_v30  ;;  %v8670_v30 = vld [vmem:[#allocation7 + $0xa00] sm:$0xff]  }
 0x43d   : > { %7734 = vmatprep.subr.bf16.mxu0 %v8610_v46  ;;  %8120 = vmatprep.subr.bf16.mxu1 %v8612_v18  ;;  %v8672_v34 = vld [vmem:[#allocation7 + $0xa40] sm:$0xff]  }
 0x43e   : > { %v8671_v46 = vld [vmem:[#allocation7 + $0x9c0] sm:$0xff]  }
 0x440   : > { %7735 = vmatpush3.bf16.msra.mxu0 %v8611_v33  ;;  %8121 = vmatpush3.bf16.msra.mxu1 %v8612_v18  ;;  %v8676_v18 = vld [vmem:[#allocation7 + $0x978] sm:$0xff]  }
 0x441   : > { %7736 = vmatprep.subr.bf16.mxu0 %v8613_v4  ;;  %8122 = vmatprep.subr.bf16.mxu1 %v8615_v44  ;;  %v9560_v33 = vld [vmem:[#allocation7 + $0x9b8] sm:$0xff]  }
 0x444   : > { %7737 = vmatpush3.bf16.msra.mxu0 %v8614_v57  ;;  %8123 = vmatpush3.bf16.msra.mxu1 %v8615_v44 }
 0x445   : > { %7760 = vmatprep.subr.bf16.mxu0 %v8618_v62  ;;  %8124 = vmatprep.subr.bf16.mxu1 %v8619_v43 }
 0x447   : > { %4982 = vmatmul.mubr.bf16.vlgmr.msra.gmra.mxu0 %v7159_v26 }
 0x448   : > { %4989 = vmatprep.mubr.bf16.mxu0 %v9531_v0  ;;  %7761 = vmatpush3.bf16.msra.mxu0 %v8620_v36  ;;  %v8649_v0 = vld [vmem:[#allocation7 + $0xa38] sm:$0xff]  }
 0x449   : > { %8125 = vmatpush3.bf16.msra.mxu1 %v8619_v43  ;;  %7762 = vmatprep.subr.bf16.mxu0 %v8621_v54 }
 0x44a   : > { %8126 = vmatprep.subr.bf16.mxu1 %v8622_v5 }
 0x44c   : > { %7763 = vmatpush3.bf16.msra.mxu0 %v8623_v37 }
 0x44d   : > { %8127 = vmatpush3.bf16.msra.mxu1 %v8622_v5  ;;  %7764 = vmatprep.subr.bf16.mxu0 %v8625_v32 }
 0x44e   : > { %8132 = vmatprep.subr.bf16.mxu1 %v8627_v22 }
 0x44f   : > { %4990 = vmatmul.mubr.bf16.gmra.mxu0 %v9533_v52  ;;  %v8650_v52 = vld [vmem:[#allocation7 + $0x9f8] sm:$0xff]  }
 0x450   : > { %8129 = vmatmul.mubr.bf16.vlgmr.msra.gmra.mxu1 %v9541_v27  ;;  %7765 = vmatpush3.bf16.msra.mxu0 %v8626_v49  ;;  %v8654_v27 = vld [vmem:[#allocation7 + $0xa70] sm:$0xff]  }
 0x451   : > { %5312 = vmatprep.mubr.bf16.mxu0 %v9543_v11  ;;  %8133 = vmatpush3.bf16.msra.mxu1 %v8627_v22  ;;  %v8657_v11 = vld [vmem:[#allocation7 + $0xa68] sm:$0xff]  }
 0x452   : > { %8148 = vmatprep.mubr.bf16.mxu1 %v8628_v48  ;;  %7766 = vmatprep.subr.bf16.mxu0 %v8629_v42 }
 0x453   : > { %8134 = vmatprep.subr.bf16.mxu1 %v8631_v55 }
 0x454   : > { %7767 = vmatpush3.bf16.msra.mxu0 %v8630_v12 }
 0x455   : > { %8135 = vmatpush3.bf16.msra.mxu1 %v8631_v55  ;;  %7768 = vmatprep.subr.bf16.mxu0 %v8632_v2 }
 0x456   : > { %8136 = vmatprep.subr.bf16.mxu1 %v8634_v58 }
 0x458   : > { %7769 = vmatpush3.bf16.msra.mxu0 %v8633_v21 }
 0x459   : > { %8137 = vmatpush3.bf16.msra.mxu1 %v8634_v58  ;;  %7770 = vmatprep.subr.bf16.mxu0 %v8635_v3 }
 0x45a   : > { %8138 = vmatprep.subr.bf16.mxu1 %v8637_v6 }
 0x45c   : > { %7771 = vmatpush3.bf16.msra.mxu0 %v8636_v15 }
 0x45d   : > { %8139 = vmatpush3.bf16.msra.mxu1 %v8637_v6  ;;  %7772 = vmatprep.subr.bf16.mxu0 %v8638_v47 }
 0x45e   : > { %8140 = vmatprep.subr.bf16.mxu1 %v8640_v39 }
 0x460   : > { %7773 = vmatpush3.bf16.msra.mxu0 %v8639_v24 }
 0x461   : > { %8141 = vmatpush3.bf16.msra.mxu1 %v8640_v39  ;;  %7774 = vmatprep.subr.bf16.mxu0 %v8641_v59 }
 0x462   : > { %8142 = vmatprep.subr.bf16.mxu1 %v8643_v14 }
 0x464   : > { %7775 = vmatpush3.bf16.msra.mxu0 %v8642_v40 }
 0x465   : > { %8143 = vmatpush3.bf16.msra.mxu1 %v8643_v14  ;;  %7798 = vmatprep.subr.bf16.mxu0 %v8649_v0 }
 0x466   : > { %8144 = vmatprep.subr.bf16.mxu1 %v8644_v29 }
 0x467   : > { %5313 = vmatmul.mubr.bf16.vlgmr.msra.gmra.mxu0 %v9547_v10  ;;  %v8660_v10 = vld [vmem:[#allocation7 + $0xa60] sm:$0xff]  }
 0x468   : > { %5320 = vmatprep.mubr.bf16.mxu0 %v9490_v25  ;;  %7799 = vmatpush3.bf16.msra.mxu0 %v8650_v52  ;;  %v8655_v25 = vld [vmem:[#allocation7 + $0xa28] sm:$0xff]  }
 0x469   : > { %8145 = vmatpush3.bf16.msra.mxu1 %v8644_v29  ;;  %7800 = vmatprep.subr.bf16.mxu0 %v8652_v8 }
 0x46a   : > { %8146 = vmatprep.subr.bf16.mxu1 %v8645_v41 }
 0x46c   : > { %7801 = vmatpush3.bf16.msra.mxu0 %v8653_v28 }
 0x46d   : > { %8147 = vmatpush3.bf16.msra.mxu1 %v8645_v41  ;;  %7802 = vmatprep.subr.bf16.mxu0 %v8655_v25 }
 0x46e   : > { %8152 = vmatprep.subr.bf16.mxu1 %v8651_v45 }
 0x46f   : > { %5321 = vmatmul.mubr.bf16.gmra.mxu0 %v7189_v63 }
 0x470   : > { %8149 = vmatmul.mubr.bf16.vlgmr.msra.gmra.mxu1 %v9504_v51  ;;  %7803 = vmatpush3.bf16.msra.mxu0 %v8656_v38  ;;  %v8659_v51 = vld [vmem:[#allocation7 + $0x9e0] sm:$0xff]  }
 0x471   : > { %8153 = vmatpush3.bf16.msra.mxu1 %v8651_v45  ;;  %7804 = vmatprep.subr.bf16.mxu0 %v8658_v16 }
 0x472   : > { %8154 = vmatprep.subr.bf16.mxu1 %v8654_v27 }
 0x474   : > { %7805 = vmatpush3.bf16.msra.mxu0 %v8659_v51 }
 0x475   : > { %8155 = vmatpush3.bf16.msra.mxu1 %v8654_v27  ;;  %7806 = vmatprep.subr.bf16.mxu0 %v8661_v13 }
 0x476   : > { %8156 = vmatprep.subr.bf16.mxu1 %v8657_v11 }
 0x478   : > { %7807 = vmatpush3.bf16.msra.mxu0 %v8662_v7 }
 0x479   : > { %8157 = vmatpush3.bf16.msra.mxu1 %v8657_v11  ;;  %7808 = vmatprep.subr.bf16.mxu0 %v8664_v19 }
 0x47a   : > { %8158 = vmatprep.subr.bf16.mxu1 %v8660_v10 }
 0x47c   : > { %7809 = vmatpush3.bf16.msra.mxu0 %v8665_v60 }
 0x47d   : > { %8159 = vmatpush3.bf16.msra.mxu1 %v8660_v10  ;;  %7810 = vmatprep.subr.bf16.mxu0 %v8667_v17  ;;  %v7216_v17 = vld [vmem:[#allocation9 + $0x3] ss:$0 sm:$0xff] }
 0x47e   : > { %8160 = vmatprep.subr.bf16.mxu1 %v8663_v31 }
 0x480   : > { %7811 = vmatpush3.bf16.msra.mxu0 %v8668_v50 }
 0x481   : > { %8161 = vmatpush3.bf16.msra.mxu1 %v8663_v31  ;;  %7812 = vmatprep.subr.bf16.mxu0 %v8670_v30 }
 0x482   : > { %8162 = vmatprep.subr.bf16.mxu1 %v8666_v20 }
 0x484   : > { %7813 = vmatpush3.bf16.msra.mxu0 %v8671_v46 }
 0x485   : > { %8163 = vmatpush3.bf16.msra.mxu1 %v8666_v20  ;;  %7836 = vmatprep.subr.bf16.mxu0 %v8676_v18 }
 0x486   : > { %8164 = vmatprep.subr.bf16.mxu1 %v8669_v35 }
 0x489   : > { %8165 = vmatpush3.bf16.msra.mxu1 %v8669_v35 }
 0x48a   : > { %8166 = vmatprep.subr.bf16.mxu1 %v8672_v34 }
 0x48d   : > { %8167 = vmatpush3.bf16.msra.mxu1 %v8672_v34 }
 0x48e   : > { %8172 = vmatprep.subr.bf16.mxu1 %v9560_v33 }
 0x4e7   : > { %v7700_v4 = vpop.f32.mrf.mxu0 }
 0x4e9   : > { %v7701_v44 = vpop.f32.mrf.mxu0 }
 0x4ea   : > { %v7702_v59 = vadd.f32 %v7701_v44, %v7700_v4  ;;  %v7217_v4 = vld [vmem:[#allocation10 + $0x3] ss:$0 sm:$0xff] }
 0x4eb   : > { %v7703_v57 = vpop.f32.mrf.mxu0 }
 0x4ed   : > { %v7704_v1 = vpop.f32.mrf.mxu0 }
 0x4ee   : > { %v7705_v8 = vadd.f32 %v7704_v1, %v7703_v57 }
 0x4ef   : > { %v7706_v9 = vpop.f32.mrf.mxu0  ;;  %v8110_v37 = vpop.f32.mrf.mxu1 }
 0x4f1   : > { %v7707_v62 = vpop.f32.mrf.mxu0  ;;  %v4774_v22 = vpop.f32.mrf.mxu1 }
 0x4f2   : > { %v7708_v15 = vadd.f32 %v7707_v62, %v7706_v9  ;;  %v4775_v56 = vadd.f32 %v7702_v59, %v4774_v22 }
 0x4f3   : > { %v7709_v43 = vpop.f32.mrf.mxu0  ;;  %v8111_v42 = vpop.f32.mrf.mxu1 }
 0x4f4   : > { %v4783_v29 = vadd.f32 %v8110_v37, %v7708_v15 }
 0x4f5   : > { %v7710_v26 = vpop.f32.mrf.mxu0  ;;  %v4777_v48 = vpop.f32.mrf.mxu1 }
 0x4f6   : > { %v7711_v41 = vadd.f32 %v7710_v26, %v7709_v43  ;;  %v4778_v10 = vadd.f32 %v7705_v8, %v4777_v48 }
 0x4f8   : > { %v4786_v11 = vadd.f32 %v8111_v42, %v7711_v41 }
 0x507   : > { %v7738_v36 = vpop.f32.mrf.mxu0 }
 0x509   : > { %v7739_v54 = vpop.f32.mrf.mxu0 }
 0x50a   : > { %v7740_v14 = vadd.f32 %v7739_v54, %v7738_v36 }
 0x50b   : > { %v7741_v5 = vpop.f32.mrf.mxu0 }
 0x50c   : > { %v4984_v27 = vadd.f32 %v7740_v14, %v4775_v56  ;;  %v9563_v14 = vld [vmem:[#allocation2 + $0x1c] sm:$0x1] }
 0x50d   : > { %v7742_v32 = vpop.f32.mrf.mxu0 }
 0x50e   : > { %v7743_v28 = vadd.f32 %v7742_v32, %v7741_v5 }
 0x50f   : > { %v7744_v49 = vpop.f32.mrf.mxu0 }
 0x510   : > { %v8130_v2 = vpop.f32.mrf.mxu1  ;;  %v4987_v50 = vadd.f32 %v7743_v28, %v4778_v10 }
 0x511   : > { %v7745_v55 = vpop.f32.mrf.mxu0 }
 0x512   : > { %v5032_v21 = vpop.f32.mrf.mxu1  ;;  %v7746_v24 = vadd.f32 %v7745_v55, %v7744_v49 }
 0x513   : > { %v7747_v12 = vpop.f32.mrf.mxu0  ;;  %v5033_v13 = vadd.f32 %v5032_v21, %v4984_v27  ;;  %v5433_v21 = vld [vmem:[#allocation2 + $0x10] sm:$0x8] }
 0x514   : > { %v8131_v47 = vpop.f32.mrf.mxu1  ;;  %v4992_v0 = vadd.f32 %v7746_v24, %v4783_v29 }
 0x515   : > { %v7748_v58 = vpop.f32.mrf.mxu0 }
 0x516   : > { %v5035_v53 = vpop.f32.mrf.mxu1  ;;  %v7749_v52 = vadd.f32 %v7748_v58, %v7747_v12  ;;  %v5041_v19 = vadd.f32 %v8130_v2, %v4992_v0 }
 0x517   : > { %v5036_v1 = vadd.f32 %v5035_v53, %v4987_v50  ;;  %v5618_v53 = vshll.u32 %v9563_v14, 16 }
 0x518   : > { %v4995_v20 = vadd.f32 %v7749_v52, %v4786_v11 }
 0x51a   : > { %v5044_v43 = vadd.f32 %v8131_v47, %v4995_v20 }
 0x527   : > { %v7776_v3 = vpop.f32.mrf.mxu0 }
 0x529   : > { %v7777_v6 = vpop.f32.mrf.mxu0 }
 0x52a   : > { %v7778_v25 = vadd.f32 %v7777_v6, %v7776_v3  ;;  %v5436_v3 = vld [vmem:[#allocation2 + $0x20] sm:$0x8] }
 0x52b   : > { %v7779_v39 = vpop.f32.mrf.mxu0  ;;  %v5487_v24 = vshrl.u32 %v5436_v3, 16 }
 0x52d   : > { %v7780_v40 = vpop.f32.mrf.mxu0  ;;  %v7224_v41 = vrot.slane %v5487_v24, 11 }
 0x52e   : > { %v7781_v30 = vadd.f32 %v7780_v40, %v7779_v39  ;;  %v5465_v39 = vshrl.u32 %v5433_v21, 16  ;;  %v9565_v40 = vld [vmem:[#allocation2 + $0x2c] sm:$0x1] }
 0x52f   : > { %v7782_v63 = vpop.f32.mrf.mxu0  ;;  %v5642_v28 = vshll.u32 %v9565_v40, 16  ;;  %v8684_v40 = vld [vmem:[#allocation7 + $0x930] sm:$0xff]  }
 0x530   : > { %v8150_v45 = vpop.f32.mrf.mxu1  ;;  %v7223_v29 = vrot.slane %v5465_v39, 11  ;;  %v5620_v39 = vrot.slane %v5618_v53, 5 }
 0x531   : > { %v7783_v38 = vpop.f32.mrf.mxu0 }
 0x532   : > { %v7784_v16 = vadd.f32 %v7783_v38, %v7782_v63  ;;  %v5363_v51 = vpop.f32.mrf.mxu1 }
 0x533   : > { %v5364_v31 = vadd.f32 %v7778_v25, %v5363_v51  ;;  %v7785_v7 = vpop.f32.mrf.mxu0 }
 0x534   : > { %v5372_v60 = vadd.f32 %v8150_v45, %v7784_v16  ;;  %v8151_v35 = vpop.f32.mrf.mxu1 }
 0x535   : > { %v5378_v34 = vadd.f32 %v5364_v31, %v5033_v13  ;;  %v7786_v46 = vpop.f32.mrf.mxu0 }
 0x536   : > { %v5380_v18 = vadd.f32 %v5372_v60, %v5041_v19  ;;  %v7787_v44 = vadd.f32 %v7786_v46, %v7785_v7  ;;  %v5366_v57 = vpop.f32.mrf.mxu1 }
 0x537   : > { %v5390_v9 = vmul.f32 %v7216_v17, %v5378_v34  ;;  %v5367_v62 = vadd.f32 %v7781_v30, %v5366_v57 }
 0x538   : > { %v5392_v26 = vmul.f32 %v7216_v17, %v5380_v18  ;;  %v5375_v36 = vadd.f32 %v8151_v35, %v7787_v44 }
 0x539   : > { %v5402_v54 = vadd.f32 %v7217_v4, %v5390_v9  ;;  %v5379_v5 = vadd.f32 %v5367_v62, %v5036_v1 }
 0x53a   : > { %v5404_v37 = vadd.f32 %v7217_v4, %v5392_v26  ;;  %v5381_v32 = vadd.f32 %v5375_v36, %v5044_v43 }
 0x53b   : > { %v5406_v22 = vmax.f32 %v5402_v54, 0.0  ;;  %v5391_v49 = vmul.f32 %v7216_v17, %v5379_v5 }
 0x53c   : > { %v5408_v42 = vmax.f32 %v5404_v37, 0.0  ;;  %v5393_v55 = vmul.f32 %v7216_v17, %v5381_v32 }
 0x53d   : > { %v7337_v48 = vpack.c.bf16 %v5406_v22, %v5406_v22  ;;  %v5403_v12 = vadd.f32 %v7217_v4, %v5391_v49 }
 0x53e   : > { %v7339_v2 = vpack.c.bf16 %v5408_v42, %v5408_v42  ;;  %v5405_v58 = vadd.f32 %v7217_v4, %v5393_v55 }
 0x53f   : > { %5426 = vst [vmem:[#allocation2 + $0x14] sm:$0xf] %v7337_v48  ;;  %v5407_v6 = vmax.f32 %v5403_v12, 0.0 }
 0x540   : > { %5428 = vst [vmem:[#allocation2 + $0x24] sm:$0xf] %v7339_v2  ;;  %v5409_v15 = vmax.f32 %v5405_v58, 0.0 }
 0x541   : > { %v7338_v47 = vpack.c.bf16 %v5407_v6, %v5407_v6 }
 0x542   : > { %v7340_v59 = vpack.c.bf16 %v5409_v15, %v5409_v15 }
 0x543   : > { %5427 = vst [vmem:[#allocation2 + $0x18] sm:$0xf] %v7338_v47 }
 0x544   : > { %5429 = vst [vmem:[#allocation2 + $0x28] sm:$0xf] %v7340_v59 }
 0x546   : > { %v5434_v56 = vld [vmem:[#allocation2 + $0x14] sm:$0xf] }
 0x547   : > { %v5548_v63 = vld [vmem:[#allocation2 + $0x14] sm:$0xf]  ;;  %v5470_v52 = vshrl.u32 %v5434_v56, 16  ;;  %v5437_v45 = vld [vmem:[#allocation2 + $0x24] sm:$0xf]  ;;  %v5473_v27 = vshll.u32 %v5434_v56, 16 }
 0x548   : > { %v5565_v0 = vld [vmem:[#allocation2 + $0x14] sm:$0xf]  ;;  %5556 = vst [vmem:[#allocation3 + $0x1c] sm:$0xf] %v5548_v63  ;;  %v5550_v8 = vld [vmem:[#allocation2 + $0x24] sm:$0xf] }
 0x549   : > { %v5492_v25 = vshrl.u32 %v5437_v45, 16  ;;  %v5495_v38 = vshll.u32 %v5437_v45, 16  ;;  %5558 = vst [vmem:[#allocation3 + $0x34] sm:$0xf] %v5550_v8  ;;  %v5599_v11 = vshrl.u32 %v5565_v0, 16  ;;  %v5472_v51 = vrot.slane %v5470_v52, 7 }
 0x54a   : > { %v5568_v16 = vld [vmem:[#allocation2 + $0x24] sm:$0xf]  ;;  %v5602_v10 = vshll.u32 %v5565_v0, 16  ;;  %v5435_v7 = vld [vmem:[#allocation2 + $0x18] sm:$0xf]  ;;  %v5644_v0 = vrot.slane %v5642_v28, 5 }
 0x54b   : > { %v5623_v13 = vshrl.u32 %v5568_v16, 16  ;;  %v5626_v31 = vshll.u32 %v5568_v16, 16  ;;  %v5549_v19 = vld [vmem:[#allocation2 + $0x18] sm:$0xf]  ;;  %v5494_v20 = vrot.slane %v5492_v25, 7  ;;  %v5601_v60 = vrot.slane %v5599_v11, 4 }
 0x54c   : > { %v5475_v17 = vor.u32 %v5473_v27, %v5472_v51  ;;  %v5477_v35 = vrot.slane %v5472_v51, 4  ;;  %v5479_v50 = vshrl.u32 %v5435_v7, 16  ;;  %v5482_v30 = vshll.u32 %v5435_v7, 16  ;;  %5557 = vst [vmem:[#allocation3 + $0x28] sm:$0xf] %v5549_v19  ;;  %v8677_v52 = vld [vmem:[#allocation7 + $0x938] sm:$0xff]  }
 0x54d   : > { %v5438_v34 = vld [vmem:[#allocation2 + $0x28] sm:$0xf]  ;;  %v5497_v46 = vor.u32 %v5495_v38, %v5494_v20  ;;  %v5499_v18 = vrot.slane %v5494_v20, 4  ;;  %v5566_v62 = vld [vmem:[#allocation2 + $0x18] sm:$0xf]  ;;  %v5604_v43 = vrot.slane %v5602_v10, 5 }
 0x54e   : > { %v5501_v4 = vshrl.u32 %v5438_v34, 16  ;;  %v5504_v44 = vshll.u32 %v5438_v34, 16  ;;  %v5551_v57 = vld [vmem:[#allocation2 + $0x28] sm:$0xf]  ;;  %v5476_v1 = vsel %vm9136_vm4, %v7223_v29, %v5475_v17  ;;  %v5481_v9 = vrot.slane %v5479_v50, 7  ;;  %v8683_v38 = vld [vmem:[#allocation7 + $0x970] sm:$0xff]  }
 0x54f   : > { %5559 = vst [vmem:[#allocation3 + $0x40] sm:$0xf] %v5551_v57  ;;  %v5569_v26 = vld [vmem:[#allocation2 + $0x28] sm:$0xf]  ;;  %5540 = vst [vmem:[#allocation3 + $0x18] sm:$0xf] %v5476_v1  ;;  %v5498_v36 = vsel %vm9136_vm4, %v7224_v41, %v5497_v46  ;;  %v5605_v22 = vor.u32 %v5604_v43, %v5601_v60 }
 0x550   : > { %v5503_v54 = vrot.slane %v5501_v4, 7  ;;  %v5608_v5 = vshll.u32 %v5566_v62, 16  ;;  %v5612_v37 = vshrl.u32 %v5566_v62, 16  ;;  %v5484_v32 = vor.u32 %v5482_v30, %v5481_v9  ;;  %5542 = vst [vmem:[#allocation3 + $0x30] sm:$0xf] %v5498_v36  ;;  %v8686_v11 = vld [vmem:[#allocation7 + $0x968] sm:$0xff]  }
 0x551   : > { %v5625_v49 = vrot.slane %v5623_v13, 4  ;;  %v5628_v42 = vrot.slane %v5626_v31, 5  ;;  %v5632_v2 = vshll.u32 %v5569_v26, 16  ;;  %v5606_v21 = vrot.slane %v5605_v22, 4  ;;  %v8687_v10 = vld [vmem:[#allocation7 + $0x928] sm:$0xff]   ;;  %v8689_v7 = vld [vmem:[#allocation7 + $0x960] sm:$0xff]  }
 0x552   : > { %v5506_v55 = vor.u32 %v5504_v44, %v5503_v54  ;;  %v5610_v48 = vrot.slane %v5608_v5, 5  ;;  %v5614_v12 = vrot.slane %v5612_v37, 4  ;;  %v5485_v58 = vsel %vm9136_vm4, %v5477_v35, %v5484_v32  ;;  %v8706_v19 = vld [vmem:[#allocation3 + $0x4] ss:$12 sps:$4 sm:$0xff]   ;;  %v8708_v20 = vld [vmem:[#allocation3 + $0x8] ss:$12 sps:$4 sm:$0xff]  }
 0x553   : > { %v5629_v3 = vor.u32 %v5628_v42, %v5625_v49  ;;  %v5636_v6 = vshrl.u32 %v5569_v26, 16  ;;  %5541 = vst [vmem:[#allocation3 + $0x24] sm:$0xf] %v5485_v58  ;;  %v5634_v24 = vrot.slane %v5632_v2, 5  ;;  %v9587_v8 = vld [vmem:[#allocation3 + $0x1c] ss:$12 sps:$4 sm:$0xff]  }
 0x554   : > { %v5507_v15 = vsel %vm9136_vm4, %v5499_v18, %v5506_v55  ;;  %v5615_v47 = vor.u32 %v5614_v12, %v5610_v48  ;;  %v5611_v59 = vsel %vm9146_vm5, %v5606_v21, %v5610_v48  ;;  %6004 = vmatprep.mubr.bf16.mxu0 %v9587_v8  ;;  %v8688_v60 = vld [vmem:[#allocation7 + $0x9a8] sm:$0xff]   ;;  %v8690_v17 = vld [vmem:[#allocation7 + $0x920] sm:$0xff]   ;;  %v8692_v35 = vld [vmem:[#allocation7 + $0x958] sm:$0xff]  }
 0x555   : > { %5543 = vst [vmem:[#allocation3 + $0x3c] sm:$0xf] %v5507_v15  ;;  %v5630_v14 = vrot.slane %v5629_v3, 4  ;;  %v5638_v29 = vrot.slane %v5636_v6, 4  ;;  %5680 = vst [vmem:[#allocation3 + $0x20] sm:$0xf] %v5611_v59 }
 0x556   : > { %v5616_v41 = vrot.slane %v5615_v47, 4  ;;  %v9591_v25 = vld [vmem:[#allocation3 + $0x34] ss:$12 sps:$4 sm:$0xff]   ;;  %v8693_v30 = vld [vmem:[#allocation7 + $0x918] sm:$0xff]   ;;  %v8698_v18 = vld [vmem:[#allocation7 + $0x948] sm:$0xff]  }
 0x557   : > { %v5635_v56 = vsel %vm9146_vm5, %v5630_v14, %v5634_v24  ;;  %v5639_v63 = vor.u32 %v5638_v29, %v5634_v24  ;;  %v5743_v51 = vld [vmem:[#allocation3 + $0x30] sm:$0xff]  ;;  %v8691_v50 = vld [vmem:[#allocation7 + $0x9a0] sm:$0xff]   ;;  %v8699_v44 = vld [vmem:[#allocation7 + $0x908] sm:$0xff]  }
 0x558   : > { %v5621_v61 = vsel %vm9146_vm5, %v5616_v41, %v5620_v39  ;;  %5682 = vst [vmem:[#allocation3 + $0x38] sm:$0xf] %v5635_v56  ;;  %v8695_v34 = vld [vmem:[#allocation7 + $0x950] sm:$0xff]   ;;  %v8701_v57 = vld [vmem:[#allocation7 + $0x940] sm:$0xff]   ;;  %v8700_v1 = vld [vmem:[#allocation7 + $0x988] sm:$0xff]  }
 0x559   : > { %5681 = vst [vmem:[#allocation3 + $0x2c] sm:$0xf] %v5621_v61  ;;  %v5640_v53 = vrot.slane %v5639_v63, 4  ;;  %v8696_v46 = vld [vmem:[#allocation7 + $0x910] sm:$0xff]   ;;  %v8702_v9 = vld [vmem:[#allocation7 + $0x900] sm:$0xff]   ;;  %v8707_v62 = vld [vmem:[#allocation7 + $0xaf8] sm:$0xff]  }
 0x55a   : > { %v9585_v45 = vld [vmem:[#allocation3 + $0x18] ss:$12 sps:$4 sm:$0xff]   ;;  %v8697_v4 = vld [vmem:[#allocation7 + $0x990] sm:$0xff]   ;;  %v8704_v43 = vld [vmem:[#allocation3] ss:$12 sps:$4 sm:$0xff]  }
 0x55b   : > { %v5645_v27 = vsel %vm9146_vm5, %v5640_v53, %v5644_v0  ;;  %6005 = vmatmul.mubr.bf16.vlgmr.msra.gmra.mxu0 %v9585_v45  ;;  %v8703_v26 = vld [vmem:[#allocation7 + $0x980] sm:$0xff]   ;;  %v8709_v36 = vld [vmem:[#allocation7 + $0xab8] sm:$0xff]   ;;  %v8712_v54 = vld [vmem:[#allocation7 + $0xaf0] sm:$0xff]  }
 0x55c   : > { %5683 = vst [vmem:[#allocation3 + $0x44] sm:$0xf] %v5645_v27  ;;  %7837 = vmatpush3.bf16.msra.mxu0 %v8677_v52  ;;  %6012 = vmatprep.mubr.bf16.mxu0 %v9591_v25  ;;  %v5745_v16 = vld [vmem:[#allocation3 + $0x3c] sm:$0xff]  ;;  %v8713_v37 = vld [vmem:[#allocation7 + $0xab0] sm:$0xff]   ;;  %v8715_v32 = vld [vmem:[#allocation7 + $0xae8] sm:$0xff]  }
 0x55d   : > { %7838 = vmatprep.subr.bf16.mxu0 %v8683_v38  ;;  %v9599_v31 = vcombine.low %v5743_v51, %v5745_v16  ;;  %v8710_v5 = vld [vmem:[#allocation7 + $0xb38] sm:$0xff]   ;;  %v8714_v22 = vld [vmem:[#allocation7 + $0xb30] sm:$0xff]   ;;  %v8716_v42 = vld [vmem:[#allocation7 + $0xaa8] sm:$0xff]  }
 0x55e   : > { %v8718_v55 = vld [vmem:[#allocation7 + $0xae0] sm:$0xff]   ;;  %v8717_v48 = vld [vmem:[#allocation7 + $0xb28] sm:$0xff]   ;;  %v8721_v2 = vld [vmem:[#allocation7 + $0xad8] sm:$0xff]  }
 0x55f   : > { %v8719_v12 = vld [vmem:[#allocation7 + $0xaa0] sm:$0xff]   ;;  %v8722_v21 = vld [vmem:[#allocation7 + $0xa98] sm:$0xff]   ;;  %v8724_v3 = vld [vmem:[#allocation7 + $0xad0] sm:$0xff]  }
 0x560   : > { %v9596_v28 = vld [vmem:[#allocation3 + $0x20] ss:$12 sps:$4 sm:$0xff]   ;;  %7839 = vmatpush3.bf16.msra.mxu0 %v8684_v40  ;;  %v8723_v6 = vld [vmem:[#allocation7 + $0xb18] sm:$0xff]   ;;  %v8725_v15 = vld [vmem:[#allocation7 + $0xa90] sm:$0xff]  }
 0x561   : > { %8168 = vmatprep.mubr.bf16.mxu1 %v9596_v28  ;;  %7840 = vmatprep.subr.bf16.mxu0 %v8686_v11  ;;  %v8720_v58 = vld [vmem:[#allocation7 + $0xb20] sm:$0xff]   ;;  %v8727_v47 = vld [vmem:[#allocation7 + $0xac8] sm:$0xff]   ;;  %v8726_v39 = vld [vmem:[#allocation7 + $0xb10] sm:$0xff]  }
 0x562   : > { %v8728_v24 = vld [vmem:[#allocation7 + $0xa88] sm:$0xff]   ;;  %v8730_v59 = vld [vmem:[#allocation7 + $0xac0] sm:$0xff]   ;;  %v8733_v63 = vld [vmem:[#allocation3 + $0x50] ss:$12 sps:$4 sm:$0xff]  }
 0x563   : > { %v8682_v13 = vld [vmem:[#allocation3 + $0x38] ss:$12 sps:$4 sm:$0xff]   ;;  %6013 = vmatmul.mubr.bf16.gmra.mxu0 %v9599_v31  ;;  %v8729_v14 = vld [vmem:[#allocation7 + $0xb08] sm:$0xff]  }
 0x564   : > { %8169 = vmatmul.mubr.bf16.vlgmr.msra.gmra.mxu1 %v8682_v13  ;;  %7841 = vmatpush3.bf16.msra.mxu0 %v8687_v10  ;;  %v8711_v49 = vld [vmem:[#allocation3 + $0x38] ss:$12 sps:$4 sm:$0xff]   ;;  %v8734_v0 = vld [vmem:[#allocation3 + $0x48] ss:$12 sps:$4 sm:$0xff]  }
 0x565   : > { %8173 = vmatpush3.bf16.msra.mxu1 %v9560_v33  ;;  %7842 = vmatprep.subr.bf16.mxu0 %v8689_v7  ;;  %v8694_v33 = vld [vmem:[#allocation7 + $0x998] sm:$0xff]   ;;  %v8731_v29 = vld [vmem:[#allocation7 + $0xa80] sm:$0xff]  }
 0x566   : > { %8174 = vmatprep.subr.bf16.mxu1 %v8685_v23  ;;  %6262 = vmatprep.mubr.bf16.mxu0 %v8706_v19  ;;  %v8732_v41 = vld [vmem:[#allocation7 + $0xb00] sm:$0xff]   ;;  %v8736_v56 = vld [vmem:[#allocation3 + $0x4c] ss:$12 sps:$4 sm:$0xff]  }
 0x567   : > { %8188 = vmatprep.mubr.bf16.mxu1 %v8708_v20 }
 0x568   : > { %7843 = vmatpush3.bf16.msra.mxu0 %v8690_v17 }
 0x569   : > { %8175 = vmatpush3.bf16.msra.mxu1 %v8685_v23  ;;  %7844 = vmatprep.subr.bf16.mxu0 %v8692_v35 }
 0x56a   : > { %8176 = vmatprep.subr.bf16.mxu1 %v8688_v60 }
 0x56c   : > { %7845 = vmatpush3.bf16.msra.mxu0 %v8693_v30 }
 0x56d   : > { %8177 = vmatpush3.bf16.msra.mxu1 %v8688_v60  ;;  %7846 = vmatprep.subr.bf16.mxu0 %v8695_v34 }
 0x56e   : > { %8178 = vmatprep.subr.bf16.mxu1 %v8691_v50 }
 0x570   : > { %7847 = vmatpush3.bf16.msra.mxu0 %v8696_v46 }
 0x571   : > { %8179 = vmatpush3.bf16.msra.mxu1 %v8691_v50  ;;  %7848 = vmatprep.subr.bf16.mxu0 %v8698_v18 }
 0x572   : > { %8180 = vmatprep.subr.bf16.mxu1 %v8694_v33 }
 0x574   : > { %7849 = vmatpush3.bf16.msra.mxu0 %v8699_v44 }
 0x575   : > { %8181 = vmatpush3.bf16.msra.mxu1 %v8694_v33  ;;  %7850 = vmatprep.subr.bf16.mxu0 %v8701_v57 }
 0x576   : > { %8182 = vmatprep.subr.bf16.mxu1 %v8697_v4 }
 0x578   : > { %7851 = vmatpush3.bf16.msra.mxu0 %v8702_v9 }
 0x579   : > { %8183 = vmatpush3.bf16.msra.mxu1 %v8697_v4  ;;  %7874 = vmatprep.subr.bf16.mxu0 %v8707_v62 }
 0x57a   : > { %8184 = vmatprep.subr.bf16.mxu1 %v8700_v1 }
 0x57b   : > { %6263 = vmatmul.mubr.bf16.vlgmr.msra.gmra.mxu0 %v8704_v43 }
 0x57c   : > { %6270 = vmatprep.mubr.bf16.mxu0 %v9587_v8  ;;  %7875 = vmatpush3.bf16.msra.mxu0 %v8709_v36 }
 0x57d   : > { %8185 = vmatpush3.bf16.msra.mxu1 %v8700_v1  ;;  %7876 = vmatprep.subr.bf16.mxu0 %v8712_v54 }
 0x57e   : > { %8186 = vmatprep.subr.bf16.mxu1 %v8703_v26 }
 0x580   : > { %7877 = vmatpush3.bf16.msra.mxu0 %v8713_v37 }
 0x581   : > { %8187 = vmatpush3.bf16.msra.mxu1 %v8703_v26  ;;  %7878 = vmatprep.subr.bf16.mxu0 %v8715_v32 }
 0x582   : > { %8192 = vmatprep.subr.bf16.mxu1 %v8710_v5 }
 0x583   : > { %6271 = vmatmul.mubr.bf16.gmra.mxu0 %v9585_v45 }
 0x584   : > { %8189 = vmatmul.mubr.bf16.vlgmr.msra.gmra.mxu1 %v9596_v28  ;;  %7879 = vmatpush3.bf16.msra.mxu0 %v8716_v42 }
 0x585   : > { %8193 = vmatpush3.bf16.msra.mxu1 %v8710_v5  ;;  %8208 = vmatprep.mubr.bf16.mxu1 %v8711_v49 }
 0x586   : > { %8194 = vmatprep.subr.bf16.mxu1 %v8714_v22  ;;  %6593 = vmatprep.mubr.bf16.mxu0 %v9591_v25 }
 0x587   : > { %7880 = vmatprep.subr.bf16.mxu0 %v8718_v55 }
 0x588   : > { %7881 = vmatpush3.bf16.msra.mxu0 %v8719_v12 }
 0x589   : > { %8195 = vmatpush3.bf16.msra.mxu1 %v8714_v22  ;;  %7882 = vmatprep.subr.bf16.mxu0 %v8721_v2 }
 0x58a   : > { %8196 = vmatprep.subr.bf16.mxu1 %v8717_v48 }
 0x58c   : > { %7883 = vmatpush3.bf16.msra.mxu0 %v8722_v21  ;;  %v7313_v21 = vld [vmem:[#allocation9 + $0x4] ss:$0 sm:$0xff] }
 0x58d   : > { %8197 = vmatpush3.bf16.msra.mxu1 %v8717_v48  ;;  %7884 = vmatprep.subr.bf16.mxu0 %v8724_v3 }
 0x58e   : > { %8198 = vmatprep.subr.bf16.mxu1 %v8720_v58 }
 0x590   : > { %7885 = vmatpush3.bf16.msra.mxu0 %v8725_v15 }
 0x591   : > { %8199 = vmatpush3.bf16.msra.mxu1 %v8720_v58  ;;  %7886 = vmatprep.subr.bf16.mxu0 %v8727_v47 }
 0x592   : > { %8200 = vmatprep.subr.bf16.mxu1 %v8723_v6 }
 0x594   : > { %7887 = vmatpush3.bf16.msra.mxu0 %v8728_v24 }
 0x595   : > { %8201 = vmatpush3.bf16.msra.mxu1 %v8723_v6  ;;  %7888 = vmatprep.subr.bf16.mxu0 %v8730_v59  ;;  %v7314_v59 = vld [vmem:[#allocation10 + $0x4] ss:$0 sm:$0xff] }
 0x596   : > { %8202 = vmatprep.subr.bf16.mxu1 %v8726_v39 }
 0x598   : > { %7889 = vmatpush3.bf16.msra.mxu0 %v8731_v29 }
 0x599   : > { %8203 = vmatpush3.bf16.msra.mxu1 %v8726_v39 }
 0x59a   : > { %8204 = vmatprep.subr.bf16.mxu1 %v8729_v14 }
 0x59b   : > { %6594 = vmatmul.mubr.bf16.vlgmr.msra.gmra.mxu0 %v9599_v31 }
 0x59c   : > { %6601 = vmatprep.mubr.bf16.mxu0 %v8736_v56 }
 0x59d   : > { %8205 = vmatpush3.bf16.msra.mxu1 %v8729_v14 }
 0x59e   : > { %8206 = vmatprep.subr.bf16.mxu1 %v8732_v41 }
 0x5a1   : > { %8207 = vmatpush3.bf16.msra.mxu1 %v8732_v41 }
 0x5a3   : > { %6602 = vmatmul.mubr.bf16.gmra.mxu0 %v8734_v0 }
 0x5a4   : > { %8209 = vmatmul.mubr.bf16.vlgmr.msra.gmra.mxu1 %v8733_v63 }
 0x61b   : > { %v7814_v61 = vpop.f32.mrf.mxu0 }
 0x61d   : > { %v7815_v53 = vpop.f32.mrf.mxu0 }
 0x61e   : > { %v7816_v35 = vadd.f32 %v7815_v53, %v7814_v61  ;;  %v6687_v61 = vld [vmem:[%s9106_s5] sm:$0xff] }
 0x61f   : > { %v7817_v52 = vpop.f32.mrf.mxu0 }
 0x621   : > { %v7818_v45 = vpop.f32.mrf.mxu0 }
 0x622   : > { %v7819_v33 = vadd.f32 %v7818_v45, %v7817_v52 }
 0x623   : > { %v7820_v8 = vpop.f32.mrf.mxu0 }
 0x624   : > { %v8170_v11 = vpop.f32.mrf.mxu1 }
 0x625   : > { %v7821_v27 = vpop.f32.mrf.mxu0 }
 0x626   : > { %v6055_v51 = vpop.f32.mrf.mxu1  ;;  %v7822_v4 = vadd.f32 %v7821_v27, %v7820_v8 }
 0x627   : > { %v7823_v25 = vpop.f32.mrf.mxu0  ;;  %v6056_v18 = vadd.f32 %v7816_v35, %v6055_v51  ;;  %v6689_v51 = vld [vmem:[%s9106_s5 + $0x10] sm:$0xff] }
 0x628   : > { %v8171_v10 = vpop.f32.mrf.mxu1  ;;  %v6064_v37 = vadd.f32 %v8170_v11, %v7822_v4 }
 0x629   : > { %v7824_v38 = vpop.f32.mrf.mxu0 }
 0x62a   : > { %v6058_v31 = vpop.f32.mrf.mxu1  ;;  %v7825_v36 = vadd.f32 %v7824_v38, %v7823_v25 }
 0x62b   : > { %v6059_v26 = vadd.f32 %v7819_v33, %v6058_v31 }
 0x62c   : > { %v6067_v58 = vadd.f32 %v8171_v10, %v7825_v36 }
 0x63b   : > { %v7852_v40 = vpop.f32.mrf.mxu0 }
 0x63d   : > { %v7853_v28 = vpop.f32.mrf.mxu0 }
 0x63e   : > { %v7854_v34 = vadd.f32 %v7853_v28, %v7852_v40 }
 0x63f   : > { %v7855_v16 = vpop.f32.mrf.mxu0 }
 0x640   : > { %v6265_v9 = vadd.f32 %v7854_v34, %v6056_v18 }
 0x641   : > { %v7856_v23 = vpop.f32.mrf.mxu0 }
 0x642   : > { %v7857_v44 = vadd.f32 %v7856_v23, %v7855_v16  ;;  %v6688_v16 = vld [vmem:[%s9106_s5 + $0x8] sm:$0xff] }
 0x643   : > { %v7858_v13 = vpop.f32.mrf.mxu0 }
 0x644   : > { %v8190_v19 = vpop.f32.mrf.mxu1  ;;  %v6268_v32 = vadd.f32 %v7857_v44, %v6059_v26 }
 0x645   : > { %v7859_v7 = vpop.f32.mrf.mxu0 }
 0x646   : > { %v6313_v60 = vpop.f32.mrf.mxu1  ;;  %v7860_v62 = vadd.f32 %v7859_v7, %v7858_v13 }
 0x647   : > { %v7861_v20 = vpop.f32.mrf.mxu0  ;;  %v6314_v55 = vadd.f32 %v6313_v60, %v6265_v9 }
 0x648   : > { %v8191_v50 = vpop.f32.mrf.mxu1  ;;  %v6273_v48 = vadd.f32 %v7860_v62, %v6064_v37 }
 0x649   : > { %v7862_v17 = vpop.f32.mrf.mxu0 }
 0x64a   : > { %v6316_v57 = vpop.f32.mrf.mxu1  ;;  %v7863_v22 = vadd.f32 %v7862_v17, %v7861_v20  ;;  %v6322_v41 = vadd.f32 %v8190_v19, %v6273_v48  ;;  %v6690_v20 = vld [vmem:[%s9106_s5 + $0x18] sm:$0xff] }
 0x64b   : > { %v6317_v39 = vadd.f32 %v6316_v57, %v6268_v32 }
 0x64c   : > { %v6276_v24 = vadd.f32 %v7863_v22, %v6067_v58 }
 0x64e   : > { %v6325_v25 = vadd.f32 %v8191_v50, %v6276_v24 }
 0x65b   : > { %v7890_v30 = vpop.f32.mrf.mxu0 }
 0x65d   : > { %v7891_v46 = vpop.f32.mrf.mxu0 }
 0x65e   : > { %v7892_v43 = vadd.f32 %v7891_v46, %v7890_v30 }
 0x65f   : > { %v7893_v1 = vpop.f32.mrf.mxu0 }
 0x661   : > { %v7894_v5 = vpop.f32.mrf.mxu0 }
 0x662   : > { %v7895_v2 = vadd.f32 %v7894_v5, %v7893_v1 }
 0x663   : > { %v7896_v42 = vpop.f32.mrf.mxu0 }
 0x664   : > { %v8210_v54 = vpop.f32.mrf.mxu1 }
 0x665   : > { %v7897_v6 = vpop.f32.mrf.mxu0 }
 0x666   : > { %v6644_v49 = vpop.f32.mrf.mxu1  ;;  %v7898_v47 = vadd.f32 %v7897_v6, %v7896_v42 }
 0x667   : > { %v6645_v12 = vadd.f32 %v7892_v43, %v6644_v49  ;;  %v7899_v29 = vpop.f32.mrf.mxu0 }
 0x668   : > { %v8211_v3 = vpop.f32.mrf.mxu1  ;;  %v6653_v0 = vadd.f32 %v8210_v54, %v7898_v47 }
 0x669   : > { %v6659_v15 = vadd.f32 %v6645_v12, %v6314_v55  ;;  %v7900_v53 = vpop.f32.mrf.mxu0 }
 0x66a   : > { %v6647_v14 = vpop.f32.mrf.mxu1  ;;  %v6661_v8 = vadd.f32 %v6653_v0, %v6322_v41  ;;  %v7901_v27 = vadd.f32 %v7900_v53, %v7899_v29 }
 0x66b   : > { %v6671_v56 = vmul.f32 %v7313_v21, %v6659_v15  ;;  %v6648_v63 = vadd.f32 %v7895_v2, %v6647_v14 }
 0x66c   : > { %v6673_v28 = vmul.f32 %v7313_v21, %v6661_v8  ;;  %v6656_v11 = vadd.f32 %v8211_v3, %v7901_v27 }
 0x66d   : > { %v6683_v52 = vadd.f32 %v7314_v59, %v6671_v56  ;;  %v6660_v45 = vadd.f32 %v6648_v63, %v6317_v39 }
 0x66e   : > { %v6685_v10 = vadd.f32 %v7314_v59, %v6673_v28  ;;  %v6662_v13 = vadd.f32 %v6656_v11, %v6325_v25 }
 0x66f   : > { %v6691_v38 = vadd.f32 %v6687_v61, %v6683_v52  ;;  %v6672_v40 = vmul.f32 %v7313_v21, %v6660_v45 }
 0x670   : > { %v6693_v7 = vadd.f32 %v6689_v51, %v6685_v10  ;;  %v6674_v19 = vmul.f32 %v7313_v21, %v6662_v13 }
 0x671   : > { %6695 = vst [vmem:[%s259_s21] sm:$0xff] %v6691_v38  ;;  %v6684_v23 = vadd.f32 %v7314_v59, %v6672_v40 }
 0x672   : > { %6697 = vst [vmem:[%s259_s21 + $0x10] sm:$0xff] %v6693_v7  ;;  %v6686_v60 = vadd.f32 %v7314_v59, %v6674_v19 }
 0x673   : > { %v6692_v31 = vadd.f32 %v6688_v16, %v6684_v23 }
 0x674   : > { %v6694_v17 = vadd.f32 %v6690_v20, %v6686_v60 }
 0x675   : > { %6696 = vst [vmem:[%s259_s21 + $0x8] sm:$0xff] %v6692_v31 }
 0x676   : > { %6698 = vst [vmem:[%s259_s21 + $0x18] sm:$0xff] %v6694_v17 }
 0x677   : > { %8857 = shalt.err (!%p8854_p9)
}
 0x678   : > { %s8858_s13 = scalar_lea.hbm %s9618_s25, 512  ;;  %s8862_s29 = scalar_lea.hbm %s9667_s4, 1024 }
 0x679   : > { %p8859_p1 = scmp.ne.s32.totalorder %s9618_s25, %s8858_s13  ;;  %p8863_p8 = scmp.lt.s32.totalorder %s9618_s25, %s9667_s4 }
 0x67a   : > { %p8864_p5 = scmp.lt.s32.totalorder %s8862_s29, %s8858_s13 }
 0x67b   : > { %p8860_p4 = pnand %p8859_p1, %p9688_p12 }
 0x67c   : > { %p8865_p11 = por %p8864_p5, %p8863_p8 }
 0x67d   : > { %p8861_p6 = pneg %p8860_p4 }
 0x67f   : > { %p8866_p7 = pnand %p8865_p11, %p8861_p6 }
 0x681   : > { %8869 = shalt.err (!%p8866_p7)
}
 0x682   : > { %s8930_s21 = smov 128   ;;  %s8931_s23 = smov 8  }
 0x683   : > { %8226 = dma.vmem_to_hbm [thread:$0]  (%p9688_p12), %s9620_s10, 512, %s9618_s25, %s6700_s8, %s8930_s21, %s8930_s21, %s8931_s23  }
 0x684 PF: > { %s6728_s14 = sand.u32 1, %s8904_s15   ;;  %p9689_p13 = scmp.ne.s32.totalorder %s9673_s22, 0 }
 0x685   : > { %p9690_p0 = scmp.ge.s32.totalorder %s8916_s18, 2  ;;  %s6729_s20 = scalar_lea.sflag [#allocation6], %s6728_s14 }
 0x687   : > { %p8243_p3 = pnand %p9690_p0, %p9689_p13 }
 0x689   : > { %p8244_p10 = pneg %p8243_p3 }
 0x68b   : > { %8899 = dma.done.wait (%p8244_p10), %s6729_s20, 512  }
 0x68c   : > { %8901 = vsyncadd (%p8244_p10), %s6729_s20, 4294966784  ;;  %p19_p2 = scmp.ge.s32.totalorder %s9037_s24, 4   ;;  %s9691_s15 = smov %s8908_s16 }
 0x68d   : > { %s9692_s16 = smov %s8912_s17  ;;  %s9693_s17 = smov %s9055_s26 }
 0x68e   : > { %s9694_s18 = smov %s9037_s24  ;;  %21 = sbr.rel (!%p19_p2) target bundleno = 7 (0x7), region = 117 }
 0x693   :  { %6734 = vsyncpa [#allocation5], 1 }
 0x694   :  { %6736 = vsyncpa [#allocation5 + $0x1], 1 }
 0x695   :  { %6737 = vsyncpa [#allocation8], 1 }
 0x696   :  { %6738 = vsyncpa [#allocation11], 1 }
 0x697   :  { %6739 = vsyncpa [#allocation6], 1 }
 0x698   :  { %6741 = vsyncpa [#allocation6 + $0x1], 1 }

</bundles_post_ra>
